<compile_context>
chip_gen: v5e
topology: v5e:2x2
jax: 0.10.0
libtpu: 0.0.40
codegen_flags: <defaults>
</compile_context>

<pallas_src>
import functools

import jax
import jax.numpy as jnp
from jax.experimental import pallas as pl
from jax.experimental.pallas import tpu as pltpu


# ----------------------------------------------------------------------------
# Kernel: one grid step = `Bt` batch elements, full attention in-kernel.
# ----------------------------------------------------------------------------
def _attention_kernel(
    x_ref,       # (Bt, N, C)  f32
    wqkv_ref,    # (C, 3C)     bf16
    wproj_ref,   # (C, C)      bf16
    bproj_ref,   # (1, C)      f32
    o_ref,       # (Bt, N, C)  f32
    *,
    num_heads: int,
    scale: float,
):
    Bt, N, C = x_ref.shape
    hd = C // num_heads

    x = x_ref[...]                                   # (Bt, N, C) f32
    x2d = x.reshape(Bt * N, C)                       # leading-dim merge (cheap)

    # ---- QKV projection: bf16 operands, f32 accumulation on the MXU --------
    qkv = jnp.dot(x2d.astype(jnp.bfloat16), wqkv_ref[...],
                  preferred_element_type=jnp.float32)          # (Bt*N, 3C) f32
    qkv = qkv.astype(jnp.bfloat16).reshape(Bt, N, 3 * C)       # (Bt, N, 3C)

    # ---- Per-head attention (static lane slices, no transposes) ------------
    av_heads = []
    for h in range(num_heads):
        q_h = qkv[:, :, 0 * C + h * hd: 0 * C + (h + 1) * hd]  # (Bt, N, hd) bf16
        k_h = qkv[:, :, 1 * C + h * hd: 1 * C + (h + 1) * hd]
        v_h = qkv[:, :, 2 * C + h * hd: 2 * C + (h + 1) * hd]

        # scores: contract head_dim, batch over Bt  -> (Bt, N, N) f32
        s = jnp.einsum("bnd,bmd->bnm", q_h, k_h,
                       preferred_element_type=jnp.float32) * scale

        # softmax in f32; normalization via EUP reciprocal
        s = s - jnp.max(s, axis=-1, keepdims=True)
        p = jnp.exp(s)
        p = p * pl.reciprocal(jnp.sum(p, axis=-1, keepdims=True), approx=True)

        # weighted sum of values -> (Bt, N, hd) f32
        av_h = jnp.einsum("bnm,bmd->bnd", p.astype(jnp.bfloat16), v_h,
                          preferred_element_type=jnp.float32)
        av_heads.append(av_h)

    # concat heads back onto the lane axis -> lane-dense (Bt, N, C)
    av = jnp.concatenate(av_heads, axis=-1)

    # ---- Output projection --------------------------------------------------
    out = jnp.dot(av.reshape(Bt * N, C).astype(jnp.bfloat16), wproj_ref[...],
                  preferred_element_type=jnp.float32)
    out = out + bproj_ref[...]                                  # (Bt*N, C) + (1, C)

    o_ref[...] = out.reshape(Bt, N, C).astype(o_ref.dtype)


# ----------------------------------------------------------------------------
# Wrapper
# ----------------------------------------------------------------------------
def attention_forward(x, params, *, num_heads, block_b=None):
    """x: (B, H, W, C).  Returns (B, H, W, C)."""
    B, H, W, C = x.shape
    N = H * W
    head_dim = C // num_heads
    scale = head_dim ** (-0.5)

    x_flat = x.reshape(B, N, C)

    # Pick a batch tile: a few MB per block but still >= 2 grid steps when B > 1
    # so both TensorCores / the software pipeline get work.
    if block_b is None:
        bytes_per_b = N * C * x.dtype.itemsize
        block_b = max(1, min(B // 2 if B > 1 else 1,
                             (2 * 1024 * 1024) // max(1, bytes_per_b)))
        while B % block_b:
            block_b -= 1
    Bt = block_b

    # Weights stored bf16 in HBM (half the DMA bytes); bias stays f32.
    wqkv = params["wqkv"].astype(jnp.bfloat16)                  # (C, 3C)
    wproj = params["wproj"].astype(jnp.bfloat16)                # (C, C)
    bproj = params["bproj"].reshape(1, C).astype(jnp.float32)   # (1, C)

    kernel = functools.partial(_attention_kernel, num_heads=num_heads, scale=scale)

    # NOTE: best perf when C is a multiple of 128 (lane-dense x / out blocks).
    out = pl.pallas_call(
        kernel,
        out_shape=jax.ShapeDtypeStruct((B, N, C), x.dtype),
        grid_spec=pltpu.PrefetchScalarGridSpec(
            num_scalar_prefetch=0,
            grid=(B // Bt,),
            in_specs=[
                pl.BlockSpec((Bt, N, C), lambda b: (b, 0, 0)),
                pl.BlockSpec((C, 3 * C), lambda b: (0, 0)),
                pl.BlockSpec((C, C), lambda b: (0, 0)),
                pl.BlockSpec((1, C), lambda b: (0, 0)),
            ],
            out_specs=pl.BlockSpec((Bt, N, C), lambda b: (b, 0, 0)),
        ),
        compiler_params=pltpu.CompilerParams(
            dimension_semantics=("parallel",),
            vmem_limit_bytes=32 * 1024 * 1024,
        ),
        input_output_aliases={0: 0},   # x_flat is dead after the call
    )(x_flat, wqkv, wproj, bproj)

    return out.reshape(B, H, W, C)


# ----------------------------------------------------------------------------
# Pure-JAX reference (f32 throughout) for correctness check
# ----------------------------------------------------------------------------
def attention_ref(x, params, *, num_heads):
    B, H, W, C = x.shape
    N = H * W
    hd = C // num_heads
    scale = hd ** (-0.5)

    xf = x.reshape(B, N, C)
    qkv = xf @ params["wqkv"]                                   # (B, N, 3C)
    q, k, v = jnp.split(qkv, 3, axis=-1)
    q = q.reshape(B, N, num_heads, hd).transpose(0, 2, 1, 3)
    k = k.reshape(B, N, num_heads, hd).transpose(0, 2, 1, 3)
    v = v.reshape(B, N, num_heads, hd).transpose(0, 2, 1, 3)
    attn = jnp.einsum("bhnd,bhmd->bhnm", q, k) * scale
    attn = jax.nn.softmax(attn, axis=-1)
    av = jnp.einsum("bhnm,bhmd->bhnd", attn, v)
    av = av.transpose(0, 2, 1, 3).reshape(B, N, C)
    out = av @ params["wproj"] + params["bproj"]
    return out.reshape(B, H, W, C)


# ----------------------------------------------------------------------------
# Main
# ----------------------------------------------------------------------------
if __name__ == "__main__":
    # Small shapes consistent with the module (VOLO-ish but reduced):
    B, H, W, C = 4, 8, 8, 128
    num_heads = 4                      # head_dim = 32

    key = jax.random.PRNGKey(0)
    k0, k1, k2, k3 = jax.random.split(key, 4)

    params = {
        "wqkv":  jax.random.normal(k0, (C, 3 * C), jnp.float32) * 0.05,  # qkv_bias=False
        "wproj": jax.random.normal(k1, (C, C), jnp.float32) * 0.05,
        "bproj": jax.random.normal(k2, (C,), jnp.float32) * 0.01,
    }
    x = jax.random.normal(k3, (B, H, W, C), jnp.float32)

    out = attention_forward(x, params, num_heads=num_heads)
    out = jax.block_until_ready(out)

    ref = attention_ref(x, params, num_heads=num_heads)
    assert out.shape == (B, H, W, C)
    max_err = jnp.max(jnp.abs(out - ref))
    # bf16 matmul operands + approx reciprocal -> relaxed tolerance vs f32 ref.
    assert jnp.allclose(out, ref, atol=5e-2, rtol=5e-2), f"max abs err = {max_err}"

    print("KERNEL_OK")
</pallas_src>

<mosaic_0001>
module attributes {stable_mosaic.version = 11 : i64} {
  func.func @_attention_kernel(%arg0: i32, %arg1: memref<2x64x128xf32, #tpu.memory_space<vmem>>, %arg2: memref<128x384xbf16, #tpu.memory_space<vmem>>, %arg3: memref<128x128xbf16, #tpu.memory_space<vmem>>, %arg4: memref<1x128xf32, #tpu.memory_space<vmem>>, %arg5: memref<2x64x128xf32, #tpu.memory_space<vmem>>) attributes {dimension_semantics = [#tpu.dimension_semantics<parallel>], iteration_bounds = array<i64: 2>, scalar_prefetch = 0 : i64, scratch_operands = 0 : i64, tpu.core_type = #tpu.core_type<tc>, window_params = [{transform_indices = @transform_0, window_bounds = array<i64: 2, 64, 128>}, {pipeline_mode = #tpu.pipeline_mode<synchronous>, transform_indices = @transform_1, window_bounds = array<i64: 128, 384>}, {pipeline_mode = #tpu.pipeline_mode<synchronous>, transform_indices = @transform_2, window_bounds = array<i64: 128, 128>}, {pipeline_mode = #tpu.pipeline_mode<synchronous>, transform_indices = @transform_3, window_bounds = array<i64: 1, 128>}, {transform_indices = @transform_4, window_bounds = array<i64: 2, 64, 128>}]} {
    %c0 = arith.constant 0 : index
    %c0_0 = arith.constant 0 : index
    %c0_1 = arith.constant 0 : index
    %0 = vector.load %arg1[%c0, %c0_0, %c0_1] : memref<2x64x128xf32, #tpu.memory_space<vmem>>, vector<2x64x128xf32>
    %1 = vector.shape_cast %0 : vector<2x64x128xf32> to vector<128x128xf32>
    %2 = arith.truncf %1 : vector<128x128xf32> to vector<128x128xbf16>
    %c0_2 = arith.constant 0 : index
    %c0_3 = arith.constant 0 : index
    %3 = vector.load %arg2[%c0_2, %c0_3] : memref<128x384xbf16, #tpu.memory_space<vmem>>, vector<128x384xbf16>
    %cst = arith.constant dense<0.000000e+00> : vector<128x384xf32>
    %4 = tpu.matmul %2, %3, %cst {dimension_numbers = #tpu.dot_dimension_numbers<[1], [0], [0], [1], [0, 0, 1, 1], [], []>} : vector<128x128xbf16>, vector<128x384xbf16>, vector<128x384xf32> -> vector<128x384xf32>
    %5 = arith.truncf %4 : vector<128x384xf32> to vector<128x384xbf16>
    %6 = vector.shape_cast %5 : vector<128x384xbf16> to vector<2x64x384xbf16>
    %7 = vector.extract_strided_slice %6 {offsets = [0, 0, 0], sizes = [2, 64, 32], strides = [1, 1, 1]} : vector<2x64x384xbf16> to vector<2x64x32xbf16>
    %8 = vector.extract_strided_slice %6 {offsets = [0, 0, 128], sizes = [2, 64, 32], strides = [1, 1, 1]} : vector<2x64x384xbf16> to vector<2x64x32xbf16>
    %9 = vector.extract_strided_slice %6 {offsets = [0, 0, 256], sizes = [2, 64, 32], strides = [1, 1, 1]} : vector<2x64x384xbf16> to vector<2x64x32xbf16>
    "tpu.trace_start"() <{level = 10 : i32, message = "bnd,bmd->bnm"}> : () -> ()
    %cst_4 = arith.constant dense<0.000000e+00> : vector<2x64x64xf32>
    %10 = tpu.matmul %7, %8, %cst_4 {dimension_numbers = #tpu.dot_dimension_numbers<[2], [2], [1], [1], [0, 0, 0, 1, 1, 1], [0], [0]>} : vector<2x64x32xbf16>, vector<2x64x32xbf16>, vector<2x64x64xf32> -> vector<2x64x64xf32>
    "tpu.trace_stop"() : () -> ()
    %cst_5 = arith.constant 0.176776692 : f32
    %11 = vector.broadcast %cst_5 : f32 to vector<2x64x64xf32>
    %12 = arith.mulf %10, %11 : vector<2x64x64xf32>
    %cst_6 = arith.constant dense<0xFF800000> : vector<2x64xf32>
    %13 = vector.multi_reduction <maximumf>, %12, %cst_6 [2] : vector<2x64x64xf32> to vector<2x64xf32>
    %14 = vector.shape_cast %13 : vector<2x64xf32> to vector<2x64x1xf32>
    %15 = vector.broadcast %14 : vector<2x64x1xf32> to vector<2x64x64xf32>
    %16 = arith.subf %12, %15 : vector<2x64x64xf32>
    %17 = math.exp %16 : vector<2x64x64xf32>
    %cst_7 = arith.constant dense<0.000000e+00> : vector<2x64xf32>
    %18 = vector.multi_reduction <add>, %17, %cst_7 [2] : vector<2x64x64xf32> to vector<2x64xf32>
    %19 = vector.shape_cast %18 : vector<2x64xf32> to vector<2x64x1xf32>
    %20 = tpu.reciprocal %19 {approx = true} : vector<2x64x1xf32> -> vector<2x64x1xf32>
    %21 = vector.broadcast %20 : vector<2x64x1xf32> to vector<2x64x64xf32>
    %22 = arith.mulf %17, %21 : vector<2x64x64xf32>
    %23 = arith.truncf %22 : vector<2x64x64xf32> to vector<2x64x64xbf16>
    "tpu.trace_start"() <{level = 10 : i32, message = "bnm,bmd->bnd"}> : () -> ()
    %cst_8 = arith.constant dense<0.000000e+00> : vector<2x64x32xf32>
    %24 = tpu.matmul %23, %9, %cst_8 {dimension_numbers = #tpu.dot_dimension_numbers<[2], [1], [1], [2], [0, 0, 0, 1, 1, 2], [0], [0]>} : vector<2x64x64xbf16>, vector<2x64x32xbf16>, vector<2x64x32xf32> -> vector<2x64x32xf32>
    "tpu.trace_stop"() : () -> ()
    %25 = vector.extract_strided_slice %6 {offsets = [0, 0, 32], sizes = [2, 64, 32], strides = [1, 1, 1]} : vector<2x64x384xbf16> to vector<2x64x32xbf16>
    %26 = vector.extract_strided_slice %6 {offsets = [0, 0, 160], sizes = [2, 64, 32], strides = [1, 1, 1]} : vector<2x64x384xbf16> to vector<2x64x32xbf16>
    %27 = vector.extract_strided_slice %6 {offsets = [0, 0, 288], sizes = [2, 64, 32], strides = [1, 1, 1]} : vector<2x64x384xbf16> to vector<2x64x32xbf16>
    "tpu.trace_start"() <{level = 10 : i32, message = "bnd,bmd->bnm"}> : () -> ()
    %cst_9 = arith.constant dense<0.000000e+00> : vector<2x64x64xf32>
    %28 = tpu.matmul %25, %26, %cst_9 {dimension_numbers = #tpu.dot_dimension_numbers<[2], [2], [1], [1], [0, 0, 0, 1, 1, 1], [0], [0]>} : vector<2x64x32xbf16>, vector<2x64x32xbf16>, vector<2x64x64xf32> -> vector<2x64x64xf32>
    "tpu.trace_stop"() : () -> ()
    %cst_10 = arith.constant 0.176776692 : f32
    %29 = vector.broadcast %cst_10 : f32 to vector<2x64x64xf32>
    %30 = arith.mulf %28, %29 : vector<2x64x64xf32>
    %cst_11 = arith.constant dense<0xFF800000> : vector<2x64xf32>
    %31 = vector.multi_reduction <maximumf>, %30, %cst_11 [2] : vector<2x64x64xf32> to vector<2x64xf32>
    %32 = vector.shape_cast %31 : vector<2x64xf32> to vector<2x64x1xf32>
    %33 = vector.broadcast %32 : vector<2x64x1xf32> to vector<2x64x64xf32>
    %34 = arith.subf %30, %33 : vector<2x64x64xf32>
    %35 = math.exp %34 : vector<2x64x64xf32>
    %cst_12 = arith.constant dense<0.000000e+00> : vector<2x64xf32>
    %36 = vector.multi_reduction <add>, %35, %cst_12 [2] : vector<2x64x64xf32> to vector<2x64xf32>
    %37 = vector.shape_cast %36 : vector<2x64xf32> to vector<2x64x1xf32>
    %38 = tpu.reciprocal %37 {approx = true} : vector<2x64x1xf32> -> vector<2x64x1xf32>
    %39 = vector.broadcast %38 : vector<2x64x1xf32> to vector<2x64x64xf32>
    %40 = arith.mulf %35, %39 : vector<2x64x64xf32>
    %41 = arith.truncf %40 : vector<2x64x64xf32> to vector<2x64x64xbf16>
    "tpu.trace_start"() <{level = 10 : i32, message = "bnm,bmd->bnd"}> : () -> ()
    %cst_13 = arith.constant dense<0.000000e+00> : vector<2x64x32xf32>
    %42 = tpu.matmul %41, %27, %cst_13 {dimension_numbers = #tpu.dot_dimension_numbers<[2], [1], [1], [2], [0, 0, 0, 1, 1, 2], [0], [0]>} : vector<2x64x64xbf16>, vector<2x64x32xbf16>, vector<2x64x32xf32> -> vector<2x64x32xf32>
    "tpu.trace_stop"() : () -> ()
    %43 = vector.extract_strided_slice %6 {offsets = [0, 0, 64], sizes = [2, 64, 32], strides = [1, 1, 1]} : vector<2x64x384xbf16> to vector<2x64x32xbf16>
    %44 = vector.extract_strided_slice %6 {offsets = [0, 0, 192], sizes = [2, 64, 32], strides = [1, 1, 1]} : vector<2x64x384xbf16> to vector<2x64x32xbf16>
    %45 = vector.extract_strided_slice %6 {offsets = [0, 0, 320], sizes = [2, 64, 32], strides = [1, 1, 1]} : vector<2x64x384xbf16> to vector<2x64x32xbf16>
    "tpu.trace_start"() <{level = 10 : i32, message = "bnd,bmd->bnm"}> : () -> ()
    %cst_14 = arith.constant dense<0.000000e+00> : vector<2x64x64xf32>
    %46 = tpu.matmul %43, %44, %cst_14 {dimension_numbers = #tpu.dot_dimension_numbers<[2], [2], [1], [1], [0, 0, 0, 1, 1, 1], [0], [0]>} : vector<2x64x32xbf16>, vector<2x64x32xbf16>, vector<2x64x64xf32> -> vector<2x64x64xf32>
    "tpu.trace_stop"() : () -> ()
    %cst_15 = arith.constant 0.176776692 : f32
    %47 = vector.broadcast %cst_15 : f32 to vector<2x64x64xf32>
    %48 = arith.mulf %46, %47 : vector<2x64x64xf32>
    %cst_16 = arith.constant dense<0xFF800000> : vector<2x64xf32>
    %49 = vector.multi_reduction <maximumf>, %48, %cst_16 [2] : vector<2x64x64xf32> to vector<2x64xf32>
    %50 = vector.shape_cast %49 : vector<2x64xf32> to vector<2x64x1xf32>
    %51 = vector.broadcast %50 : vector<2x64x1xf32> to vector<2x64x64xf32>
    %52 = arith.subf %48, %51 : vector<2x64x64xf32>
    %53 = math.exp %52 : vector<2x64x64xf32>
    %cst_17 = arith.constant dense<0.000000e+00> : vector<2x64xf32>
    %54 = vector.multi_reduction <add>, %53, %cst_17 [2] : vector<2x64x64xf32> to vector<2x64xf32>
    %55 = vector.shape_cast %54 : vector<2x64xf32> to vector<2x64x1xf32>
    %56 = tpu.reciprocal %55 {approx = true} : vector<2x64x1xf32> -> vector<2x64x1xf32>
    %57 = vector.broadcast %56 : vector<2x64x1xf32> to vector<2x64x64xf32>
    %58 = arith.mulf %53, %57 : vector<2x64x64xf32>
    %59 = arith.truncf %58 : vector<2x64x64xf32> to vector<2x64x64xbf16>
    "tpu.trace_start"() <{level = 10 : i32, message = "bnm,bmd->bnd"}> : () -> ()
    %cst_18 = arith.constant dense<0.000000e+00> : vector<2x64x32xf32>
    %60 = tpu.matmul %59, %45, %cst_18 {dimension_numbers = #tpu.dot_dimension_numbers<[2], [1], [1], [2], [0, 0, 0, 1, 1, 2], [0], [0]>} : vector<2x64x64xbf16>, vector<2x64x32xbf16>, vector<2x64x32xf32> -> vector<2x64x32xf32>
    "tpu.trace_stop"() : () -> ()
    %61 = vector.extract_strided_slice %6 {offsets = [0, 0, 96], sizes = [2, 64, 32], strides = [1, 1, 1]} : vector<2x64x384xbf16> to vector<2x64x32xbf16>
    %62 = vector.extract_strided_slice %6 {offsets = [0, 0, 224], sizes = [2, 64, 32], strides = [1, 1, 1]} : vector<2x64x384xbf16> to vector<2x64x32xbf16>
    %63 = vector.extract_strided_slice %6 {offsets = [0, 0, 352], sizes = [2, 64, 32], strides = [1, 1, 1]} : vector<2x64x384xbf16> to vector<2x64x32xbf16>
    "tpu.trace_start"() <{level = 10 : i32, message = "bnd,bmd->bnm"}> : () -> ()
    %cst_19 = arith.constant dense<0.000000e+00> : vector<2x64x64xf32>
    %64 = tpu.matmul %61, %62, %cst_19 {dimension_numbers = #tpu.dot_dimension_numbers<[2], [2], [1], [1], [0, 0, 0, 1, 1, 1], [0], [0]>} : vector<2x64x32xbf16>, vector<2x64x32xbf16>, vector<2x64x64xf32> -> vector<2x64x64xf32>
    "tpu.trace_stop"() : () -> ()
    %cst_20 = arith.constant 0.176776692 : f32
    %65 = vector.broadcast %cst_20 : f32 to vector<2x64x64xf32>
    %66 = arith.mulf %64, %65 : vector<2x64x64xf32>
    %cst_21 = arith.constant dense<0xFF800000> : vector<2x64xf32>
    %67 = vector.multi_reduction <maximumf>, %66, %cst_21 [2] : vector<2x64x64xf32> to vector<2x64xf32>
    %68 = vector.shape_cast %67 : vector<2x64xf32> to vector<2x64x1xf32>
    %69 = vector.broadcast %68 : vector<2x64x1xf32> to vector<2x64x64xf32>
    %70 = arith.subf %66, %69 : vector<2x64x64xf32>
    %71 = math.exp %70 : vector<2x64x64xf32>
    %cst_22 = arith.constant dense<0.000000e+00> : vector<2x64xf32>
    %72 = vector.multi_reduction <add>, %71, %cst_22 [2] : vector<2x64x64xf32> to vector<2x64xf32>
    %73 = vector.shape_cast %72 : vector<2x64xf32> to vector<2x64x1xf32>
    %74 = tpu.reciprocal %73 {approx = true} : vector<2x64x1xf32> -> vector<2x64x1xf32>
    %75 = vector.broadcast %74 : vector<2x64x1xf32> to vector<2x64x64xf32>
    %76 = arith.mulf %71, %75 : vector<2x64x64xf32>
    %77 = arith.truncf %76 : vector<2x64x64xf32> to vector<2x64x64xbf16>
    "tpu.trace_start"() <{level = 10 : i32, message = "bnm,bmd->bnd"}> : () -> ()
    %cst_23 = arith.constant dense<0.000000e+00> : vector<2x64x32xf32>
    %78 = tpu.matmul %77, %63, %cst_23 {dimension_numbers = #tpu.dot_dimension_numbers<[2], [1], [1], [2], [0, 0, 0, 1, 1, 2], [0], [0]>} : vector<2x64x64xbf16>, vector<2x64x32xbf16>, vector<2x64x32xf32> -> vector<2x64x32xf32>
    "tpu.trace_stop"() : () -> ()
    %79 = tpu.concatenate %24, %42, %60, %78 in 2 : vector<2x64x32xf32>, vector<2x64x32xf32>, vector<2x64x32xf32>, vector<2x64x32xf32> -> vector<2x64x128xf32>
    %80 = vector.shape_cast %79 : vector<2x64x128xf32> to vector<128x128xf32>
    %81 = arith.truncf %80 : vector<128x128xf32> to vector<128x128xbf16>
    %c0_24 = arith.constant 0 : index
    %c0_25 = arith.constant 0 : index
    %82 = vector.load %arg3[%c0_24, %c0_25] : memref<128x128xbf16, #tpu.memory_space<vmem>>, vector<128x128xbf16>
    %cst_26 = arith.constant dense<0.000000e+00> : vector<128x128xf32>
    %83 = tpu.matmul %81, %82, %cst_26 {dimension_numbers = #tpu.dot_dimension_numbers<[1], [0], [0], [1], [0, 0, 1, 1], [], []>} : vector<128x128xbf16>, vector<128x128xbf16>, vector<128x128xf32> -> vector<128x128xf32>
    %c0_27 = arith.constant 0 : index
    %c0_28 = arith.constant 0 : index
    %84 = vector.load %arg4[%c0_27, %c0_28] : memref<1x128xf32, #tpu.memory_space<vmem>>, vector<1x128xf32>
    %85 = vector.broadcast %84 : vector<1x128xf32> to vector<128x128xf32>
    %86 = arith.addf %83, %85 : vector<128x128xf32>
    %87 = vector.shape_cast %86 : vector<128x128xf32> to vector<2x64x128xf32>
    %c0_29 = arith.constant 0 : index
    %c0_30 = arith.constant 0 : index
    %c0_31 = arith.constant 0 : index
    %88 = vector.load %arg5[%c0_29, %c0_30, %c0_31] : memref<2x64x128xf32, #tpu.memory_space<vmem>>, vector<2x64x128xf32>
    tpu.vector_store %arg5[%c0_29, %c0_30, %c0_31], %87 {strides = array<i32>} : memref<2x64x128xf32, #tpu.memory_space<vmem>>, vector<2x64x128xf32>,
    return
  }
  func.func @transform_0(%arg0: i32) -> (i32, i32, i32) {
    %c0_i32 = arith.constant 0 : i32
    %c0_i32_0 = arith.constant 0 : i32
    %c0_i32_1 = arith.constant 0 : i32
    return %arg0, %c0_i32, %c0_i32_0 : i32, i32, i32
  }
  func.func @transform_1(%arg0: i32) -> (i32, i32) {
    %c0_i32 = arith.constant 0 : i32
    %c0_i32_0 = arith.constant 0 : i32
    %c0_i32_1 = arith.constant 0 : i32
    return %c0_i32, %c0_i32_0 : i32, i32
  }
  func.func @transform_2(%arg0: i32) -> (i32, i32) {
    %c0_i32 = arith.constant 0 : i32
    %c0_i32_0 = arith.constant 0 : i32
    %c0_i32_1 = arith.constant 0 : i32
    return %c0_i32, %c0_i32_0 : i32, i32
  }
  func.func @transform_3(%arg0: i32) -> (i32, i32) {
    %c0_i32 = arith.constant 0 : i32
    %c0_i32_0 = arith.constant 0 : i32
    %c0_i32_1 = arith.constant 0 : i32
    return %c0_i32, %c0_i32_0 : i32, i32
  }
  func.func @transform_4(%arg0: i32) -> (i32, i32, i32) {
    %c0_i32 = arith.constant 0 : i32
    %c0_i32_0 = arith.constant 0 : i32
    %c0_i32_1 = arith.constant 0 : i32
    return %arg0, %c0_i32, %c0_i32_0 : i32, i32, i32
  }
}

</mosaic_0001>

<bundles_post_ra>
// kernel: tpu_custom_call.1
= control target key start
LH: loop header
LB: loop body
LE: loop exit
PB: predicated region body
PF: predicated region fallthrough
CT: control target
= control target key end

     0   :  { %9 = vsyncpa [#allocation3], 0  ;;  %s5954_s0 = inlined_call_operand.hbm [shape: f32[4,64,128], index: 0, kind: input, shape index: {}, may-alias: {0,4}]   ;;  %s5955_s1 = inlined_call_operand.vmem [shape: bf16[128,384], index: 1, kind: input, shape index: {}]   ;;  %s5956_s2 = inlined_call_operand.vmem [shape: bf16[128,128], index: 2, kind: input, shape index: {}]   ;;  %s5957_s3 = inlined_call_operand.vmem [shape: f32[1,128], index: 3, kind: input, shape index: {}]   ;;  %s5958_s4 = inlined_call_operand.hbm [shape: f32[4,64,128], index: 4, kind: output, shape index: {}, may-alias: {0,4}]  }
   0x1   :  { %11 = vsyncpa [#allocation3 + $0x1], 0 }
   0x2   :  { %12 = vsyncpa [#allocation4], 0 }
   0x3   :  { %14 = vsyncpa [#allocation4 + $0x1], 0  ;;  %s4079_s15 = smov 0   ;;  %s4081_s16 = smov 0  }
   0x4   :  { %s4083_s17 = smov 0   ;;  %s4085_s18 = smov 0  }
   0x5 LB: > { %s4100_s19 = sadd.s32 4294967295, %s4045_s18   ;;  %s3267_s20 = sadd.s32 4294967294, %s4045_s18   ;;  %s4045_s18 = sphi %s4085_s18, %s6008_s18   ;;  %s4041_s17 = sphi %s4083_s17, %s6007_s17   ;;  %s4037_s16 = sphi %s4081_s16, %s6006_s16   ;;  %s4033_s15 = sphi %s4079_s15, %s6005_s15  }
   0x6   : > { %s4104_s21 = sadd.s32 1, %s4045_s18   ;;  %s27_s22 = sadd.s32 1, %s4041_s17 }
   0x7   : > { %s24_s23 = ssub.s32 %s4045_s18, %s4104_s21  ;;  %p34_p0 = scmp.ne.s32.totalorder %s4041_s17, %s4037_s16 }
   0x8   : > { %p25_p1 = scmp.eq.s32.totalorder %s24_s23, 0  ;;  %p35_p2 = scmp.eq.s32.totalorder %s4045_s18, 0 }
   0x9   : > { %p40_p3 = scmp.ne.s32.totalorder %s4037_s16, %s4033_s15  ;;  %p41_p4 = scmp.eq.s32.totalorder %s4100_s19, 0 }
   0xa   : > { %s4116_s24 = scalar_select %p25_p1, %s4041_s17, %s27_s22  }
   0xb   : > { %p4118_p5 = por %p35_p2, %p34_p0  ;;  %p4122_p6 = por %p41_p4, %p40_p3 }
   0xc   : > { %p127_p7 = scmp.eq.s32.totalorder %s4100_s19, 1  ;;  %p133_p8 = scmp.eq.s32.totalorder %s3267_s20, 1 }
   0xd   : > { %p3531_p10 = scmp.lt.s32.totalorder %s4045_s18, 2  ;;  %s162_s29 = sand.u32 1, %s4041_s17  }
   0xe   : > { %p4129_p11 = por %p127_p7, %p34_p0  ;;  %p4133_p12 = por %p133_p8, %p40_p3 }
   0xf   : > { %s3476_s30 = sshll.u32 %s4045_s18, 7  ;;  %s3270_s5 = sshll.u32 %s162_s29, 7 }
  0x10   : > { %s172_s8 = scalar_lea.hbm %s5954_s0, %s3476_s30  ;;  %s166_s10 = scalar_lea.vmem [#allocation2], %s3270_s5 }
  0x11   : > { %s173_s9 = sshll.u32 %s172_s8, 4  ;;  %s175_s11 = sshll.u32 %s166_s10, 4  ;;  %s174_s9 = int_to_ptr.hbm [resolvable:$true] %s173_s9  ;;  %s176_s11 = int_to_ptr.vmem [resolvable:$true] %s175_s11 }
  0x12   : > { %p4144_p13 = pnand %p3531_p10, %p4118_p5  ;;  %p3274_p0 = scmp.ge.s32.totalorder %s4045_s18, 1 }
  0x13   : > { %p183_p1 = scmp.lt.s32.totalorder %s4045_s18, 3  ;;  %s163_s13 = scalar_lea.sflag [#allocation3], %s162_s29 }
  0x14   : > { %s3949_s14 = sshra.s32 %s174_s9, 4  ;;  %p3953_p3 = pneg %p4144_p13  ;;  %s3950_s14 = int_to_ptr.hbm [resolvable:$true] %s3949_s14 }
  0x15   : > { %s3951_s20 = scalar_lea.hbm %s3950_s14, 128  ;;  %s3956_s25 = scalar_lea.hbm %s5954_s0, 256 }
  0x16   : > { %p3952_p2 = scmp.ne.s32.totalorder %s3950_s14, %s3951_s20  ;;  %p3957_p5 = scmp.lt.s32.totalorder %s3950_s14, %s5954_s0 }
  0x17   : > { %p3958_p8 = scmp.lt.s32.totalorder %s3956_s25, %s3951_s20 }
  0x18   : > { %p3954_p4 = pnand %p3953_p3, %p3952_p2 }
  0x19   : > { %p3959_p10 = por %p3958_p8, %p3957_p5 }
  0x1a   : > { %p3955_p7 = pneg %p3954_p4 }
  0x1c   : > { %p3960_p9 = pnand %p3959_p10, %p3955_p7 }
  0x1e   : > { %3963 = shalt.err (!%p3960_p9)
}
  0x1f   : > { %s4047_s29 = smov 128   ;;  %s4048_s6 = smov 8  }
  0x20   : > { %3526 = dma.hbm_to_vmem [thread:$0]  (!%p4144_p13), %s174_s9, 2048, %s176_s11, %s163_s13, %s4047_s29, %s4047_s29, %s4048_s6  }
  0x21   : > { %p184_p2 = pnand %p3274_p0, %p183_p1 }
  0x23   : > { %187 = sbr.rel (%p184_p2) target bundleno = 1845 (0x735), region = 36 }
  0x28   : > { %s4165_s7 = sand.u32 1, %s4037_s16  }
  0x29   : > { %s3275_s8 = sshll.u32 %s4165_s7, 7  ;;  %s190_s10 = scalar_lea.sflag [#allocation3], %s4165_s7 }
  0x2a   : > { %s4171_s14 = scalar_lea.vmem [#allocation2], %s3275_s8 }
  0x2b   : > { %4024 = dma.done.wait (%p4122_p6), %s190_s10, 2048  }
  0x2c   : > { %4026 = vsyncadd (%p4122_p6), %s190_s10, 4294965248  ;;  %v3363_v0 = vld [vmem:[%s5955_s1 + $0xa8] sm:$0xf]  ;;  %v3499_v1 = vld [vmem:[%s5955_s1 + $0xb0] sm:$0xf0]  ;;  %s4049_s6 = smov 96  }
  0x2d   : > { %v3498_v2 = vld [vmem:[%s5955_s1 + $0xac] sm:$0xf]  ;;  %v3364_v3 = vor.u32 %v3499_v1, %v3363_v0  ;;  %v3365_v4 = vld [vmem:[%s5955_s1 + $0xb4] sm:$0xf0]  ;;  %v3371_v5 = vld [vmem:[%s5955_s1 + $0xb0] sm:$0xf] }
  0x2e   : > { %v3500_v6 = vld [vmem:[%s5955_s1 + $0xb8] sm:$0xf0]  ;;  %v3368_v7 = vor.u32 %v3498_v2, %v3365_v4  ;;  %v3351_v9 = vld [vmem:[%s5955_s1 + $0x90] sm:$0xf]  ;;  %v3495_v11 = vld [vmem:[%s5955_s1 + $0x94] sm:$0xf] }
  0x2f   : > { %v3372_v8 = vor.u32 %v3500_v6, %v3371_v5  ;;  %v3496_v10 = vld [vmem:[%s5955_s1 + $0x98] sm:$0xf0]  ;;  %406 = vmatpush.bf16.msra.mxu0 %v3364_v3  ;;  %v3353_v13 = vld [vmem:[%s5955_s1 + $0x9c] sm:$0xf0]  ;;  %v3359_v14 = vld [vmem:[%s5955_s1 + $0x98] sm:$0xf] }
  0x30   : > { %v3352_v12 = vor.u32 %v3496_v10, %v3351_v9  ;;  %v3497_v15 = vld [vmem:[%s5955_s1 + $0xa0] sm:$0xf0]  ;;  %455 = vmatpush.bf16.msra.mxu1 %v3368_v7  ;;  %v3356_v16 = vor.u32 %v3495_v11, %v3353_v13  ;;  %v3339_v18 = vld [vmem:[%s5955_s1 + $0x78] sm:$0xf]  ;;  %v3492_v20 = vld [vmem:[%s5955_s1 + $0x7c] sm:$0xf] }
  0x31   : > { %504 = vmatpush.bf16.msra.mxu2 %v3372_v8  ;;  %v3360_v17 = vor.u32 %v3497_v15, %v3359_v14  ;;  %v3493_v19 = vld [vmem:[%s5955_s1 + $0x80] sm:$0xf0]  ;;  %v3341_v21 = vld [vmem:[%s5955_s1 + $0x84] sm:$0xf0]  ;;  %v3347_v22 = vld [vmem:[%s5955_s1 + $0x80] sm:$0xf]  ;;  %3511 = vmatpush.bf16.msra.mxu3 %v3372_v8 }
  0x32   : > { %v3494_v23 = vld [vmem:[%s5955_s1 + $0x88] sm:$0xf0]  ;;  %v3340_v24 = vor.u32 %v3493_v19, %v3339_v18  ;;  %v3344_v25 = vor.u32 %v3492_v20, %v3341_v21  ;;  %v3327_v27 = vld [vmem:[%s5955_s1 + $0x60] sm:$0xf]  ;;  %v3489_v29 = vld [vmem:[%s5955_s1 + $0x64] sm:$0xf] }
  0x33   : > { %407 = vmatpush.bf16.msra.mxu0 %v3352_v12  ;;  %v3348_v26 = vor.u32 %v3494_v23, %v3347_v22  ;;  %v3490_v28 = vld [vmem:[%s5955_s1 + $0x68] sm:$0xf0]  ;;  %v3329_v30 = vld [vmem:[%s5955_s1 + $0x6c] sm:$0xf0]  ;;  %v3335_v31 = vld [vmem:[%s5955_s1 + $0x68] sm:$0xf] }
  0x34   : > { %456 = vmatpush.bf16.msra.mxu1 %v3356_v16  ;;  %v3491_v32 = vld [vmem:[%s5955_s1 + $0x70] sm:$0xf0]  ;;  %v3328_v33 = vor.u32 %v3490_v28, %v3327_v27  ;;  %v3332_v34 = vor.u32 %v3489_v29, %v3329_v30  ;;  %v3315_v36 = vld [vmem:[%s5955_s1 + $0x48] sm:$0xf]  ;;  %v3486_v38 = vld [vmem:[%s5955_s1 + $0x4c] sm:$0xf] }
  0x35   : > { %505 = vmatpush.bf16.msra.mxu2 %v3360_v17  ;;  %3512 = vmatpush.bf16.msra.mxu3 %v3360_v17  ;;  %v3336_v35 = vor.u32 %v3491_v32, %v3335_v31  ;;  %v3487_v37 = vld [vmem:[%s5955_s1 + $0x50] sm:$0xf0]  ;;  %v3317_v39 = vld [vmem:[%s5955_s1 + $0x54] sm:$0xf0]  ;;  %v3323_v40 = vld [vmem:[%s5955_s1 + $0x50] sm:$0xf] }
  0x36   : > { %v3488_v41 = vld [vmem:[%s5955_s1 + $0x58] sm:$0xf0]  ;;  %v3316_v42 = vor.u32 %v3487_v37, %v3315_v36  ;;  %v3303_v43 = vld [vmem:[%s5955_s1 + $0x30] sm:$0xf]  ;;  %v3320_v44 = vor.u32 %v3486_v38, %v3317_v39  ;;  %v3483_v47 = vld [vmem:[%s5955_s1 + $0x34] sm:$0xf] }
  0x37   : > { %408 = vmatpush.bf16.msra.mxu0 %v3340_v24  ;;  %v3324_v45 = vor.u32 %v3488_v41, %v3323_v40  ;;  %v3484_v46 = vld [vmem:[%s5955_s1 + $0x38] sm:$0xf0]  ;;  %v3305_v48 = vld [vmem:[%s5955_s1 + $0x3c] sm:$0xf0]  ;;  %v3311_v49 = vld [vmem:[%s5955_s1 + $0x38] sm:$0xf] }
  0x38   : > { %457 = vmatpush.bf16.msra.mxu1 %v3344_v25  ;;  %v3485_v50 = vld [vmem:[%s5955_s1 + $0x40] sm:$0xf0]  ;;  %v3304_v51 = vor.u32 %v3484_v46, %v3303_v43  ;;  %v3308_v52 = vor.u32 %v3483_v47, %v3305_v48  ;;  %v3291_v54 = vld [vmem:[%s5955_s1 + $0x18] sm:$0xf]  ;;  %v3480_v56 = vld [vmem:[%s5955_s1 + $0x1c] sm:$0xf] }
  0x39   : > { %506 = vmatpush.bf16.msra.mxu2 %v3348_v26  ;;  %3513 = vmatpush.bf16.msra.mxu3 %v3348_v26  ;;  %v3312_v53 = vor.u32 %v3485_v50, %v3311_v49  ;;  %v3481_v55 = vld [vmem:[%s5955_s1 + $0x20] sm:$0xf0]  ;;  %v3293_v57 = vld [vmem:[%s5955_s1 + $0x24] sm:$0xf0]  ;;  %v3299_v58 = vld [vmem:[%s5955_s1 + $0x20] sm:$0xf] }
  0x3a   : > { %v3482_v59 = vld [vmem:[%s5955_s1 + $0x28] sm:$0xf0]  ;;  %v3292_v60 = vor.u32 %v3481_v55, %v3291_v54  ;;  %v3296_v61 = vor.u32 %v3480_v56, %v3293_v57  ;;  %v3279_v63 = vld [vmem:[%s5955_s1] sm:$0xf]  ;;  %v3477_v1 = vld [vmem:[%s5955_s1 + $0x4] sm:$0xf] }
  0x3b   : > { %409 = vmatpush.bf16.msra.mxu0 %v3328_v33  ;;  %v3300_v62 = vor.u32 %v3482_v59, %v3299_v58  ;;  %v3478_v0 = vld [vmem:[%s5955_s1 + $0x8] sm:$0xf0]  ;;  %v3281_v2 = vld [vmem:[%s5955_s1 + $0xc] sm:$0xf0]  ;;  %v3287_v3 = vld [vmem:[%s5955_s1 + $0x8] sm:$0xf] }
  0x3c   : > { %458 = vmatpush.bf16.msra.mxu1 %v3332_v34  ;;  %v3479_v4 = vld [vmem:[%s5955_s1 + $0x10] sm:$0xf0]  ;;  %v3280_v5 = vor.u32 %v3478_v0, %v3279_v63  ;;  %v222_v6 = vld [vmem:[%s4171_s14] sm:$0xff]  ;;  %v223_v7 = vld [vmem:[%s4171_s14 + $0x8] sm:$0xff]  ;;  %v3284_v8 = vor.u32 %v3477_v1, %v3281_v2  ;;  %s4051_s10 = smov 32   ;;  %vm625_vm0 = vcmask 261120  }
  0x3d   : > { %507 = vmatpush.bf16.msra.mxu2 %v3336_v35  ;;  %3514 = vmatpush.bf16.msra.mxu3 %v3336_v35  ;;  %v3288_v9 = vor.u32 %v3479_v4, %v3287_v3  ;;  %v230_v10 = vld [vmem:[%s4171_s14 + $0x40] sm:$0xff]  ;;  %v231_v11 = vld [vmem:[%s4171_s14 + $0x48] sm:$0xff]  ;;  %v238_v12 = vpack.c.bf16 %v223_v7, %v222_v6  ;;  %v224_v14 = vld [vmem:[%s4171_s14 + $0x10] sm:$0xff]  ;;  %vm788_vm1 = vcmask 523264   ;;  %vm3019_vm2 = vcmask 785408   ;;  %s5853_s20 = scalar_lea.vmem [#allocation5], %s3275_s8 }
  0x3e   : > { %v242_v13 = vpack.c.bf16 %v231_v11, %v230_v10  ;;  %v225_v15 = vld [vmem:[%s4171_s14 + $0x18] sm:$0xff]  ;;  %v232_v16 = vld [vmem:[%s4171_s14 + $0x50] sm:$0xff]  ;;  %v226_v20 = vld [vmem:[%s4171_s14 + $0x20] sm:$0xff]  ;;  %s3510_s8 = sshll.u32 %s4100_s19, 7  ;;  %s3191_s25 = sshll.u32 %s5853_s20, 4  ;;  %s3192_s25 = int_to_ptr.vmem [resolvable:$true] %s3191_s25 }
  0x3f   : > { %410 = vmatpush.bf16.msra.mxu0 %v3316_v42  ;;  %v233_v17 = vld [vmem:[%s4171_s14 + $0x58] sm:$0xff]  ;;  %v239_v18 = vpack.c.bf16 %v225_v15, %v224_v14  ;;  %v227_v21 = vld [vmem:[%s4171_s14 + $0x28] sm:$0xff]  ;;  %v234_v22 = vld [vmem:[%s4171_s14 + $0x60] sm:$0xff]  ;;  %s3190_s23 = scalar_lea.hbm %s5958_s4, %s3510_s8  ;;  %s3178_s26 = scalar_lea.sflag [#allocation4], %s4165_s7 }
  0x40   : > { %459 = vmatpush.bf16.msra.mxu1 %v3320_v44  ;;  %v243_v19 = vpack.c.bf16 %v233_v17, %v232_v16  ;;  %v235_v23 = vld [vmem:[%s4171_s14 + $0x68] sm:$0xff]  ;;  %v240_v24 = vpack.c.bf16 %v227_v21, %v226_v20  ;;  %v228_v26 = vld [vmem:[%s4171_s14 + $0x30] sm:$0xff]  ;;  %v229_v27 = vld [vmem:[%s4171_s14 + $0x38] sm:$0xff]  ;;  %s3193_s30 = sshll.u32 %s3190_s23, 4  ;;  %s3999_s9 = scalar_lea.hbm %s5958_s4, 256  ;;  %s3194_s30 = int_to_ptr.hbm [resolvable:$true] %s3193_s30 }
  0x41   : > { %508 = vmatpush.bf16.msra.mxu2 %v3324_v45  ;;  %3515 = vmatpush.bf16.msra.mxu3 %v3324_v45  ;;  %v244_v25 = vpack.c.bf16 %v235_v23, %v234_v22  ;;  %v236_v28 = vld [vmem:[%s4171_s14 + $0x70] sm:$0xff]  ;;  %v237_v29 = vld [vmem:[%s4171_s14 + $0x78] sm:$0xff]  ;;  %v241_v30 = vpack.c.bf16 %v229_v27, %v228_v26  ;;  %s4050_s14 = smov 64   ;;  %s3993_s5 = sshra.s32 %s3194_s30, 4  ;;  %s3994_s5 = int_to_ptr.hbm [resolvable:$true] %s3993_s5 }
  0x42   : > { %v245_v31 = vpack.c.bf16 %v237_v29, %v236_v28  ;;  %s3995_s19 = scalar_lea.hbm %s3994_s5, 128  ;;  %p4000_p0 = scmp.lt.s32.totalorder %s3994_s5, %s5958_s4 }
  0x43   : > { %411 = vmatpush.bf16.msra.mxu0 %v3304_v51  ;;  %p3996_p6 = scmp.ne.s32.totalorder %s3994_s5, %s3995_s19  ;;  %p4001_p1 = scmp.lt.s32.totalorder %s3999_s9, %s3995_s19 }
  0x44   : > { %460 = vmatpush.bf16.msra.mxu1 %v3308_v52 }
  0x45   : > { %509 = vmatpush.bf16.msra.mxu2 %v3312_v53  ;;  %3516 = vmatpush.bf16.msra.mxu3 %v3312_v53  ;;  %p3997_p9 = pnand %p3996_p6, %p4129_p11  ;;  %p4002_p3 = por %p4001_p1, %p4000_p0 }
  0x47   : > { %412 = vmatpush.bf16.msra.mxu0 %v3292_v60  ;;  %p3998_p13 = pneg %p3997_p9 }
  0x48   : > { %461 = vmatpush.bf16.msra.mxu1 %v3296_v61 }
  0x49   : > { %510 = vmatpush.bf16.msra.mxu2 %v3300_v62  ;;  %3517 = vmatpush.bf16.msra.mxu3 %v3300_v62  ;;  %p4003_p4 = pnand %p4002_p3, %p3998_p13 }
  0x4b   : > { %413 = vmatpush.bf16.msra.mxu0 %v3280_v5 }
  0x4c   : > { %462 = vmatpush.bf16.msra.mxu1 %v3284_v8 }
  0x4d   : > { %511 = vmatpush.bf16.msra.mxu2 %v3288_v9  ;;  %3518 = vmatpush.bf16.msra.mxu3 %v3288_v9 }
  0x4e   : > { %414 = vmatmul.bf16.vlgmr.msra.gmra.mxu0 %v238_v12 }
  0x4f   : > { %463 = vmatmul.bf16.vlgmr.msra.gmra.mxu1 %v238_v12 }
  0x50   : > { %512 = vmatmul.bf16.vlgmr.msra.gmra.mxu2 %v238_v12  ;;  %532 = vmatmul.bf16.vlgmr.msra.gmra.mxu3 %v242_v13 }
  0x5e   : > { %419 = vmatmul.bf16.gmra.mxu0 %v239_v18 }
  0x5f   : > { %468 = vmatmul.bf16.gmra.mxu1 %v239_v18 }
  0x60   : > { %517 = vmatmul.bf16.gmra.mxu2 %v239_v18  ;;  %537 = vmatmul.bf16.gmra.mxu3 %v243_v19 }
  0x6e   : > { %424 = vmatmul.bf16.gmra.mxu0 %v240_v24 }
  0x6f   : > { %473 = vmatmul.bf16.gmra.mxu1 %v240_v24 }
  0x70   : > { %522 = vmatmul.bf16.gmra.mxu2 %v240_v24  ;;  %542 = vmatmul.bf16.gmra.mxu3 %v244_v25 }
  0x7e   : > { %429 = vmatmul.bf16.gmra.mxu0 %v241_v30 }
  0x7f   : > { %478 = vmatmul.bf16.gmra.mxu1 %v241_v30 }
  0x80   : > { %527 = vmatmul.bf16.gmra.mxu2 %v241_v30  ;;  %547 = vmatmul.bf16.gmra.mxu3 %v245_v31 }
  0x8e   : > { %434 = vmatmul.bf16.gmra.mxu0 %v242_v13 }
  0x8f   : > { %483 = vmatmul.bf16.gmra.mxu1 %v242_v13 }
  0x9e   : > { %439 = vmatmul.bf16.gmra.mxu0 %v243_v19 }
  0x9f   : > { %488 = vmatmul.bf16.gmra.mxu1 %v243_v19 }
  0xae   : > { %444 = vmatmul.bf16.gmra.mxu0 %v244_v25 }
  0xaf   : > { %493 = vmatmul.bf16.gmra.mxu1 %v244_v25 }
  0xbe   : > { %449 = vmatmul.bf16.gmra.mxu0 %v245_v31 }
  0xbf   : > { %498 = vmatmul.bf16.gmra.mxu1 %v245_v31 }
  0xcb   : > { %v415_v32 = vpop.f32.mrf.mxu0 }
  0xcc   : > { %v464_v33 = vpop.f32.mrf.mxu1 }
  0xcd   : > { %v553_v34 = vpack.c.bf16 %v464_v33, %v415_v32 }
  0xcf   : > { %1151 = vrot.lane.b32.xlu0 %v553_v34, %s4049_s6  ;;  %v593_v40 = vrot.slane %v553_v34, 4  ;;  %v601_v41 = vunpack.c.l.b16 %v553_v34 }
  0xd1   : > { %v4344_v45 = vunpack.c.l.b16 %v593_v40 }
  0xd3   : > { %v513_v35 = vpop.f32.mrf.mxu2  ;;  %v417_v36 = vpop.f32.mrf.mxu0 }
  0xd4   : > { %v4338_v37 = vpop.f32.mrf.mxu3  ;;  %v466_v38 = vpop.f32.mrf.mxu1  ;;  %v554_v52 = vpack.c.bf16 %v513_v35, %v513_v35 }
  0xd5   : > { %v555_v39 = vpack.c.bf16 %v466_v38, %v417_v36 }
  0xd6   : > { %v1009_v56 = vunpack.c.l.b16 %v554_v52 }
  0xd7   : > { %1699 = vrot.lane.b32.xlu0 %v553_v34, %s4050_s14  ;;  %1153 = vrot.lane.b32.xlu1 %v555_v39, %s4049_s6  ;;  %v602_v42 = vunpack.c.l.b16 %v555_v39  ;;  %v594_v43 = vrot.slane %v555_v39, 4 }
  0xd9   : > { %v4342_v44 = vpack.c.b16 %v602_v42, %v601_v41  ;;  %v4346_v46 = vunpack.c.l.b16 %v594_v43 }
  0xdb   : > { %v515_v47 = vpop.f32.mrf.mxu2  ;;  %1175 = vrot.lane.b32.xlu2 %v4342_v44, %s4049_s6  ;;  %v420_v48 = vpop.f32.mrf.mxu0  ;;  %v621_v50 = vpack.c.b16 %v4346_v46, %v4344_v45 }
  0xdc   : > { %v4350_v49 = vpop.f32.mrf.mxu3  ;;  %v469_v51 = vpop.f32.mrf.mxu1  ;;  %v556_v53 = vpack.c.bf16 %v515_v47, %v515_v47 }
  0xdd   : > { %v4354_v54 = vpack.c.bf16 %v469_v51, %v420_v48 }
  0xde   : > { %v1010_v57 = vunpack.c.l.b16 %v556_v53 }
  0xdf   : > { %2247 = vrot.lane.b32.xlu0 %v553_v34, %s4051_s10  ;;  %1701 = vrot.lane.b32.xlu1 %v555_v39, %s4050_s14  ;;  %v603_v7 = vunpack.c.l.b16 %v4354_v54 }
  0xe0   : > { %v4362_v61 = vpack.c.b16 %v1010_v57, %v1009_v56 }
  0xe2   : > { %5979 = vst [vmem:[#allocation8_spill] sm:$0xff] %v4362_v61 }
  0xe3   : > { %v518_v55 = vpop.f32.mrf.mxu2  ;;  %1155 = vrot.lane.b32.xlu2 %v4354_v54, %s4049_s6  ;;  %v422_v58 = vpop.f32.mrf.mxu0 }
  0xe4   : > { %v4360_v59 = vpop.f32.mrf.mxu3  ;;  %v471_v60 = vpop.f32.mrf.mxu1  ;;  %v558_v14 = vpack.c.bf16 %v518_v55, %v518_v55 }
  0xe5   : > { %v4375_v2 = vpack.c.bf16 %v471_v60, %v422_v58  ;;  %v574_v53 = vpack.c.bf16 %v4360_v59, %v4360_v59 }
  0xe6   : > { %v1011_v18 = vunpack.c.l.b16 %v558_v14 }
  0xe7   : > { %2249 = vrot.lane.b32.xlu1 %v555_v39, %s4051_s10  ;;  %1723 = vrot.lane.b32.xlu0 %v4342_v44, %s4050_s14  ;;  %v604_v8 = vunpack.c.l.b16 %v4375_v2 }
  0xe9   : > { %v4385_v9 = vpack.c.b16 %v604_v8, %v603_v7  ;;  %v570_v8 = vpack.c.bf16 %v4338_v37, %v4338_v37 }
  0xeb   : > { %v520_v62 = vpop.f32.mrf.mxu2  ;;  %1573 = vrot.lane.b32.xlu2 %v4362_v61, %s4049_s6  ;;  %v425_v63 = vpop.f32.mrf.mxu0 }
  0xec   : > { %v4369_v0 = vpop.f32.mrf.mxu3  ;;  %v474_v1 = vpop.f32.mrf.mxu1  ;;  %v560_v15 = vpack.c.bf16 %v520_v62, %v520_v62 }
  0xed   : > { %v4389_v16 = vpack.c.bf16 %v474_v1, %v425_v63  ;;  %v576_v1 = vpack.c.bf16 %v4369_v0, %v4369_v0  ;;  %v595_v0 = vrot.slane %v4354_v54, 4 }
  0xee   : > { %v1012_v19 = vunpack.c.l.b16 %v560_v15 }
  0xef   : > { %2271 = vrot.lane.b32.xlu1 %v4342_v44, %s4051_s10  ;;  %1703 = vrot.lane.b32.xlu0 %v4354_v54, %s4050_s14  ;;  %v597_v28 = vrot.slane %v4389_v16, 4  ;;  %v1097_v14 = vunpack.c.l.b16 %v576_v1 }
  0xf0   : > { %v4404_v27 = vpack.c.b16 %v1012_v19, %v1011_v18 }
  0xf1   : > { %v617_v40 = vunpack.c.l.b16 %v597_v28 }
  0xf2   : > { %5980 = vst [vmem:[#allocation9_spill] sm:$0xff] %v4404_v27 }
  0xf3   : > { %v523_v3 = vpop.f32.mrf.mxu2  ;;  %1157 = vrot.lane.b32.xlu2 %v4375_v2, %s4049_s6  ;;  %v427_v4 = vpop.f32.mrf.mxu0 }
  0xf4   : > { %v543_v5 = vpop.f32.mrf.mxu3  ;;  %v476_v6 = vpop.f32.mrf.mxu1  ;;  %v562_v34 = vpack.c.bf16 %v523_v3, %v523_v3 }
  0xf5   : > { %v4397_v21 = vpack.c.bf16 %v476_v6, %v427_v4  ;;  %v578_v39 = vpack.c.bf16 %v543_v5, %v543_v5 }
  0xf6   : > { %v1013_v58 = vunpack.c.l.b16 %v562_v34 }
  0xf7   : > { %2251 = vrot.lane.b32.xlu0 %v4354_v54, %s4051_s10  ;;  %1705 = vrot.lane.b32.xlu1 %v4375_v2, %s4050_s14  ;;  %v598_v32 = vrot.slane %v4397_v21, 4  ;;  %v1098_v3 = vunpack.c.l.b16 %v578_v39  ;;  %v605_v54 = vunpack.c.l.b16 %v4389_v16 }
  0xf9   : > { %v618_v51 = vunpack.c.l.b16 %v598_v32 }
  0xfb   : > { %v525_v10 = vpop.f32.mrf.mxu2  ;;  %1725 = vrot.lane.b32.xlu2 %v4385_v9, %s4050_s14  ;;  %v430_v11 = vpop.f32.mrf.mxu0  ;;  %v623_v59 = vpack.c.b16 %v618_v51, %v617_v40 }
  0xfc   : > { %v545_v12 = vpop.f32.mrf.mxu3  ;;  %v479_v13 = vpop.f32.mrf.mxu1  ;;  %v564_v35 = vpack.c.bf16 %v525_v10, %v525_v10 }
  0xfd   : > { %v4391_v17 = vpack.c.bf16 %v479_v13, %v430_v11  ;;  %v580_v41 = vpack.c.bf16 %v545_v12, %v545_v12  ;;  %v596_v11 = vrot.slane %v4375_v2, 4  ;;  %v572_v12 = vpack.c.bf16 %v4350_v49, %v4350_v49 }
  0xfe   : > { %v1014_v60 = vunpack.c.l.b16 %v564_v35  ;;  %v1096_v13 = vunpack.c.l.b16 %v574_v53  ;;  %v645_v18 = vsel %vm625_vm0, %v623_v59, 0  ;;  %v615_v49 = vunpack.c.l.b16 %v595_v0 }
  0xff   : > { %2253 = vrot.lane.b32.xlu1 %v4375_v2, %s4051_s10  ;;  %2273 = vrot.lane.b32.xlu0 %v4385_v9, %s4051_s10  ;;  %v599_v23 = vrot.slane %v4391_v17, 4  ;;  %v1099_v4 = vunpack.c.l.b16 %v580_v41  ;;  %v606_v2 = vunpack.c.l.b16 %v4397_v21  ;;  %v607_v32 = vunpack.c.l.b16 %v4391_v17 }
 0x100   : > { %v4434_v10 = vpack.c.b16 %v1014_v60, %v1013_v58 }
 0x101   : > { %v619_v31 = vunpack.c.l.b16 %v599_v23  ;;  %v4441_v15 = vpack.c.b16 %v1099_v4, %v1098_v3  ;;  %v1095_v23 = vunpack.c.l.b16 %v572_v12 }
 0x103   : > { %v528_v20 = vpop.f32.mrf.mxu2  ;;  %2255 = vrot.lane.b32.xlu2 %v4389_v16, %s4051_s10  ;;  %v432_v22 = vpop.f32.mrf.mxu0  ;;  %5983 = vst [vmem:[#allocation12_spill] sm:$0xff] %v4441_v15 }
 0x104   : > { %v548_v24 = vpop.f32.mrf.mxu3  ;;  %v481_v25 = vpop.f32.mrf.mxu1  ;;  %v566_v29 = vpack.c.bf16 %v528_v20, %v528_v20  ;;  %v616_v20 = vunpack.c.l.b16 %v596_v11 }
 0x105   : > { %v4402_v26 = vpack.c.bf16 %v481_v25, %v432_v22  ;;  %v582_v33 = vpack.c.bf16 %v548_v24, %v548_v24  ;;  %v1094_v22 = vunpack.c.l.b16 %v570_v8  ;;  %v4450_v24 = vpack.c.b16 %v1097_v14, %v1096_v13 }
 0x106   : > { %v1015_v42 = vunpack.c.l.b16 %v566_v29  ;;  %v4458_v25 = vpack.c.b16 %v606_v2, %v605_v54  ;;  %v622_v28 = vpack.c.b16 %v616_v20, %v615_v49 }
 0x107   : > { %1177 = vrot.lane.b32.xlu1 %v4385_v9, %s4049_s6  ;;  %2257 = vrot.lane.b32.xlu0 %v4397_v21, %s4051_s10  ;;  %v600_v30 = vrot.slane %v4402_v26, 4  ;;  %v1100_v56 = vunpack.c.l.b16 %v582_v33  ;;  %v4460_v29 = vpack.c.b16 %v1095_v23, %v1094_v22  ;;  %v608_v33 = vunpack.c.l.b16 %v4402_v26 }
 0x109   : > { %v620_v36 = vunpack.c.l.b16 %v600_v30  ;;  %5984 = vst [vmem:[#allocation13_spill] sm:$0xff] %v4460_v29  ;;  %v4476_v35 = vpack.c.b16 %v608_v33, %v607_v32 }
 0x10b   : > { %v530_v38 = vpop.f32.mrf.mxu2  ;;  %1575 = vrot.lane.b32.xlu2 %v4404_v27, %s4049_s6  ;;  %v4415_v47 = vpop.f32.mrf.mxu0  ;;  %v624_v48 = vpack.c.b16 %v620_v36, %v619_v31 }
 0x10c   : > { %v568_v43 = vpack.c.bf16 %v530_v38, %v530_v38  ;;  %v550_v52 = vpop.f32.mrf.mxu3  ;;  %v4419_v55 = vpop.f32.mrf.mxu1  ;;  %v639_v38 = vsel %vm625_vm0, %v621_v50, 0 }
 0x10d   : > { %v584_v57 = vpack.c.bf16 %v550_v52, %v550_v52  ;;  %v648_v63 = vsel %vm625_vm0, %v624_v48, 0  ;;  %v4496_v45 = vpack.c.bf16 %v4419_v55, %v4415_v47 }
 0x10e   : > { %v1016_v62 = vunpack.c.l.b16 %v568_v43  ;;  %654 = vmatpush.bf16.xpose.msrb.mxu3 %v648_v63 }
 0x10f   : > { %v1101_v5 = vunpack.c.l.b16 %v584_v57  ;;  %1159 = vrot.lane.b32.xlu1 %v4389_v16, %s4049_s6  ;;  %1163 = vrot.lane.b32.xlu0 %v4391_v17, %s4049_s6  ;;  %v687_v32 = vrot.slane %v4496_v45, 4 }
 0x110   : > { %v4424_v6 = vpack.c.b16 %v1016_v62, %v1015_v42 }
 0x111   : > { %v4430_v7 = vpack.c.b16 %v1101_v5, %v1100_v56 }
 0x112   : > { %5981 = vst [vmem:[#allocation10_spill] sm:$0xff] %v4424_v6  ;;  %1041 = vmatpush.bf16.msrb.mxu0 %v4424_v6 }
 0x113   : > { %5982 = vst [vmem:[#allocation11_spill] sm:$0xff] %v4430_v7  ;;  %1126 = vmatpush.bf16.msrb.mxu1 %v4430_v7  ;;  %1709 = vrot.lane.b32.xlu2 %v4397_v21, %s4050_s14  ;;  %v437_v37 = vpop.f32.mrf.mxu0 }
 0x114   : > { %v486_v19 = vpop.f32.mrf.mxu1 }
 0x115   : > { %v4498_v46 = vpack.c.bf16 %v486_v19, %v437_v37 }
 0x116   : > { %1042 = vmatpush.bf16.msrb.mxu0 %v4434_v10  ;;  %655 = vmatpush.bf16.xpose.msrb.mxu3 %v645_v18 }
 0x117   : > { %1127 = vmatpush.bf16.msrb.mxu1 %v4441_v15  ;;  %1707 = vrot.lane.b32.xlu1 %v4389_v16, %s4050_s14  ;;  %v642_v16 = vsel %vm625_vm0, %v622_v28, 0  ;;  %v688_v33 = vrot.slane %v4498_v46, 4 }
 0x118   : > { %1165 = vrot.lane.b32.xlu0 %v4402_v26, %s4049_s6 }
 0x11a   : > { %1043 = vmatpush.bf16.msrb.mxu0 %v4404_v27 }
 0x11b   : > { %1128 = vmatpush.bf16.msrb.mxu1 %v4450_v24  ;;  %1179 = vrot.lane.b32.xlu2 %v4458_v25, %s4049_s6  ;;  %v440_v30 = vpop.f32.mrf.mxu0 }
 0x11c   : > { %v489_v31 = vpop.f32.mrf.mxu1 }
 0x11d   : > { %v573_v8 = vpack.c.bf16 %v489_v31, %v440_v30 }
 0x11e   : > { %1044 = vmatpush.bf16.msrb.mxu0 %v4362_v61  ;;  %656 = vmatpush.bf16.xpose.msrb.mxu3 %v642_v16 }
 0x11f   : > { %1129 = vmatpush.bf16.msrb.mxu1 %v4460_v29  ;;  %1161 = vrot.lane.b32.xlu1 %v4397_v21, %s4049_s6  ;;  %v689_v18 = vrot.slane %v573_v8, 4 }
 0x120   : > { %2261 = vrot.lane.b32.xlu0 %v4402_v26, %s4051_s10 }
 0x121   : > { %v709_v20 = vunpack.c.l.b16 %v689_v18 }
 0x123   : > { %1727 = vrot.lane.b32.xlu2 %v4458_v25, %s4050_s14  ;;  %v442_v34 = vpop.f32.mrf.mxu0 }
 0x124   : > { %v491_v36 = vpop.f32.mrf.mxu1 }
 0x125   : > { %v4526_v52 = vpack.c.bf16 %v491_v36, %v442_v34 }
 0x126   : > { %657 = vmatpush.bf16.xpose.msrb.mxu3 %v639_v38  ;;  %v707_v38 = vunpack.c.l.b16 %v687_v32 }
 0x127   : > { %2275 = vrot.lane.b32.xlu1 %v4458_v25, %s4051_s10  ;;  %v690_v19 = vrot.slane %v4526_v52, 4 }
 0x128   : > { %1729 = vrot.lane.b32.xlu0 %v4476_v35, %s4050_s14 }
 0x129   : > { %v710_v22 = vunpack.c.l.b16 %v690_v19 }
 0x12b   : > { %1711 = vrot.lane.b32.xlu2 %v4391_v17, %s4050_s14  ;;  %v445_v21 = vpop.f32.mrf.mxu0  ;;  %v716_v23 = vpack.c.b16 %v710_v22, %v709_v20 }
 0x12c   : > { %v494_v39 = vpop.f32.mrf.mxu1 }
 0x12d   : > { %3373 = vmatmul.msk.bf16.vlgmr.msrb.gmra.mxu3 %vm625_vm0, %v4342_v44  ;;  %v695_v44 = vunpack.c.l.b16 %v4496_v45  ;;  %v4528_v53 = vpack.c.bf16 %v494_v39, %v445_v21  ;;  %v735_v34 = vsel %vm625_vm0, %v716_v23, 0  ;;  %v708_v21 = vunpack.c.l.b16 %v688_v33 }
 0x12f   : > { %1713 = vrot.lane.b32.xlu1 %v4402_v26, %s4050_s14  ;;  %v696_v26 = vunpack.c.l.b16 %v4498_v46  ;;  %v691_v1 = vrot.slane %v4528_v53, 4 }
 0x130   : > { %1652 = vrot.lane.b32.xlu0 %v4430_v7, %s4049_s6 }
 0x131   : > { %v4512_v43 = vpack.c.b16 %v696_v26, %v695_v44  ;;  %v711_v11 = vunpack.c.l.b16 %v691_v1  ;;  %v697_v26 = vunpack.c.l.b16 %v573_v8 }
 0x133   : > { %2259 = vrot.lane.b32.xlu2 %v4391_v17, %s4051_s10  ;;  %v447_v50 = vpop.f32.mrf.mxu0 }
 0x134   : > { %v496_v40 = vpop.f32.mrf.mxu1 }
 0x135   : > { %v4502_v41 = vpop.permute.xlu2 %1175  ;;  %v4530_v55 = vpack.c.bf16 %v496_v40, %v447_v50 }
 0x137   : > { %2277 = vrot.lane.b32.xlu1 %v4476_v35, %s4051_s10  ;;  %v692_v3 = vrot.slane %v4530_v55, 4  ;;  %v700_v28 = vunpack.c.l.b16 %v4530_v55 }
 0x138   : > { %2346 = vrot.lane.b32.xlu0 %v4498_v46, %s4051_s10 }
 0x139   : > { %v712_v12 = vunpack.c.l.b16 %v692_v3 }
 0x13b   : > { %1577 = vrot.lane.b32.xlu2 %v4434_v10, %s4049_s6  ;;  %v450_v42 = vpop.f32.mrf.mxu0  ;;  %v717_v37 = vpack.c.b16 %v712_v12, %v711_v11 }
 0x13c   : > { %v499_v17 = vpop.f32.mrf.mxu1 }
 0x13d   : > { %v4514_v47 = vpop.permute.xlu2 %1155  ;;  %3374 = vmatmul.msk.bf16.gmra.mxu3 %vm625_vm0, %v4385_v9  ;;  %v4518_v48 = vpack.c.bf16 %v499_v17, %v450_v42  ;;  %v738_v49 = vsel %vm625_vm0, %v717_v37, 0  ;;  %v698_v42 = vunpack.c.l.b16 %v4526_v52 }
 0x13f   : > { %1248 = vrot.lane.b32.xlu1 %v4496_v45, %s4049_s6  ;;  %v693_v56 = vrot.slane %v4518_v48, 4 }
 0x140   : > { %1820 = vrot.lane.b32.xlu0 %v4512_v43, %s4050_s14 }
 0x141   : > { %v4524_v51 = vpop.permute.xlu0 %1151  ;;  %v713_v63 = vunpack.c.l.b16 %v693_v56 }
 0x143   : > { %1181 = vrot.lane.b32.xlu2 %v4476_v35, %s4049_s6  ;;  %v452_v9 = vpop.f32.mrf.mxu0 }
 0x144   : > { %v501_v57 = vpop.f32.mrf.mxu1 }
 0x145   : > { %v4535_v58 = vpack.c.bf16 %v501_v57, %v452_v9  ;;  %v4537_v60 = vpop.permute.xlu2 %1573  ;;  %v704_v9 = vpack.c.b16 %v698_v42, %v697_v26 }
 0x147   : > { %1796 = vrot.lane.b32.xlu1 %v4496_v45, %s4050_s14  ;;  %v694_v62 = vrot.slane %v4535_v58, 4 }
 0x148   : > { %2350 = vrot.lane.b32.xlu0 %v4526_v52, %s4051_s10 }
 0x149   : > { %v4546_v4 = vpop.permute.xlu0 %1699  ;;  %v4548_v5 = vpop.permute.xlu1 %1153  ;;  %v714_v59 = vunpack.c.l.b16 %v694_v62 }
 0x14b   : > { %2344 = vrot.lane.b32.xlu2 %v4496_v45, %s4051_s10  ;;  %v718_v0 = vpack.c.b16 %v714_v59, %v713_v63  ;;  %v702_v63 = vunpack.c.l.b16 %v4535_v58 }
 0x14d   : > { %3375 = vmatmul.msk.bf16.gmra.mxu3 %vm625_vm0, %v4458_v25  ;;  %v741_v13 = vsel %vm625_vm0, %v718_v0, 0  ;;  %v4555_v14 = vpop.permute.xlu2 %1157  ;;  %v699_v25 = vunpack.c.l.b16 %v4528_v53 }
 0x14e   : > { %747 = vmatpush.bf16.xpose.msra.mxu3 %v741_v13  ;;  %v1170_v32 = vrot.slane %v4555_v14, 4  ;;  %v1168_v14 = vrot.slane %v4548_v5, 4 }
 0x14f   : > { %1579 = vrot.lane.b32.xlu1 %v4424_v6, %s4049_s6  ;;  %v4586_v36 = vpack.c.b16 %v700_v28, %v699_v25 }
 0x150   : > { %1804 = vrot.lane.b32.xlu0 %v4528_v53, %s4050_s14 }
 0x151   : > { %v4562_v54 = vpop.permute.xlu0 %2247  ;;  %v4564_v2 = vpop.permute.xlu1 %1701 }
 0x153   : > { %1250 = vrot.lane.b32.xlu2 %v4498_v46, %s4049_s6 }
 0x155   : > { %v4575_v30 = vpop.permute.xlu2 %1725 }
 0x156   : > { %748 = vmatpush.bf16.xpose.msra.mxu3 %v738_v49 }
 0x157   : > { %2368 = vrot.lane.b32.xlu1 %v4512_v43, %s4051_s10 }
 0x158   : > { %2352 = vrot.lane.b32.xlu0 %v4528_v53, %s4051_s10 }
 0x159   : > { %v4577_v31 = vpop.permute.xlu1 %2249  ;;  %v4579_v16 = vpop.permute.xlu0 %1723 }
 0x15b   : > { %1798 = vrot.lane.b32.xlu2 %v4498_v46, %s4050_s14  ;;  %v715_v46 = vpack.c.b16 %v708_v21, %v707_v38  ;;  %v1169_v21 = vrot.slane %v4514_v47, 4  ;;  %v1167_v47 = vrot.slane %v4524_v51, 4 }
 0x15d   : > { %3376 = vmatmul.msk.bf16.gmra.mxu3 %vm625_vm0, %v4476_v35  ;;  %v4597_v50 = vpop.permute.xlu2 %2255  ;;  %v732_v35 = vsel %vm625_vm0, %v715_v46, 0 }
 0x15e   : > { %749 = vmatpush.bf16.xpose.msra.mxu3 %v735_v34 }
 0x15f   : > { %1252 = vrot.lane.b32.xlu1 %v573_v8, %s4049_s6 }
 0x160   : > { %1824 = vrot.lane.b32.xlu0 %v4586_v36, %s4050_s14 }
 0x161   : > { %v4593_v39 = vpop.permute.xlu1 %2271  ;;  %v4595_v45 = vpop.permute.xlu0 %1703 }
 0x163   : > { %1272 = vrot.lane.b32.xlu2 %v4512_v43, %s4049_s6 }
 0x165   : > { %v4611_v17 = vpop.permute.xlu2 %1575 }
 0x166   : > { %750 = vmatpush.bf16.xpose.msra.mxu3 %v732_v35 }
 0x167   : > { %1800 = vrot.lane.b32.xlu1 %v573_v8, %s4050_s14 }
 0x168   : > { %2372 = vrot.lane.b32.xlu0 %v4586_v36, %s4051_s10 }
 0x169   : > { %v4605_v40 = vpop.permute.xlu0 %2251  ;;  %v4607_v44 = vpop.permute.xlu1 %1705 }
 0x16b   : > { %2348 = vrot.lane.b32.xlu2 %v573_v8, %s4051_s10 }
 0x16d   : > { %3377 = vmatmul.msk.bf16.vlgmr.msra.gmra.mxu3 %vm625_vm0, %v4512_v43  ;;  %v4624_v62 = vpop.permute.xlu2 %1709  ;;  %v701_v43 = vunpack.c.l.b16 %v4518_v48 }
 0x16f   : > { %1274 = vrot.lane.b32.xlu1 %v704_v9, %s4049_s6  ;;  %v706_v59 = vpack.c.b16 %v702_v63, %v701_v43 }
 0x170   : > { %1808 = vrot.lane.b32.xlu0 %v4518_v48, %s4050_s14 }
 0x171   : > { %v4618_v56 = vpop.permute.xlu1 %2253  ;;  %v4620_v57 = vpop.permute.xlu0 %2273 }
 0x173   : > { %1254 = vrot.lane.b32.xlu2 %v4526_v52, %s4049_s6 }
 0x175   : > { %v4641_v8 = vpop.permute.xlu2 %1179 }
 0x177   : > { %2370 = vrot.lane.b32.xlu1 %v704_v9, %s4051_s10 }
 0x178   : > { %2358 = vrot.lane.b32.xlu0 %v4535_v58, %s4051_s10 }
 0x179   : > { %v4631_v1 = vpop.permute.xlu1 %1177  ;;  %v4633_v3 = vpop.permute.xlu0 %2257 }
 0x17b   : > { %1802 = vrot.lane.b32.xlu2 %v4526_v52, %s4050_s14 }
 0x17d   : > { %3378 = vmatmul.msk.bf16.gmra.mxu3 %vm625_vm0, %v704_v9  ;;  %v4646_v19 = vpop.permute.xlu2 %1727 }
 0x17f   : > { %1256 = vrot.lane.b32.xlu1 %v4528_v53, %s4049_s6 }
 0x180   : > { %2374 = vrot.lane.b32.xlu0 %v706_v59, %s4051_s10 }
 0x181   : > { %v1160_v0 = vpop.permute.xlu1 %1159  ;;  %v1164_v11 = vpop.permute.xlu0 %1163 }
 0x182   : > { %v1173_v12 = vrot.slane %v1164_v11, 4  ;;  %v1171_v20 = vrot.slane %v1160_v0, 4 }
 0x183   : > { %1822 = vrot.lane.b32.xlu2 %v704_v9, %s4050_s14  ;;  %v1185_v9 = vunpack.c.l.b16 %v1169_v21 }
 0x184   : > { %v1189_v37 = vunpack.c.l.b16 %v1173_v12  ;;  %v1187_v33 = vunpack.c.l.b16 %v1171_v20 }
 0x185   : > { %v1712_v38 = vpop.permute.xlu2 %1711 }
 0x186   : > { %v1721_v0 = vrot.slane %v1712_v38, 4  ;;  %v1717_v38 = vrot.slane %v4595_v45, 4 }
 0x187   : > { %1806 = vrot.lane.b32.xlu1 %v4530_v55, %s4050_s14 }
 0x188   : > { %v1737_v5 = vunpack.c.l.b16 %v1721_v0 }
 0x189   : > { %v1708_v13 = vpop.permute.xlu1 %1707 }
 0x18a   : > { %v1166_v52 = vpop.permute.xlu0 %1165  ;;  %v1719_v51 = vrot.slane %v1708_v13, 4 }
 0x18b   : > { %v1174_v18 = vrot.slane %v1166_v52, 4  ;;  %1258 = vrot.lane.b32.xlu2 %v4530_v55, %s4049_s6 }
 0x18d   : > { %v1190_v53 = vunpack.c.l.b16 %v1174_v18  ;;  %3379 = vmatmul.msk.bf16.gmra.mxu3 %vm625_vm0, %v4586_v36  ;;  %v2260_v63 = vpop.permute.xlu2 %2259 }
 0x18f   : > { %v1194_v49 = vpack.c.b16 %v1190_v53, %v1189_v37  ;;  %2354 = vrot.lane.b32.xlu1 %v4530_v55, %s4051_s10  ;;  %v1186_v55 = vunpack.c.l.b16 %v1170_v32  ;;  %v1183_v37 = vunpack.c.l.b16 %v1167_v47  ;;  %v2269_v47 = vrot.slane %v2260_v63, 4 }
 0x191   : > { %v1217_v22 = vsel %vm625_vm0, %v1194_v49, 0  ;;  %v1162_v23 = vpop.permute.xlu1 %1161  ;;  %v1192_v43 = vpack.c.b16 %v1186_v55, %v1185_v9 }
 0x192   : > { %1223 = vmatpush.bf16.xpose.msrb.mxu2 %v1217_v22  ;;  %v4655_v25 = vpop.permute.xlu0 %2261  ;;  %v1172_v28 = vrot.slane %v1162_v23, 4  ;;  %v1720_v22 = vrot.slane %v4624_v62, 4 }
 0x193   : > { %1260 = vrot.lane.b32.xlu2 %v4518_v48, %s4049_s6  ;;  %v1211_v11 = vsel %vm625_vm0, %v1192_v43, 0  ;;  %v1715_v43 = vrot.slane %v4546_v4, 4 }
 0x194   : > { %v1188_v34 = vunpack.c.l.b16 %v1172_v28  ;;  %v1735_v28 = vunpack.c.l.b16 %v1719_v51 }
 0x195   : > { %v1578_v32 = vpop.permute.xlu2 %1577 }
 0x196   : > { %v1193_v46 = vpack.c.b16 %v1188_v34, %v1187_v33  ;;  %v1718_v34 = vrot.slane %v4607_v44, 4  ;;  %v1733_v44 = vunpack.c.l.b16 %v1717_v38 }
 0x197   : > { %1276 = vrot.lane.b32.xlu1 %v4586_v36, %s4049_s6  ;;  %v1184_v36 = vunpack.c.l.b16 %v1168_v14 }
 0x198   : > { %v1214_v35 = vsel %vm625_vm0, %v1193_v46, 0  ;;  %v1734_v21 = vunpack.c.l.b16 %v1718_v34  ;;  %v2265_v34 = vrot.slane %v4605_v40, 4  ;;  %v2263_v40 = vrot.slane %v4562_v54, 4 }
 0x199   : > { %v4664_v26 = vpop.permute.xlu1 %2275  ;;  %v1191_v49 = vpack.c.b16 %v1184_v36, %v1183_v37  ;;  %v1731_v37 = vunpack.c.l.b16 %v1715_v43 }
 0x19a   : > { %1224 = vmatpush.bf16.xpose.msrb.mxu2 %v1214_v35  ;;  %v4666_v42 = vpop.permute.xlu0 %1729  ;;  %v1740_v14 = vpack.c.b16 %v1734_v21, %v1733_v44 }
 0x19b   : > { %1278 = vrot.lane.b32.xlu2 %v706_v59, %s4049_s6 }
 0x19d   : > { %3380 = vmatmul.msk.bf16.gmra.mxu3 %vm625_vm0, %v706_v59  ;;  %v4694_v9 = vpop.permute.xlu2 %1181 }
 0x19f   : > { %2356 = vrot.lane.b32.xlu1 %v4518_v48, %s4051_s10  ;;  %v1208_v48 = vsel %vm625_vm0, %v1191_v49, 0 }
 0x1a1   : > { %v1714_v12 = vpop.permute.xlu1 %1713 }
 0x1a2   : > { %1225 = vmatpush.bf16.xpose.msrb.mxu2 %v1211_v11  ;;  %v1653_v52 = vpop.permute.xlu0 %1652  ;;  %v1722_v18 = vrot.slane %v1714_v12, 4  ;;  %v1759_v12 = vsel %vm625_vm0, %v1740_v14, 0 }
 0x1a3   : > { %1674 = vmatpush.bf16.msra.mxu1 %v1653_v52  ;;  %1826 = vrot.lane.b32.xlu2 %v706_v59, %s4050_s14  ;;  %v1736_v59 = vunpack.c.l.b16 %v1720_v22 }
 0x1a4   : > { %v1738_v53 = vunpack.c.l.b16 %v1722_v18  ;;  %v2285_v18 = vunpack.c.l.b16 %v2269_v47 }
 0x1a5   : > { %v1741_v13 = vpack.c.b16 %v1736_v59, %v1735_v28 }
 0x1a6   : > { %v1742_v20 = vpack.c.b16 %v1738_v53, %v1737_v5  ;;  %v4704_v5 = vpop.permute.xlu2 %2344 }
 0x1a7   : > { %1262 = vrot.lane.b32.xlu1 %v4535_v58, %s4049_s6  ;;  %v1762_v35 = vsel %vm625_vm0, %v1741_v13, 0 }
 0x1a8   : > { %v1765_v23 = vsel %vm625_vm0, %v1742_v20, 0 }
 0x1a9   : > { %v4681_v33 = vpop.permute.xlu1 %2277 }
 0x1aa   : > { %1226 = vmatpush.bf16.xpose.msrb.mxu2 %v1208_v48 }
 0x1ae   : > { %v4717_v28 = vpop.permute.xlu2 %1250 }
 0x1af   : > { %1810 = vrot.lane.b32.xlu1 %v4535_v58, %s4050_s14  ;;  %v1716_v58 = vrot.slane %v4564_v2, 4  ;;  %v2268_v2 = vrot.slane %v4633_v3, 4 }
 0x1b0   : > { %v659_v62 = vpop.f32.mrf.mxu3 }
 0x1b1   : > { %3389 = vmatmul.msk.bf16.vlgmr.msrb.gmra.mxu2 %vm625_vm0, %v4502_v41  ;;  %v4689_v46 = vmul.f32 0.17677669, %v659_v62  ;;  %v4691_v55 = vpop.permute.xlu1 %1248  ;;  %v2270_v41 = vrot.slane %v4655_v25, 4  ;;  %v1732_v0 = vunpack.c.l.b16 %v1716_v58  ;;  %v2267_v25 = vrot.slane %v4597_v50, 4 }
 0x1b2   : > { %1771 = vmatpush.bf16.xpose.msra.mxu2 %v1765_v23  ;;  %v2284_v22 = vunpack.c.l.b16 %v2268_v2  ;;  %v2266_v50 = vrot.slane %v4618_v56, 4 }
 0x1b3   : > { %v789_v45 = vsel %vm788_vm1, %v4689_v46, -inf  ;;  %v2286_v52 = vunpack.c.l.b16 %v2270_v41  ;;  %v1739_v53 = vpack.c.b16 %v1732_v0, %v1731_v37  ;;  %v2283_v23 = vunpack.c.l.b16 %v2267_v25 }
 0x1b4   : > { %790 = vmax.xlane.f32.xlu0 %v789_v45  ;;  %v2282_v62 = vunpack.c.l.b16 %v2266_v50  ;;  %v4731_v45 = vpop.permute.xlu0 %2346 }
 0x1b5   : > { %v2290_v49 = vpack.c.b16 %v2286_v52, %v2285_v18  ;;  %v1756_v20 = vsel %vm625_vm0, %v1739_v53, 0 }
 0x1b7   : > { %v2313_v48 = vsel %vm625_vm0, %v2290_v49, 0 }
 0x1b8   : > { %v661_v36 = vpop.f32.mrf.mxu3 }
 0x1b9   : > { %v4701_v11 = vpop.permute.xlu1 %1796  ;;  %v4719_v59 = vmul.f32 0.17677669, %v661_v36 }
 0x1ba   : > { %1772 = vmatpush.bf16.xpose.msra.mxu2 %v1762_v35  ;;  %v2264_v35 = vrot.slane %v4577_v31, 4  ;;  %v2279_v31 = vunpack.c.l.b16 %v2263_v40 }
 0x1bb   : > { %v792_v56 = vsel %vm788_vm1, %v4719_v59, -inf }
 0x1bc   : > { %v2280_v41 = vunpack.c.l.b16 %v2264_v35  ;;  %v4742_v36 = vpop.permute.xlu0 %1820 }
 0x1c0   : > { %v664_v4 = vpop.f32.mrf.mxu3 }
 0x1c1   : > { %3390 = vmatmul.msk.bf16.gmra.mxu2 %vm625_vm0, %v4631_v1  ;;  %v4710_v63 = vmul.f32 0.17677669, %v664_v4  ;;  %v1580_v51 = vpop.permute.xlu1 %1579  ;;  %v2289_v1 = vpack.c.b16 %v2284_v22, %v2283_v23 }
 0x1c2   : > { %1773 = vmatpush.bf16.xpose.msra.mxu2 %v1759_v12  ;;  %1601 = vmatpush.bf16.msra.mxu0 %v1580_v51 }
 0x1c3   : > { %v795_v3 = vsel %vm788_vm1, %v4710_v63, -inf  ;;  %v2310_v21 = vsel %vm625_vm0, %v2289_v1, 0 }
 0x1c4   : > { %796 = vmax.xlane.f32.xlu0 %v795_v3  ;;  %v4757_v2 = vpop.permute.xlu0 %2350 }
 0x1c6   : > { %1602 = vmatpush.bf16.msra.mxu0 %v1578_v32  ;;  %v2281_v32 = vunpack.c.l.b16 %v2265_v34 }
 0x1c8   : > { %v666_v13 = vpop.f32.mrf.mxu3  ;;  %v2288_v44 = vpack.c.b16 %v2282_v62, %v2281_v32 }
 0x1c9   : > { %v4722_v38 = vpop.permute.xlu1 %2368  ;;  %v4740_v47 = vmul.f32 0.17677669, %v666_v13 }
 0x1ca   : > { %1774 = vmatpush.bf16.xpose.msra.mxu2 %v1756_v20  ;;  %1603 = vmatpush.bf16.msra.mxu0 %v4611_v17  ;;  %v4735_v17 = vpop.permute.xlu2 %1798  ;;  %v2307_v43 = vsel %vm625_vm0, %v2288_v44, 0 }
 0x1cb   : > { %v798_v0 = vsel %vm788_vm1, %v4740_v47, -inf }
 0x1cc   : > { %793 = vmax.xlane.f32.xlu2 %v792_v56 }
 0x1ce   : > { %1604 = vmatpush.bf16.msra.mxu0 %v4537_v60  ;;  %v2287_v60 = vpack.c.b16 %v2280_v41, %v2279_v31 }
 0x1d0   : > { %v669_v58 = vpop.f32.mrf.mxu3  ;;  %v2304_v52 = vsel %vm625_vm0, %v2287_v60, 0 }
 0x1d1   : > { %3391 = vmatmul.msk.bf16.gmra.mxu2 %vm625_vm0, %v4641_v8  ;;  %v4737_v14 = vpop.permute.xlu1 %1252  ;;  %v4755_v53 = vmul.f32 0.17677669, %v669_v58 }
 0x1d2   : > { %2319 = vmatpush.bf16.xpose.msrb.mxu2 %v2313_v48  ;;  %v4751_v37 = vpop.permute.xlu2 %1272  ;;  %v4771_v48 = vpop.permute.xlu0 %1804 }
 0x1d3   : > { %v801_v25 = vsel %vm788_vm1, %v4755_v53, -inf }
 0x1d8   : > { %v671_v54 = vpop.f32.mrf.mxu3 }
 0x1d9   : > { %v4746_v12 = vmul.f32 0.17677669, %v671_v54  ;;  %v4748_v8 = vpop.permute.xlu1 %1800  ;;  %799 = vmax.xlane.f32.xlu1 %v798_v0 }
 0x1da   : > { %2320 = vmatpush.bf16.xpose.msrb.mxu2 %v2310_v21  ;;  %v4769_v22 = vpop.permute.xlu2 %2348  ;;  %v4785_v21 = vpop.permute.xlu0 %2352 }
 0x1db   : > { %v804_v18 = vsel %vm788_vm1, %v4746_v12, -inf }
 0x1dc   : > { %805 = vmax.xlane.f32.xlu2 %v804_v18 }
 0x1e0   : > { %v674_v49 = vpop.f32.mrf.mxu3 }
 0x1e1   : > { %3392 = vmatmul.msk.bf16.gmra.mxu2 %vm625_vm0, %v4694_v9  ;;  %v4763_v4 = vmul.f32 0.17677669, %v674_v49  ;;  %v4765_v51 = vpop.permute.xlu1 %1274  ;;  %802 = vmax.xlane.f32.xlu1 %v801_v25 }
 0x1e2   : > { %2321 = vmatpush.bf16.xpose.msrb.mxu2 %v2307_v43  ;;  %v4779_v1 = vpop.permute.xlu2 %1254 }
 0x1e3   : > { %v807_v20 = vsel %vm788_vm1, %v4763_v4, -inf }
 0x1e4   : > { %808 = vmax.xlane.f32.xlu0 %v807_v20 }
 0x1e8   : > { %v676_v3 = vpop.f32.mrf.mxu3 }
 0x1e9   : > { %v4773_v23 = vmul.f32 0.17677669, %v676_v3  ;;  %v4775_v9 = vpop.permute.xlu1 %2370 }
 0x1ea   : > { %2322 = vmatpush.bf16.xpose.msrb.mxu2 %v2304_v52  ;;  %v4789_v35 = vpop.permute.xlu2 %1802 }
 0x1eb   : > { %v810_v50 = vsel %vm788_vm1, %v4773_v23, -inf }
 0x1ec   : > { %811 = vmax.xlane.f32.xlu2 %v810_v50 }
 0x1f0   : > { %v752_v34 = vpop.f32.mrf.mxu3 }
 0x1f1   : > { %3405 = vmatmul.msk.bf16.vlgmr.msra.gmra.mxu2 %vm625_vm0, %v4579_v16  ;;  %v4783_v13 = vmul.f32 0.17677669, %v752_v34  ;;  %v1257_v62 = vpop.permute.xlu1 %1256  ;;  %v4797_v16 = vpop.permute.xlu0 %1824 }
 0x1f2   : > { %v4805_v60 = vpop.permute.xlu2 %1822  ;;  %v1268_v61 = vrot.slane %v1257_v62, 4 }
 0x1f3   : > { %v813_v56 = vsel %vm788_vm1, %v4783_v13, -inf }
 0x1f4   : > { %814 = vmax.xlane.f32.xlu2 %v813_v56  ;;  %v1284_v15 = vunpack.c.l.b16 %v1268_v61  ;;  %v1267_v61 = vrot.slane %v4779_v1, 4 }
 0x1f8   : > { %v754_v32 = vpop.f32.mrf.mxu3 }
 0x1f9   : > { %v4791_v44 = vmul.f32 0.17677669, %v754_v32  ;;  %v4793_v40 = vpop.permute.xlu1 %1806  ;;  %v4809_v0 = vpop.permute.xlu0 %2372 }
 0x1fa   : > { %v1259_v25 = vpop.permute.xlu2 %1258 }
 0x1fb   : > { %v816_v58 = vsel %vm788_vm1, %v4791_v44, -inf }
 0x1fc   : > { %817 = vmax.xlane.f32.xlu0 %v816_v58 }
 0x200   : > { %v757_v41 = vpop.f32.mrf.mxu3 }
 0x201   : > { %3406 = vmatmul.msk.bf16.gmra.mxu2 %vm625_vm0, %v4575_v30  ;;  %v4801_v43 = vmul.f32 0.17677669, %v757_v41  ;;  %v4803_v31 = vpop.permute.xlu1 %2354  ;;  %v1809_v20 = vpop.permute.xlu0 %1808 }
 0x202   : > { %v1261_v32 = vpop.permute.xlu2 %1260 }
 0x203   : > { %5985 = vst [vmem:[#allocation14_spill] sm:$0xff] %v4801_v43  ;;  %v819_v54 = vsel %vm788_vm1, %v4801_v43, -inf  ;;  %v1270_v58 = vrot.slane %v1261_v32, 4  ;;  %v1269_v43 = vrot.slane %v1259_v25, 4 }
 0x204   : > { %820 = vmax.xlane.f32.xlu2 %v819_v54 }
 0x208   : > { %v759_v52 = vpop.f32.mrf.mxu3 }
 0x209   : > { %v4811_v18 = vmul.f32 0.17677669, %v759_v52  ;;  %v4813_v49 = vpop.permute.xlu1 %1276  ;;  %v4825_v41 = vpop.permute.xlu0 %2358 }
 0x20b   : > { %v822_v30 = vsel %vm788_vm1, %v4811_v18, -inf }
 0x20c   : > { %823 = vmax.xlane.f32.xlu0 %v822_v30 }
 0x210   : > { %v762_v3 = vpop.f32.mrf.mxu3 }
 0x211   : > { %3407 = vmatmul.msk.bf16.gmra.mxu2 %vm625_vm0, %v4646_v19  ;;  %v4819_v50 = vmul.f32 0.17677669, %v762_v3  ;;  %v4821_v34 = vpop.permute.xlu1 %2356  ;;  %v1286_v3 = vunpack.c.l.b16 %v1270_v58  ;;  %v4836_v6 = vpop.permute.xlu0 %2374 }
 0x213   : > { %v825_v56 = vsel %vm788_vm1, %v4819_v50, -inf }
 0x214   : > { %826 = vmax.xlane.f32.xlu2 %v825_v56 }
 0x218   : > { %v764_v54 = vpop.f32.mrf.mxu3 }
 0x219   : > { %v4827_v52 = vmul.f32 0.17677669, %v764_v54  ;;  %v1263_v30 = vpop.permute.xlu1 %1262 }
 0x21a   : > { %v1271_v7 = vrot.slane %v1263_v30, 4  ;;  %v1285_v30 = vunpack.c.l.b16 %v1269_v43 }
 0x21b   : > { %v828_v19 = vsel %vm788_vm1, %v4827_v52, -inf }
 0x21c   : > { %v1287_v29 = vunpack.c.l.b16 %v1271_v7  ;;  %829 = vmax.xlane.f32.xlu0 %v828_v19  ;;  %v1266_v7 = vrot.slane %v4737_v14, 4  ;;  %v1283_v19 = vunpack.c.l.b16 %v1267_v61 }
 0x21e   : > { %v1291_v27 = vpack.c.b16 %v1287_v29, %v1286_v3  ;;  %v1290_v29 = vpack.c.b16 %v1285_v30, %v1284_v15  ;;  %v1282_v25 = vunpack.c.l.b16 %v1266_v7  ;;  %v4848_v15 = vpop.permute.xlu2 %1278  ;;  %v1818_v7 = vrot.slane %v1809_v20, 4 }
 0x220   : > { %v767_v56 = vpop.f32.mrf.mxu3  ;;  %v1314_v32 = vsel %vm625_vm0, %v1291_v27, 0  ;;  %v1289_v14 = vpack.c.b16 %v1283_v19, %v1282_v25 }
 0x221   : > { %3408 = vmatmul.msk.bf16.gmra.mxu2 %vm625_vm0, %v4666_v42  ;;  %v4834_v54 = vmul.f32 0.17677669, %v767_v56  ;;  %1320 = vmatpush.bf16.xpose.msrb.mxu3 %v1314_v32  ;;  %v1311_v42 = vsel %vm625_vm0, %v1290_v29, 0  ;;  %v1811_v43 = vpop.permute.xlu1 %1810  ;;  %v1264_v32 = vrot.slane %v4691_v55, 4 }
 0x222   : > { %v1819_v1 = vrot.slane %v1811_v43, 4  ;;  %v1308_v61 = vsel %vm625_vm0, %v1289_v14, 0 }
 0x223   : > { %v831_v62 = vsel %vm788_vm1, %v4834_v54, -inf  ;;  %v1280_v29 = vunpack.c.l.b16 %v1264_v32 }
 0x224   : > { %832 = vmax.xlane.f32.xlu2 %v831_v62  ;;  %v1265_v62 = vrot.slane %v4717_v28, 4 }
 0x226   : > { %v1281_v55 = vunpack.c.l.b16 %v1265_v62  ;;  %v4861_v20 = vpop.permute.xlu2 %1826 }
 0x227   : > { %v791_v3 = vpop.xlane.xlu0 %790 }
 0x228   : > { %v769_v58 = vpop.f32.mrf.mxu3  ;;  %v837_v30 = vsub.f32 %v4689_v46, %v791_v3  ;;  %v1288_v43 = vpack.c.b16 %v1281_v55, %v1280_v29  ;;  %v1817_v46 = vrot.slane %v4793_v40, 4  ;;  %v1814_v29 = vrot.slane %v4748_v8, 4 }
 0x229   : > { %v4843_v27 = vmul.f32 0.17677669, %v769_v58  ;;  %1321 = vmatpush.bf16.xpose.msrb.mxu3 %v1311_v42  ;;  %v1835_v58 = vunpack.c.l.b16 %v1819_v1 }
 0x22a   : > { %v853_v42 = vmul.f32 1.442695, %v837_v30  ;;  %v1305_v32 = vsel %vm625_vm0, %v1288_v43, 0  ;;  %v1833_v14 = vunpack.c.l.b16 %v1817_v46  ;;  %v1830_v8 = vunpack.c.l.b16 %v1814_v29 }
 0x22b   : > { %v834_v56 = vsel %vm788_vm1, %v4843_v27, -inf }
 0x22c   : > { %835 = vmax.xlane.f32.xlu2 %v834_v56  ;;  %v1834_v56 = vunpack.c.l.b16 %v1818_v7  ;;  %3693 = vpow2.f32 %v853_v42  ;;  %v1815_v42 = vrot.slane %v4789_v35, 4 }
 0x22e   : > { %v1839_v3 = vpack.c.b16 %v1835_v58, %v1834_v56 }
 0x230   : > { %v1862_v1 = vsel %vm625_vm0, %v1839_v3, 0  ;;  %v1831_v3 = vunpack.c.l.b16 %v1815_v42 }
 0x231   : > { %3421 = vmatmul.msk.bf16.vlgmr.msrb.gmra.mxu2 %vm625_vm0, %v4593_v39  ;;  %1322 = vmatpush.bf16.xpose.msrb.mxu3 %v1308_v61  ;;  %v1816_v39 = vrot.slane %v4771_v48, 4 }
 0x232   : > { %v4865_v30 = vpop.eup %3693 }
 0x233   : > { %v1832_v40 = vunpack.c.l.b16 %v1816_v39  ;;  %v885_v48 = vsel %vm788_vm1, %v4865_v30, 0.0  ;;  %v1812_v39 = vrot.slane %v4701_v11, 4 }
 0x234   : > { %v1228_v25 = vpop.f32.mrf.mxu2 }
 0x235   : > { %v4855_v19 = vmul.f32 0.17677669, %v1228_v25  ;;  %v1838_v61 = vpack.c.b16 %v1833_v14, %v1832_v40  ;;  %v1828_v40 = vunpack.c.l.b16 %v1812_v39 }
 0x237   : > { %v1361_v28 = vsel %vm788_vm1, %v4855_v19, -inf  ;;  %v1859_v25 = vsel %vm625_vm0, %v1838_v61, 0  ;;  %v797_v43 = vpop.xlane.xlu0 %796 }
 0x238   : > { %1362 = vmax.xlane.f32.xlu1 %v1361_v28 }
 0x239   : > { %1323 = vmatpush.bf16.xpose.msrb.mxu3 %v1305_v32  ;;  %v1837_v32 = vpack.c.b16 %v1831_v3, %v1830_v8 }
 0x23b   : > { %v1856_v29 = vsel %vm625_vm0, %v1837_v32, 0 }
 0x23c   : > { %v1230_v62 = vpop.f32.mrf.mxu2 }
 0x23d   : > { %v4867_v7 = vmul.f32 0.17677669, %v1230_v62 }
 0x23f   : > { %v1364_v58 = vsel %vm788_vm1, %v4867_v7, -inf  ;;  %v794_v55 = vpop.xlane.xlu2 %793 }
 0x240   : > { %886 = vadd.xlane.f32.xlu1 %v885_v48  ;;  %1365 = vmax.xlane.f32.xlu2 %v1364_v58  ;;  %v838_v56 = vsub.f32 %v4719_v59, %v794_v55  ;;  %v839_v59 = vsub.f32 %v4710_v63, %v797_v43 }
 0x241   : > { %1868 = vmatpush.bf16.xpose.msra.mxu3 %v1862_v1  ;;  %3422 = vmatmul.msk.bf16.gmra.mxu2 %vm625_vm0, %v4620_v57  ;;  %v2366_v57 = vrot.slane %v4821_v34, 4  ;;  %v1813_v1 = vrot.slane %v4735_v17, 4  ;;  %v2365_v17 = vrot.slane %v4803_v31, 4 }
 0x242   : > { %3393 = vmatmul.msk.bf16.vlgmr.msrb.gmra.mxu3 %vm625_vm0, %v4751_v37  ;;  %v855_v46 = vmul.f32 1.442695, %v838_v56  ;;  %v2367_v37 = vrot.slane %v4825_v41, 4  ;;  %v857_v62 = vmul.f32 1.442695, %v839_v59 }
 0x243   : > { %v2382_v11 = vunpack.c.l.b16 %v2366_v57  ;;  %v1829_v48 = vunpack.c.l.b16 %v1813_v1  ;;  %v2381_v31 = vunpack.c.l.b16 %v2365_v17  ;;  %v2360_v17 = vrot.slane %v4704_v5, 4 }
 0x244   : > { %v1233_v28 = vpop.f32.mrf.mxu2  ;;  %3695 = vpow2.f32 %v855_v46  ;;  %v2383_v61 = vunpack.c.l.b16 %v2367_v37  ;;  %v2364_v46 = vrot.slane %v4785_v21, 4 }
 0x245   : > { %v4881_v35 = vmul.f32 0.17677669, %v1233_v28  ;;  %3697 = vpow2.f32 %v857_v62  ;;  %v1836_v55 = vpack.c.b16 %v1829_v48, %v1828_v40 }
 0x246   : > { %v2387_v56 = vpack.c.b16 %v2383_v61, %v2382_v11  ;;  %v2380_v59 = vunpack.c.l.b16 %v2364_v46 }
 0x247   : > { %v1367_v14 = vsel %vm788_vm1, %v4881_v35, -inf }
 0x248   : > { %1368 = vmax.xlane.f32.xlu2 %v1367_v14  ;;  %v2410_v3 = vsel %vm625_vm0, %v2387_v56, 0  ;;  %v2386_v1 = vpack.c.b16 %v2381_v31, %v2380_v59 }
 0x249   : > { %1869 = vmatpush.bf16.xpose.msra.mxu3 %v1859_v25 }
 0x24a   : > { %v4891_v63 = vpop.eup %3695 }
 0x24b   : > { %v888_v25 = vsel %vm788_vm1, %v4891_v63, 0.0  ;;  %v4908_v28 = vpop.eup %3697 }
 0x24c   : > { %v1235_v58 = vpop.f32.mrf.mxu2  ;;  %v800_v34 = vpop.xlane.xlu1 %799  ;;  %v891_v14 = vsel %vm788_vm1, %v4908_v28, 0.0 }
 0x24d   : > { %v4893_v41 = vmul.f32 0.17677669, %v1235_v58  ;;  %v840_v42 = vsub.f32 %v4740_v47, %v800_v34  ;;  %v1853_v47 = vsel %vm625_vm0, %v1836_v55, 0  ;;  %v2361_v34 = vrot.slane %v4731_v45, 4 }
 0x24f   : > { %v1370_v8 = vsel %vm788_vm1, %v4893_v41, -inf  ;;  %v859_v43 = vmul.f32 1.442695, %v840_v42  ;;  %v806_v61 = vpop.xlane.xlu2 %805 }
 0x250   : > { %1371 = vmax.xlane.f32.xlu0 %v1370_v8  ;;  %889 = vadd.xlane.f32.xlu2 %v888_v25  ;;  %v842_v58 = vsub.f32 %v4746_v12, %v806_v61  ;;  %v2377_v25 = vunpack.c.l.b16 %v2361_v34 }
 0x251   : > { %1870 = vmatpush.bf16.xpose.msra.mxu3 %v1856_v29  ;;  %3423 = vmatmul.msk.bf16.gmra.mxu2 %vm625_vm0, %v4664_v26  ;;  %3699 = vpow2.f32 %v859_v43  ;;  %v2362_v26 = vrot.slane %v4769_v22, 4  ;;  %v2407_v22 = vsel %vm625_vm0, %v2386_v1, 0 }
 0x252   : > { %3394 = vmatmul.msk.bf16.gmra.mxu3 %vm625_vm0, %v4765_v51  ;;  %v2363_v51 = vrot.slane %v4757_v2, 4  ;;  %v863_v56 = vmul.f32 1.442695, %v842_v58 }
 0x253   : > { %v2378_v2 = vunpack.c.l.b16 %v2362_v26 }
 0x254   : > { %v1238_v39 = vpop.f32.mrf.mxu2  ;;  %v803_v21 = vpop.xlane.xlu1 %802 }
 0x255   : > { %v4910_v32 = vmul.f32 0.17677669, %v1238_v39  ;;  %v841_v37 = vsub.f32 %v4755_v53, %v803_v21  ;;  %v2379_v53 = vunpack.c.l.b16 %v2363_v51 }
 0x257   : > { %v1373_v57 = vsel %vm788_vm1, %v4910_v32, -inf  ;;  %v4919_v40 = vpop.eup %3699  ;;  %v861_v29 = vmul.f32 1.442695, %v841_v37  ;;  %v2385_v55 = vpack.c.b16 %v2379_v53, %v2378_v2  ;;  %v809_v8 = vpop.xlane.xlu0 %808 }
 0x258   : > { %1374 = vmax.xlane.f32.xlu1 %v1373_v57  ;;  %892 = vadd.xlane.f32.xlu2 %v891_v14  ;;  %v894_v62 = vsel %vm788_vm1, %v4919_v40, 0.0  ;;  %v843_v31 = vsub.f32 %v4763_v4, %v809_v8 }
 0x259   : > { %1871 = vmatpush.bf16.xpose.msra.mxu3 %v1853_v47  ;;  %895 = vadd.xlane.f32.xlu0 %v894_v62  ;;  %3701 = vpow2.f32 %v861_v29  ;;  %v2404_v43 = vsel %vm625_vm0, %v2385_v55, 0  ;;  %v2376_v47 = vunpack.c.l.b16 %v2360_v17 }
 0x25a   : > { %3703 = vpow2.f32 %v863_v56  ;;  %v865_v59 = vmul.f32 1.442695, %v843_v31 }
 0x25b   : > { %v2384_v39 = vpack.c.b16 %v2377_v25, %v2376_v47 }
 0x25c   : > { %v1240_v11 = vpop.f32.mrf.mxu2  ;;  %3705 = vpow2.f32 %v865_v59 }
 0x25d   : > { %v4924_v48 = vmul.f32 0.17677669, %v1240_v11  ;;  %v2401_v51 = vsel %vm625_vm0, %v2384_v39, 0 }
 0x25f   : > { %v1376_v42 = vsel %vm788_vm1, %v4924_v48, -inf  ;;  %v812_v12 = vpop.xlane.xlu2 %811  ;;  %v4936_v45 = vpop.eup %3701 }
 0x260   : > { %1377 = vmax.xlane.f32.xlu2 %v1376_v42  ;;  %v4947_v37 = vpop.eup %3703 }
 0x261   : > { %2416 = vmatpush.bf16.xpose.msrb.mxu3 %v2410_v3  ;;  %3424 = vmatmul.msk.bf16.gmra.mxu2 %vm625_vm0, %v4681_v33  ;;  %v897_v3 = vsel %vm788_vm1, %v4936_v45, 0.0 }
 0x262   : > { %3395 = vmatmul.msk.bf16.gmra.mxu3 %vm625_vm0, %v4813_v49  ;;  %v844_v49 = vsub.f32 %v4773_v23, %v812_v12  ;;  %v900_v23 = vsel %vm788_vm1, %v4947_v37, 0.0  ;;  %v4957_v14 = vpop.eup %3705 }
 0x263   : > { %v903_v62 = vsel %vm788_vm1, %v4957_v14, 0.0 }
 0x264   : > { %v1243_v46 = vpop.f32.mrf.mxu2  ;;  %v867_v21 = vmul.f32 1.442695, %v844_v49 }
 0x265   : > { %v4939_v5 = vmul.f32 0.17677669, %v1243_v46 }
 0x266   : > { %3707 = vpow2.f32 %v867_v21 }
 0x267   : > { %v1379_v33 = vsel %vm788_vm1, %v4939_v5, -inf }
 0x268   : > { %1380 = vmax.xlane.f32.xlu0 %v1379_v33  ;;  %898 = vadd.xlane.f32.xlu2 %v897_v3 }
 0x269   : > { %2417 = vmatpush.bf16.xpose.msrb.mxu3 %v2407_v22 }
 0x26c   : > { %v1245_v4 = vpop.f32.mrf.mxu2  ;;  %v4959_v1 = vpop.eup %3707 }
 0x26d   : > { %v4949_v26 = vmul.f32 0.17677669, %v1245_v4  ;;  %v906_v29 = vsel %vm788_vm1, %v4959_v1, 0.0 }
 0x26f   : > { %v1382_v57 = vsel %vm788_vm1, %v4949_v26, -inf  ;;  %v818_v34 = vpop.xlane.xlu0 %817 }
 0x270   : > { %901 = vadd.xlane.f32.xlu0 %v900_v23  ;;  %1383 = vmax.xlane.f32.xlu2 %v1382_v57 }
 0x271   : > { %2418 = vmatpush.bf16.xpose.msrb.mxu3 %v2404_v43 }
 0x272   : > { %3396 = vmatmul.msk.bf16.gmra.mxu3 %vm625_vm0, %v4848_v15  ;;  %v815_v15 = vpop.xlane.xlu2 %814 }
 0x273   : > { %v845_v12 = vsub.f32 %v4783_v13, %v815_v15 }
 0x274   : > { %v1776_v2 = vpop.f32.mrf.mxu2 }
 0x275   : > { %v4965_v53 = vmul.f32 0.17677669, %v1776_v2  ;;  %v869_v33 = vmul.f32 1.442695, %v845_v12 }
 0x277   : > { %v1909_v61 = vsel %vm788_vm1, %v4965_v53, -inf }
 0x278   : > { %904 = vadd.xlane.f32.xlu0 %v903_v62  ;;  %907 = vadd.xlane.f32.xlu2 %v906_v29 }
 0x279   : > { %2419 = vmatpush.bf16.xpose.msrb.mxu3 %v2401_v51 }
 0x27a   : > { %v4971_v22 = vpop.xlane.xlu2 %820 }
 0x27c   : > { %v1778_v47 = vpop.f32.mrf.mxu2 }
 0x27f   : > { %v4993_v55 = vpop.xlane.xlu0 %823 }
 0x280   : > { %1910 = vmax.xlane.f32.xlu0 %v1909_v61 }
 0x282   : > { %3409 = vmatmul.msk.bf16.vlgmr.msra.gmra.mxu3 %vm625_vm0, %v4742_v36 }
 0x287   : > { %v4977_v11 = vpop.xlane.xlu2 %826 }
 0x28f   : > { %v4997_v8 = vpop.xlane.xlu0 %829 }
 0x292   : > { %3410 = vmatmul.msk.bf16.gmra.mxu3 %vm625_vm0, %v4805_v60 }
 0x294   : > { %2125 = vrot.lane.b32.xlu0 %v4434_v10, %s4050_s14 }
 0x297   : > { %v4981_v58 = vpop.xlane.xlu2 %832 }
 0x29c   : > { %1648 = vrot.lane.b32.xlu0 %v4450_v24, %s4049_s6 }
 0x29f   : > { %v4985_v36 = vpop.xlane.xlu2 %835 }
 0x2a2   : > { %3411 = vmatmul.msk.bf16.gmra.mxu3 %vm625_vm0, %v4797_v16 }
 0x2ab   : > { %v4987_v42 = vpop.xlane.xlu1 %1362 }
 0x2b2   : > { %3412 = vmatmul.msk.bf16.gmra.mxu3 %vm625_vm0, %v4861_v20 }
 0x2b3   : > { %v4991_v60 = vpop.xlane.xlu2 %1365  ;;  %v887_v17 = vpop.xlane.xlu1 %886 }
 0x2b4   : > { %3709 = vrcp.f32 %v887_v17 }
 0x2ba   : > { %v3710_v25 = vpop.eup %3709 }
 0x2bb   : > { %v4995_v56 = vpop.xlane.xlu2 %1368  ;;  %v949_v31 = vmul.f32 %v3710_v25, %v4865_v30  ;;  %v846_v30 = vsub.f32 %v4791_v44, %v818_v34 }
 0x2bd   : > { %v965_v39 = vpack.c.bf16 %v949_v31, %v949_v31  ;;  %v871_v44 = vmul.f32 1.442695, %v846_v30 }
 0x2bf   : > { %v989_v2 = vunpack.c.l.b16 %v965_v39 }
 0x2c2   : > { %3425 = vmatmul.msk.bf16.vlgmr.msrb.gmra.mxu3 %vm625_vm0, %v4722_v38  ;;  %v5009_v38 = vmul.f32 0.17677669, %v1778_v47 }
 0x2c3   : > { %v890_v16 = vpop.xlane.xlu2 %889  ;;  %v5002_v20 = vpop.xlane.xlu0 %1371 }
 0x2c4   : > { %3711 = vrcp.f32 %v890_v16  ;;  %v1912_v62 = vsel %vm788_vm1, %v5009_v38, -inf }
 0x2c5   : > { %v1325_v43 = vpop.f32.mrf.mxu3  ;;  %3713 = vpow2.f32 %v869_v33 }
 0x2c6   : > { %v5004_v46 = vmul.f32 0.17677669, %v1325_v43 }
 0x2c8   : > { %v1385_v49 = vsel %vm788_vm1, %v5004_v46, -inf }
 0x2c9   : > { %1386 = vmax.xlane.f32.xlu1 %v1385_v49 }
 0x2ca   : > { %v3712_v3 = vpop.eup %3711 }
 0x2cb   : > { %v950_v13 = vmul.f32 %v3712_v3, %v4891_v63  ;;  %v893_v59 = vpop.xlane.xlu2 %892  ;;  %v1781_v63 = vpop.f32.mrf.mxu2 }
 0x2cc   : > { %3715 = vrcp.f32 %v893_v59  ;;  %v896_v23 = vpop.xlane.xlu0 %895  ;;  %v5021_v15 = vpop.eup %3713  ;;  %v5023_v34 = vmul.f32 0.17677669, %v1781_v63 }
 0x2cd   : > { %v1327_v21 = vpop.f32.mrf.mxu3  ;;  %v966_v51 = vpack.c.bf16 %v950_v13, %v950_v13  ;;  %3717 = vrcp.f32 %v896_v23  ;;  %v909_v47 = vsel %vm788_vm1, %v5021_v15, 0.0 }
 0x2ce   : > { %v5012_v4 = vmul.f32 0.17677669, %v1327_v21  ;;  %3719 = vpow2.f32 %v871_v44 }
 0x2cf   : > { %v990_v57 = vunpack.c.l.b16 %v966_v51 }
 0x2d0   : > { %v1388_v29 = vsel %vm788_vm1, %v5012_v4, -inf }
 0x2d1   : > { %1913 = vmax.xlane.f32.xlu1 %v1912_v62  ;;  %1389 = vmax.xlane.f32.xlu2 %v1388_v29  ;;  %v997_v61 = vpack.c.b16 %v990_v57, %v989_v2 }
 0x2d2   : > { %3426 = vmatmul.msk.bf16.gmra.mxu3 %vm625_vm0, %v4775_v9  ;;  %v3716_v17 = vpop.eup %3715  ;;  %v1915_v9 = vsel %vm788_vm1, %v5023_v34, -inf }
 0x2d3   : > { %3381 = vmatmul.msk.bf16.vlgmr.msrb.gmra.mxu0 %vm788_vm1, %v997_v61  ;;  %v5026_v16 = vpop.xlane.xlu2 %1377  ;;  %v3718_v25 = vpop.eup %3717  ;;  %v951_v31 = vmul.f32 %v3716_v17, %v4908_v28 }
 0x2d4   : > { %v952_v43 = vmul.f32 %v3718_v25, %v4919_v40  ;;  %v5038_v40 = vpop.eup %3719  ;;  %v5042_v23 = vpop.f32.mrf.mxu2  ;;  %v848_v25 = vsub.f32 %v4811_v18, %v4993_v55  ;;  %v849_v18 = vsub.f32 %v4819_v50, %v4977_v11 }
 0x2d5   : > { %v1330_v12 = vpop.f32.mrf.mxu3  ;;  %v967_v13 = vpack.c.bf16 %v951_v31, %v951_v31  ;;  %v912_v62 = vsel %vm788_vm1, %v5038_v40, 0.0 }
 0x2d6   : > { %v968_v49 = vpack.c.bf16 %v952_v43, %v952_v43  ;;  %v5034_v33 = vmul.f32 0.17677669, %v1330_v12 }
 0x2d7   : > { %v991_v57 = vunpack.c.l.b16 %v967_v13 }
 0x2d8   : > { %v992_v51 = vunpack.c.l.b16 %v968_v49  ;;  %v1391_v28 = vsel %vm788_vm1, %v5034_v33, -inf }
 0x2d9   : > { %910 = vadd.xlane.f32.xlu1 %v909_v47  ;;  %1916 = vmax.xlane.f32.xlu2 %v1915_v9  ;;  %v875_v9 = vmul.f32 1.442695, %v848_v25  ;;  %v5987_v25 = vld [vmem:[#allocation12_spill] sm:$0xff] }
 0x2da   : > { %v998_v29 = vpack.c.b16 %v992_v51, %v991_v57 }
 0x2db   : > { %v5036_v3 = vpop.xlane.xlu0 %1380  ;;  %v899_v39 = vpop.xlane.xlu2 %898 }
 0x2dc   : > { %3721 = vrcp.f32 %v899_v39 }
 0x2dd   : > { %v1332_v59 = vpop.f32.mrf.mxu3 }
 0x2de   : > { %v5040_v21 = vmul.f32 0.17677669, %v1332_v59 }
 0x2e0   : > { %v1394_v30 = vsel %vm788_vm1, %v5040_v21, -inf }
 0x2e1   : > { %1392 = vmax.xlane.f32.xlu1 %v1391_v28  ;;  %1395 = vmax.xlane.f32.xlu0 %v1394_v30 }
 0x2e2   : > { %913 = vadd.xlane.f32.xlu2 %v912_v62  ;;  %3427 = vmatmul.msk.bf16.gmra.mxu3 %vm625_vm0, %v4809_v0  ;;  %v3722_v61 = vpop.eup %3721  ;;  %v1786_v0 = vpop.f32.mrf.mxu2 }
 0x2e3   : > { %v902_v2 = vpop.xlane.xlu0 %901  ;;  %3382 = vmatmul.msk.bf16.gmra.mxu0 %vm788_vm1, %v998_v29  ;;  %v5053_v63 = vpop.xlane.xlu2 %1383  ;;  %v953_v43 = vmul.f32 %v3722_v61, %v4936_v45  ;;  %v5062_v31 = vmul.f32 0.17677669, %v1786_v0 }
 0x2e4   : > { %3723 = vrcp.f32 %v902_v2 }
 0x2e5   : > { %v1335_v17 = vpop.f32.mrf.mxu3  ;;  %v969_v59 = vpack.c.bf16 %v953_v43, %v953_v43  ;;  %v1921_v45 = vsel %vm788_vm1, %v5062_v31, -inf }
 0x2e6   : > { %v5055_v44 = vmul.f32 0.17677669, %v1335_v17 }
 0x2e7   : > { %v993_v55 = vunpack.c.l.b16 %v969_v59 }
 0x2e8   : > { %v1397_v12 = vsel %vm788_vm1, %v5055_v44, -inf }
 0x2e9   : > { %1398 = vmax.xlane.f32.xlu0 %v1397_v12 }
 0x2ea   : > { %v3724_v47 = vpop.eup %3723  ;;  %v5076_v11 = vpop.f32.mrf.mxu2 }
 0x2eb   : > { %v905_v49 = vpop.xlane.xlu0 %904  ;;  %v908_v39 = vpop.xlane.xlu2 %907  ;;  %v954_v13 = vmul.f32 %v3724_v47, %v4947_v37  ;;  %v877_v37 = vmul.f32 1.442695, %v849_v18  ;;  %v851_v47 = vsub.f32 %v4834_v54, %v4981_v58 }
 0x2ec   : > { %3725 = vrcp.f32 %v905_v49 }
 0x2ed   : > { %3727 = vrcp.f32 %v908_v39  ;;  %v970_v51 = vpack.c.bf16 %v954_v13, %v954_v13  ;;  %v5080_v17 = vpop.f32.mrf.mxu3  ;;  %v5988_v39 = vld [vmem:[#allocation9_spill] sm:$0xff]  ;;  %v881_v59 = vmul.f32 1.442695, %v851_v47 }
 0x2ee   : > { %3729 = vpow2.f32 %v875_v9 }
 0x2ef   : > { %v994_v28 = vunpack.c.l.b16 %v970_v51  ;;  %3731 = vpow2.f32 %v877_v37 }
 0x2f0   : > { %3733 = vpow2.f32 %v881_v59 }
 0x2f1   : > { %1922 = vmax.xlane.f32.xlu0 %v1921_v45  ;;  %v999_v30 = vpack.c.b16 %v994_v28, %v993_v55  ;;  %v1412_v45 = vsub.f32 %v4893_v41, %v5002_v20  ;;  %v1375_v55 = vpop.xlane.xlu1 %1374 }
 0x2f2   : > { %3428 = vmatmul.msk.bf16.gmra.mxu3 %vm625_vm0, %v4836_v6  ;;  %v3726_v57 = vpop.eup %3725  ;;  %v5986_v6 = vld [vmem:[#allocation10_spill] sm:$0xff]  ;;  %v1791_v49 = vpop.f32.mrf.mxu2 }
 0x2f3   : > { %v3728_v62 = vpop.eup %3727  ;;  %3383 = vmatmul.msk.bf16.gmra.mxu0 %vm788_vm1, %v999_v30  ;;  %v955_v2 = vmul.f32 %v3726_v57, %v4957_v14  ;;  %v5094_v18 = vmul.f32 0.17677669, %v1791_v49  ;;  %v1431_v58 = vmul.f32 1.442695, %v1412_v45  ;;  %v1413_v57 = vsub.f32 %v4910_v32, %v1375_v55 }
 0x2f4   : > { %v5072_v29 = vpop.eup %3729  ;;  %v956_v50 = vmul.f32 %v3728_v62, %v4959_v1 }
 0x2f5   : > { %v918_v61 = vsel %vm788_vm1, %v5072_v29, 0.0  ;;  %v971_v12 = vpack.c.bf16 %v955_v2, %v955_v2  ;;  %v5086_v14 = vpop.eup %3731  ;;  %v1340_v51 = vpop.f32.mrf.mxu3  ;;  %v1927_v54 = vsel %vm788_vm1, %v5094_v18, -inf  ;;  %3735 = vpow2.f32 %v1431_v58 }
 0x2f6   : > { %v972_v43 = vpack.c.bf16 %v956_v50, %v956_v50  ;;  %v921_v9 = vsel %vm788_vm1, %v5086_v14, 0.0  ;;  %v5101_v28 = vpop.eup %3733  ;;  %v1433_v62 = vmul.f32 1.442695, %v1413_v57  ;;  %v5989_v50 = vld [vmem:[#allocation14_spill] sm:$0xff]  ;;  %v5146_v57 = vmul.f32 0.17677669, %v5080_v17 }
 0x2f7   : > { %v995_v1 = vunpack.c.l.b16 %v971_v12  ;;  %v927_v37 = vsel %vm788_vm1, %v5101_v28, 0.0 }
 0x2f8   : > { %v996_v0 = vunpack.c.l.b16 %v972_v43  ;;  %3737 = vpow2.f32 %v1433_v62  ;;  %v5119_v43 = vmul.f32 0.17677669, %v5042_v23 }
 0x2f9   : > { %919 = vadd.xlane.f32.xlu0 %v918_v61  ;;  %v847_v61 = vsub.f32 %v5989_v50, %v4971_v22 }
 0x2fa   : > { %2127 = vrot.lane.b32.xlu2 %v5986_v6, %s4050_s14  ;;  %1650 = vrot.lane.b32.xlu1 %v5987_v25, %s4049_s6  ;;  %v1000_v13 = vpack.c.b16 %v996_v0, %v995_v1  ;;  %v1416_v1 = vsub.f32 %v4949_v26, %v5053_v63  ;;  %v1918_v49 = vsel %vm788_vm1, %v5119_v43, -inf  ;;  %v852_v63 = vsub.f32 %v4843_v27, %v4985_v36  ;;  %v1793_v45 = vpop.f32.mrf.mxu2 }
 0x2fb   : > { %v5108_v2 = vpop.eup %3735  ;;  %v873_v32 = vmul.f32 1.442695, %v847_v61  ;;  %v5143_v55 = vmul.f32 0.17677669, %v1793_v45  ;;  %v1410_v36 = vsub.f32 %v4867_v7, %v4991_v60 }
 0x2fc   : > { %v1466_v20 = vsel %vm788_vm1, %v5108_v2, 0.0  ;;  %v883_v58 = vmul.f32 1.442695, %v852_v63 }
 0x2fd   : > { %v5103_v30 = vpop.f32.mrf.mxu3  ;;  %3739 = vpow2.f32 %v873_v32  ;;  %v1930_v62 = vsel %vm788_vm1, %v5143_v55, -inf  ;;  %v1427_v17 = vmul.f32 1.442695, %v1410_v36  ;;  %v5161_v32 = vmul.f32 0.17677669, %v5076_v11 }
 0x2fe   : > { %v5116_v12 = vpop.eup %3737  ;;  %v1409_v11 = vsub.f32 %v4855_v19, %v4987_v42  ;;  %v5186_v19 = vmul.f32 0.17677669, %v5103_v30 }
 0x2ff   : > { %v1469_v0 = vsel %vm788_vm1, %v5116_v12, 0.0  ;;  %v1924_v7 = vsel %vm788_vm1, %v5161_v32, -inf }
 0x300   : > { %v1425_v63 = vmul.f32 1.442695, %v1409_v11  ;;  %v1406_v36 = vsel %vm788_vm1, %v5186_v19, -inf }
 0x301   : > { %922 = vadd.xlane.f32.xlu0 %v921_v9  ;;  %v1439_v9 = vmul.f32 1.442695, %v1416_v1 }
 0x302   : > { %2123 = vrot.lane.b32.xlu2 %v5988_v39, %s4050_s14 }
 0x303   : > { %3384 = vmatmul.msk.bf16.gmra.mxu0 %vm788_vm1, %v1000_v13  ;;  %v5129_v13 = vmul.f32 0.17677669, %v1340_v51  ;;  %3741 = vpow2.f32 %v1439_v9  ;;  %v5131_v23 = vpop.eup %3739 }
 0x304   : > { %3743 = vpow2.f32 %v883_v58 }
 0x305   : > { %v5110_v41 = vpop.f32.mrf.mxu3  ;;  %v1403_v59 = vsel %vm788_vm1, %v5129_v13, -inf  ;;  %3745 = vpow2.f32 %v1427_v17 }
 0x309   : > { %1928 = vmax.xlane.f32.xlu0 %v1927_v54  ;;  %v915_v54 = vsel %vm788_vm1, %v5131_v23, 0.0  ;;  %v5141_v51 = vpop.eup %3741 }
 0x30a   : > { %v1478_v27 = vsel %vm788_vm1, %v5141_v51, 0.0  ;;  %v5158_v61 = vpop.eup %3743 }
 0x30b   : > { %v5169_v1 = vpop.eup %3745 }
 0x30c   : > { %v1460_v9 = vsel %vm788_vm1, %v5169_v1, 0.0 }
 0x30d   : > { %v1875_v47 = vpop.f32.mrf.mxu3 }
 0x30e   : > { %v5127_v22 = vmul.f32 0.17677669, %v1875_v47 }
 0x310   : > { %v1936_v26 = vsel %vm788_vm1, %v5127_v22, -inf }
 0x311   : > { %928 = vadd.xlane.f32.xlu0 %v927_v37  ;;  %v850_v37 = vsub.f32 %v4827_v52, %v4997_v8  ;;  %v930_v52 = vsel %vm788_vm1, %v5158_v61, 0.0  ;;  %v1911_v8 = vpop.xlane.xlu0 %1910 }
 0x312   : > { %v1957_v47 = vsub.f32 %v4965_v53, %v1911_v8 }
 0x313   : > { %v879_v50 = vmul.f32 1.442695, %v850_v37 }
 0x315   : > { %3747 = vpow2.f32 %v879_v50  ;;  %v1411_v50 = vsub.f32 %v4881_v35, %v4995_v56 }
 0x316   : > { %3749 = vpow2.f32 %v1425_v63 }
 0x319   : > { %1467 = vadd.xlane.f32.xlu0 %v1466_v20  ;;  %v1400_v20 = vsel %vm788_vm1, %v5146_v57, -inf }
 0x321   : > { %1470 = vadd.xlane.f32.xlu0 %v1469_v0  ;;  %v5171_v0 = vpop.eup %3747 }
 0x324   : > { %1919 = vmax.xlane.f32.xlu1 %v1918_v49  ;;  %v2324_v49 = vpop.f32.mrf.mxu2 }
 0x329   : > { %1937 = vmax.xlane.f32.xlu0 %v1936_v26  ;;  %v924_v26 = vsel %vm788_vm1, %v5171_v0, 0.0 }
 0x32b   : > { %1404 = vmax.xlane.f32.xlu2 %v1403_v59 }
 0x32c   : > { %916 = vadd.xlane.f32.xlu1 %v915_v54  ;;  %v1973_v54 = vmul.f32 1.442695, %v1957_v47 }
 0x32e   : > { %3751 = vpow2.f32 %v1973_v54 }
 0x331   : > { %1479 = vadd.xlane.f32.xlu0 %v1478_v27  ;;  %v5183_v27 = vmul.f32 0.17677669, %v2324_v49  ;;  %v5209_v49 = vmul.f32 0.17677669, %v5110_v41 }
 0x333   : > { %1931 = vmax.xlane.f32.xlu2 %v1930_v62  ;;  %v2457_v42 = vsel %vm788_vm1, %v5183_v27, -inf  ;;  %v5194_v62 = vpop.eup %3749  ;;  %v1933_v35 = vsel %vm788_vm1, %v5209_v49, -inf }
 0x334   : > { %1401 = vmax.xlane.f32.xlu1 %v1400_v20  ;;  %v5196_v20 = vpop.eup %3751  ;;  %v1457_v8 = vsel %vm788_vm1, %v5194_v62, 0.0 }
 0x33b   : > { %931 = vadd.xlane.f32.xlu2 %v930_v52  ;;  %v2126_v52 = vpop.permute.xlu0 %2125 }
 0x33c   : > { %v5167_v60 = vpop.xlane.xlu1 %1386  ;;  %1925 = vmax.xlane.f32.xlu1 %v1924_v7  ;;  %v2005_v7 = vsel %vm788_vm1, %v5196_v20, 0.0 }
 0x343   : > { %1461 = vadd.xlane.f32.xlu2 %v1460_v9  ;;  %v1429_v9 = vmul.f32 1.442695, %v1411_v50  ;;  %v1649_v63 = vpop.permute.xlu0 %1648 }
 0x344   : > { %v5180_v59 = vpop.xlane.xlu1 %1913  ;;  %925 = vadd.xlane.f32.xlu1 %v924_v26  ;;  %v1390_v45 = vpop.xlane.xlu2 %1389 }
 0x345   : > { %v1418_v58 = vsub.f32 %v5012_v4, %v1390_v45 }
 0x347   : > { %v1443_v53 = vmul.f32 1.442695, %v1418_v58 }
 0x349   : > { %3753 = vpow2.f32 %v1443_v53 }
 0x34b   : > { %2458 = vmax.xlane.f32.xlu2 %v2457_v42 }
 0x34c   : > { %1407 = vmax.xlane.f32.xlu1 %v1406_v36  ;;  %v5192_v37 = vpop.xlane.xlu2 %1916  ;;  %v911_v4 = vpop.xlane.xlu1 %910 }
 0x34d   : > { %3755 = vrcp.f32 %v911_v4  ;;  %v2326_v4 = vpop.f32.mrf.mxu2 }
 0x34f   : > { %v5198_v30 = vpop.eup %3753 }
 0x350   : > { %v1484_v17 = vsel %vm788_vm1, %v5198_v30, 0.0 }
 0x351   : > { %1485 = vadd.xlane.f32.xlu0 %v1484_v17 }
 0x353   : > { %2006 = vadd.xlane.f32.xlu2 %v2005_v7  ;;  %v3756_v47 = vpop.eup %3755 }
 0x354   : > { %1458 = vadd.xlane.f32.xlu1 %v1457_v8  ;;  %v957_v26 = vmul.f32 %v3756_v47, %v5021_v15  ;;  %v1414_v15 = vsub.f32 %v4924_v48, %v5026_v16  ;;  %v1393_v7 = vpop.xlane.xlu1 %1392  ;;  %v1396_v8 = vpop.xlane.xlu0 %1395  ;;  %v5990_v47 = vld [vmem:[#allocation13_spill] sm:$0xff]  ;;  %v1415_v48 = vsub.f32 %v4939_v5, %v5036_v3  ;;  %v5991_v16 = vld [vmem:[#allocation8_spill] sm:$0xff] }
 0x355   : > { %v914_v11 = vpop.xlane.xlu2 %913 }
 0x356   : > { %3757 = vrcp.f32 %v914_v11  ;;  %v973_v45 = vpack.c.bf16 %v957_v26, %v957_v26  ;;  %v1435_v11 = vmul.f32 1.442695, %v1414_v15 }
 0x357   : > { %3759 = vpow2.f32 %v1429_v9  ;;  %v5224_v9 = vmul.f32 0.17677669, %v2326_v4 }
 0x358   : > { %v1074_v41 = vunpack.c.l.b16 %v973_v45  ;;  %3761 = vpow2.f32 %v1435_v11 }
 0x35c   : > { %v3758_v56 = vpop.eup %3757  ;;  %1934 = vmax.xlane.f32.xlu1 %v1933_v35  ;;  %v1437_v35 = vmul.f32 1.442695, %v1415_v48 }
 0x35d   : > { %v958_v54 = vmul.f32 %v3758_v56, %v5038_v40  ;;  %v2128_v58 = vpop.permute.xlu2 %2127  ;;  %v5215_v42 = vpop.eup %3759 }
 0x35e   : > { %2149 = vmatpush.bf16.msrb.mxu0 %v2128_v58  ;;  %v1463_v17 = vsel %vm788_vm1, %v5215_v42, 0.0  ;;  %v5232_v56 = vpop.xlane.xlu0 %1398  ;;  %v5234_v45 = vpop.eup %3761  ;;  %3763 = vpow2.f32 %v1437_v35 }
 0x35f   : > { %v974_v53 = vpack.c.bf16 %v958_v54, %v958_v54  ;;  %v1417_v54 = vsub.f32 %v5004_v46, %v5167_v60  ;;  %v1472_v5 = vsel %vm788_vm1, %v5234_v45, 0.0  ;;  %v1419_v46 = vsub.f32 %v5034_v33, %v1393_v7 }
 0x361   : > { %v1075_v36 = vunpack.c.l.b16 %v974_v53  ;;  %v1441_v3 = vmul.f32 1.442695, %v1417_v54 }
 0x362   : > { %2150 = vmatpush.bf16.msrb.mxu0 %v2126_v52  ;;  %v2460_v52 = vsel %vm788_vm1, %v5224_v9, -inf }
 0x363   : > { %v1082_v50 = vpack.c.b16 %v1075_v36, %v1074_v41  ;;  %3765 = vpow2.f32 %v1441_v3  ;;  %v1958_v36 = vsub.f32 %v5009_v38, %v5180_v59  ;;  %v1959_v38 = vsub.f32 %v5023_v34, %v5192_v37 }
 0x364   : > { %1464 = vadd.xlane.f32.xlu1 %v1463_v17  ;;  %v5240_v58 = vpop.eup %3763  ;;  %v1445_v17 = vmul.f32 1.442695, %v1419_v46 }
 0x365   : > { %3385 = vmatmul.msk.bf16.vlgmr.msrb.gmra.mxu1 %vm788_vm1, %v1082_v50  ;;  %v2124_v40 = vpop.permute.xlu2 %2123  ;;  %1646 = vrot.lane.b32.xlu0 %v5990_v47, %s4049_s6  ;;  %v1475_v41 = vsel %vm788_vm1, %v5240_v58, 0.0  ;;  %v1977_v33 = vmul.f32 1.442695, %v1959_v38 }
 0x366   : > { %2151 = vmatpush.bf16.msrb.mxu0 %v2124_v40  ;;  %v1923_v53 = vpop.xlane.xlu0 %1922  ;;  %v1878_v40 = vpop.f32.mrf.mxu3 }
 0x367   : > { %v5259_v7 = vmul.f32 0.17677669, %v1878_v40 }
 0x369   : > { %v5246_v15 = vpop.eup %3765  ;;  %5992 = vst [vmem:[#allocation10_spill] sm:$0xff] %v5259_v7 }
 0x36a   : > { %v1481_v4 = vsel %vm788_vm1, %v5246_v15, 0.0 }
 0x36b   : > { %2121 = vrot.lane.b32.xlu2 %v5991_v16, %s4050_s14 }
 0x36c   : > { %v1651_v26 = vpop.permute.xlu1 %1650  ;;  %2461 = vmax.xlane.f32.xlu1 %v2460_v52  ;;  %v1420_v52 = vsub.f32 %v5040_v21, %v1396_v8  ;;  %v1961_v21 = vsub.f32 %v5062_v31, %v1923_v53 }
 0x36d   : > { %1675 = vmatpush.bf16.msra.mxu1 %v1651_v26  ;;  %v1939_v26 = vsel %vm788_vm1, %v5259_v7, -inf }
 0x36e   : > { %v920_v60 = vpop.xlane.xlu0 %919  ;;  %v1447_v37 = vmul.f32 1.442695, %v1420_v52  ;;  %v1880_v3 = vpop.f32.mrf.mxu3  ;;  %v1981_v46 = vmul.f32 1.442695, %v1961_v21 }
 0x371   : > { %1676 = vmatpush.bf16.msra.mxu1 %v1649_v63  ;;  %v1975_v63 = vmul.f32 1.442695, %v1958_v36 }
 0x373   : > { %3767 = vpow2.f32 %v1975_v63  ;;  %v2329_v63 = vpop.f32.mrf.mxu2 }
 0x374   : > { %1473 = vadd.xlane.f32.xlu1 %v1472_v5  ;;  %3769 = vpow2.f32 %v1445_v17 }
 0x375   : > { %3771 = vpow2.f32 %v1977_v33 }
 0x376   : > { %v5257_v11 = vpop.xlane.xlu0 %922  ;;  %3773 = vpow2.f32 %v1447_v37  ;;  %v5282_v31 = vpop.f32.mrf.mxu3 }
 0x377   : > { %3775 = vrcp.f32 %v920_v60 }
 0x379   : > { %v5251_v50 = vpop.eup %3767 }
 0x37a   : > { %v2008_v59 = vsel %vm788_vm1, %v5251_v50, 0.0  ;;  %v5261_v48 = vpop.eup %3769 }
 0x37b   : > { %v1487_v34 = vsel %vm788_vm1, %v5261_v48, 0.0  ;;  %v5270_v5 = vpop.eup %3771  ;;  %v2331_v37 = vpop.f32.mrf.mxu2 }
 0x37c   : > { %1476 = vadd.xlane.f32.xlu1 %v1475_v41  ;;  %v2011_v41 = vsel %vm788_vm1, %v5270_v5, 0.0  ;;  %v5276_v17 = vpop.eup %3773 }
 0x37d   : > { %5993 = vst [vmem:[#allocation12_spill] sm:$0xff] %v5276_v17  ;;  %v1490_v60 = vsel %vm788_vm1, %v5276_v17, 0.0 }
 0x37e   : > { %v5268_v35 = vpop.xlane.xlu0 %1928 }
 0x384   : > { %1482 = vadd.xlane.f32.xlu1 %v1481_v4 }
 0x386   : > { %v5278_v40 = vpop.xlane.xlu0 %928 }
 0x38c   : > { %2009 = vadd.xlane.f32.xlu1 %v2008_v59  ;;  %v3776_v59 = vpop.eup %3775 }
 0x38d   : > { %v960_v33 = vmul.f32 %v3776_v59, %v5072_v29 }
 0x38f   : > { %v976_v21 = vpack.c.bf16 %v960_v33, %v960_v33 }
 0x394   : > { %1940 = vmax.xlane.f32.xlu2 %v1939_v26  ;;  %1488 = vadd.xlane.f32.xlu1 %v1487_v34  ;;  %v5289_v26 = vmul.f32 0.17677669, %v1880_v3 }
 0x397   : > { %v1920_v54 = vpop.xlane.xlu1 %1919 }
 0x398   : > { %v1960_v36 = vsub.f32 %v5119_v43, %v1920_v54 }
 0x39a   : > { %v1979_v8 = vmul.f32 1.442695, %v1960_v36 }
 0x39c   : > { %3777 = vpow2.f32 %v1979_v8  ;;  %2012 = vadd.xlane.f32.xlu1 %v2011_v41 }
 0x39e   : > { %v1405_v4 = vpop.xlane.xlu2 %1404 }
 0x39f   : > { %v917_v38 = vpop.xlane.xlu1 %916  ;;  %v1423_v29 = vsub.f32 %v5129_v13, %v1405_v4  ;;  %v2334_v4 = vpop.f32.mrf.mxu2 }
 0x3a0   : > { %3779 = vrcp.f32 %v917_v38  ;;  %v1942_v38 = vsel %vm788_vm1, %v5289_v26, -inf }
 0x3a1   : > { %3781 = vpow2.f32 %v1981_v46  ;;  %v5294_v46 = vpop.xlane.xlu0 %1467  ;;  %v1453_v7 = vmul.f32 1.442695, %v1423_v29 }
 0x3a2   : > { %v5280_v43 = vpop.eup %3777  ;;  %3783 = vrcp.f32 %v5257_v11 }
 0x3a3   : > { %v2014_v53 = vsel %vm788_vm1, %v5280_v43, 0.0  ;;  %3785 = vpow2.f32 %v1453_v7 }
 0x3a4   : > { %2015 = vadd.xlane.f32.xlu0 %v2014_v53  ;;  %1491 = vadd.xlane.f32.xlu1 %v1490_v60  ;;  %v1077_v53 = vunpack.c.l.b16 %v976_v21  ;;  %v1885_v60 = vpop.f32.mrf.mxu3 }
 0x3a6   : > { %v3780_v52 = vpop.eup %3779  ;;  %v1932_v34 = vpop.xlane.xlu2 %1931 }
 0x3a7   : > { %v1402_v54 = vpop.xlane.xlu1 %1401  ;;  %v959_v36 = vmul.f32 %v3780_v52, %v5131_v23  ;;  %v5292_v8 = vpop.eup %3781  ;;  %v5301_v52 = vmul.f32 0.17677669, %v2329_v63 }
 0x3a8   : > { %v2017_v3 = vsel %vm788_vm1, %v5292_v8, 0.0  ;;  %v3784_v7 = vpop.eup %3783 }
 0x3a9   : > { %v975_v41 = vpack.c.bf16 %v959_v36, %v959_v36  ;;  %v5303_v36 = vmul.f32 0.17677669, %v1885_v60  ;;  %v2463_v29 = vsel %vm788_vm1, %v5301_v52, -inf }
 0x3ab   : > { %v1076_v59 = vunpack.c.l.b16 %v975_v41  ;;  %v1421_v41 = vsub.f32 %v5055_v44, %v5232_v56  ;;  %v1948_v63 = vsel %vm788_vm1, %v5303_v36, -inf  ;;  %v5317_v44 = vmul.f32 0.17677669, %v2331_v37 }
 0x3ac   : > { %2018 = vadd.xlane.f32.xlu0 %v2017_v3  ;;  %1943 = vmax.xlane.f32.xlu1 %v1942_v38  ;;  %v1964_v38 = vsub.f32 %v5143_v55, %v1932_v34  ;;  %v5315_v3 = vpop.xlane.xlu0 %1470  ;;  %v5319_v55 = vpop.eup %3785  ;;  %v1422_v34 = vsub.f32 %v5146_v57, %v1402_v54 }
 0x3ad   : > { %v1083_v23 = vpack.c.b16 %v1077_v53, %v1076_v59  ;;  %v5324_v53 = vpop.f32.mrf.mxu2  ;;  %v2466_v37 = vsel %vm788_vm1, %v5317_v44, -inf }
 0x3ae   : > { %v932_v33 = vpop.xlane.xlu2 %931  ;;  %v1987_v56 = vmul.f32 1.442695, %v1964_v38  ;;  %v1451_v57 = vmul.f32 1.442695, %v1422_v34 }
 0x3af   : > { %v1926_v17 = vpop.xlane.xlu1 %1925  ;;  %3386 = vmatmul.msk.bf16.gmra.mxu1 %vm788_vm1, %v1083_v23  ;;  %v961_v23 = vmul.f32 %v3784_v7, %v5086_v14 }
 0x3b0   : > { %v1962_v13 = vsub.f32 %v5161_v32, %v1926_v17  ;;  %v1449_v32 = vmul.f32 1.442695, %v1421_v41  ;;  %v5333_v41 = vmul.f32 0.17677669, %v2334_v4 }
 0x3b2   : > { %v1983_v21 = vmul.f32 1.442695, %v1962_v13  ;;  %v1499_v13 = vsel %vm788_vm1, %v5319_v55, 0.0  ;;  %v2469_v34 = vsel %vm788_vm1, %v5333_v41, -inf }
 0x3b4   : > { %3787 = vpow2.f32 %v1983_v21  ;;  %1949 = vmax.xlane.f32.xlu0 %v1948_v63  ;;  %2464 = vmax.xlane.f32.xlu1 %v2463_v29  ;;  %v1938_v21 = vpop.xlane.xlu0 %1937 }
 0x3b6   : > { %v1462_v17 = vpop.xlane.xlu2 %1461 }
 0x3b7   : > { %v926_v11 = vpop.xlane.xlu1 %925 }
 0x3b8   : > { %3789 = vrcp.f32 %v926_v11 }
 0x3b9   : > { %3791 = vpow2.f32 %v1449_v32  ;;  %v977_v32 = vpack.c.bf16 %v961_v23, %v961_v23  ;;  %v2339_v23 = vpop.f32.mrf.mxu2 }
 0x3ba   : > { %v5322_v59 = vpop.eup %3787  ;;  %3793 = vpow2.f32 %v1987_v56 }
 0x3bb   : > { %v2020_v60 = vsel %vm788_vm1, %v5322_v59, 0.0  ;;  %3795 = vrcp.f32 %v5278_v40  ;;  %v1966_v40 = vsub.f32 %v5127_v22, %v1938_v21 }
 0x3bc   : > { %2021 = vadd.xlane.f32.xlu2 %v2020_v60  ;;  %2467 = vmax.xlane.f32.xlu1 %v2466_v37  ;;  %3797 = vrcp.f32 %v932_v33  ;;  %v1078_v60 = vunpack.c.l.b16 %v977_v32  ;;  %v5358_v32 = vpop.xlane.xlu0 %1479 }
 0x3bd   : > { %1500 = vadd.xlane.f32.xlu0 %v1499_v13  ;;  %3799 = vpow2.f32 %v1451_v57  ;;  %v1991_v22 = vmul.f32 1.442695, %v1966_v40 }
 0x3be   : > { %v3790_v54 = vpop.eup %3789  ;;  %v5335_v38 = vpop.xlane.xlu2 %2458  ;;  %3801 = vrcp.f32 %v1462_v17 }
 0x3bf   : > { %v1408_v63 = vpop.xlane.xlu1 %1407  ;;  %v962_v29 = vmul.f32 %v3790_v54, %v5171_v0  ;;  %v5339_v14 = vpop.eup %3791 }
 0x3c0   : > { %v1424_v56 = vsub.f32 %v5186_v19, %v1408_v63  ;;  %v5342_v11 = vpop.eup %3793  ;;  %v1493_v0 = vsel %vm788_vm1, %v5339_v14, 0.0 }
 0x3c1   : > { %v978_v7 = vpack.c.bf16 %v962_v29, %v962_v29  ;;  %v2026_v19 = vsel %vm788_vm1, %v5342_v11, 0.0  ;;  %v3796_v33 = vpop.eup %3795  ;;  %v5356_v29 = vmul.f32 0.17677669, %v2339_v23 }
 0x3c2   : > { %v1455_v4 = vmul.f32 1.442695, %v1424_v56  ;;  %v3798_v13 = vpop.eup %3797 }
 0x3c3   : > { %v1079_v37 = vunpack.c.l.b16 %v978_v7  ;;  %v5353_v54 = vpop.eup %3799  ;;  %v964_v56 = vmul.f32 %v3798_v13, %v5158_v61 }
 0x3c4   : > { %3803 = vpow2.f32 %v1455_v4  ;;  %2470 = vmax.xlane.f32.xlu2 %v2469_v34  ;;  %1494 = vadd.xlane.f32.xlu1 %v1493_v0  ;;  %v3802_v63 = vpop.eup %3801  ;;  %v963_v4 = vmul.f32 %v3796_v33, %v5101_v28  ;;  %v1496_v0 = vsel %vm788_vm1, %v5353_v54, 0.0  ;;  %v5372_v28 = vmul.f32 0.17677669, %v5282_v31 }
 0x3c5   : > { %2027 = vadd.xlane.f32.xlu0 %v2026_v19  ;;  %v1084_v17 = vpack.c.b16 %v1079_v37, %v1078_v60  ;;  %v1522_v34 = vmul.f32 %v3802_v63, %v5169_v1  ;;  %v1888_v60 = vpop.f32.mrf.mxu3  ;;  %v2475_v37 = vsel %vm788_vm1, %v5356_v29, -inf  ;;  %v980_v61 = vpack.c.bf16 %v964_v56, %v964_v56 }
 0x3c6   : > { %v5351_v57 = vpop.xlane.xlu2 %2006  ;;  %v5374_v1 = vmul.f32 0.17677669, %v1888_v60  ;;  %v1963_v56 = vsub.f32 %v5094_v18, %v5268_v35  ;;  %v2505_v31 = vsub.f32 %v5183_v27, %v5335_v38  ;;  %v5393_v38 = vmul.f32 0.17677669, %v5324_v53 }
 0x3c7   : > { %v1459_v21 = vpop.xlane.xlu1 %1458  ;;  %3387 = vmatmul.msk.bf16.gmra.mxu1 %vm788_vm1, %v1084_v17  ;;  %v1538_v23 = vpack.c.bf16 %v1522_v34, %v1522_v34 }
 0x3c8   : > { %3805 = vrcp.f32 %v1459_v21  ;;  %v5377_v21 = vpop.xlane.xlu0 %1485  ;;  %v1985_v35 = vmul.f32 1.442695, %v1963_v56  ;;  %v2521_v27 = vmul.f32 1.442695, %v2505_v31  ;;  %v2472_v53 = vsel %vm788_vm1, %v5393_v38, -inf }
 0x3c9   : > { %3807 = vpow2.f32 %v1991_v22  ;;  %v979_v22 = vpack.c.bf16 %v963_v4, %v963_v4  ;;  %v1562_v34 = vunpack.c.l.b16 %v1538_v23  ;;  %v1951_v4 = vsel %vm788_vm1, %v5374_v1, -inf }
 0x3ca   : > { %v5361_v7 = vpop.eup %3803  ;;  %3809 = vrcp.f32 %v5294_v46 }
 0x3cb   : > { %v1502_v40 = vsel %vm788_vm1, %v5361_v7, 0.0 }
 0x3cc   : > { %1503 = vadd.xlane.f32.xlu2 %v1502_v40  ;;  %1497 = vadd.xlane.f32.xlu1 %v1496_v0  ;;  %v1081_v0 = vunpack.c.l.b16 %v980_v61 }
 0x3cd   : > { %2476 = vmax.xlane.f32.xlu0 %v2475_v37  ;;  %v1080_v37 = vunpack.c.l.b16 %v979_v22 }
 0x3ce   : > { %v3806_v19 = vpop.eup %3805  ;;  %v2122_v33 = vpop.permute.xlu2 %2121 }
 0x3cf   : > { %v1521_v17 = vmul.f32 %v3806_v19, %v5194_v62  ;;  %2152 = vmatpush.bf16.msrb.mxu0 %v2122_v33  ;;  %v1935_v13 = vpop.xlane.xlu1 %1934  ;;  %v5379_v63 = vpop.eup %3807  ;;  %v1945_v62 = vsel %vm788_vm1, %v5372_v28, -inf  ;;  %v1085_v61 = vpack.c.b16 %v1081_v0, %v1080_v37 }
 0x3d0   : > { %v2341_v19 = vpop.f32.mrf.mxu2  ;;  %v2032_v18 = vsel %vm788_vm1, %v5379_v63, 0.0 }
 0x3d1   : > { %v1537_v40 = vpack.c.bf16 %v1521_v17, %v1521_v17  ;;  %v5395_v33 = vmul.f32 0.17677669, %v2341_v19  ;;  %v3810_v17 = vpop.eup %3809 }
 0x3d2   : > { %v1524_v56 = vmul.f32 %v3810_v17, %v5108_v2  ;;  %v1965_v2 = vsub.f32 %v5209_v49, %v1935_v13  ;;  %v5994_v49 = vld [vmem:[#allocation11_spill] sm:$0xff] }
 0x3d3   : > { %v1561_v60 = vunpack.c.l.b16 %v1537_v40  ;;  %v2478_v40 = vsel %vm788_vm1, %v5395_v33, -inf }
 0x3d4   : > { %1952 = vmax.xlane.f32.xlu2 %v1951_v4  ;;  %1946 = vmax.xlane.f32.xlu1 %v1945_v62  ;;  %v1540_v62 = vpack.c.bf16 %v1524_v56, %v1524_v56 }
 0x3d5   : > { %v1569_v46 = vpack.c.b16 %v1562_v34, %v1561_v60  ;;  %2033 = vadd.xlane.f32.xlu0 %v2032_v18 }
 0x3d6   : > { %v1564_v19 = vunpack.c.l.b16 %v1540_v62 }
 0x3d7   : > { %v1465_v23 = vpop.xlane.xlu1 %1464  ;;  %3388 = vmatmul.msk.bf16.gmra.mxu1 %vm788_vm1, %v1085_v61  ;;  %3397 = vmatmul.msk.bf16.vlgmr.msra.gmra.mxu0 %vm788_vm1, %v1569_v46  ;;  %v1647_v22 = vpop.permute.xlu0 %1646 }
 0x3d8   : > { %3811 = vrcp.f32 %v1465_v23  ;;  %1677 = vmatpush.bf16.msra.mxu1 %v1647_v22  ;;  %v1890_v61 = vpop.f32.mrf.mxu3 }
 0x3d9   : > { %3813 = vpow2.f32 %v1985_v35  ;;  %v5415_v23 = vmul.f32 0.17677669, %v1890_v61 }
 0x3da   : > { %3815 = vpow2.f32 %v2521_v27  ;;  %v1989_v27 = vmul.f32 1.442695, %v1965_v2 }
 0x3db   : > { %3817 = vrcp.f32 %v5315_v3  ;;  %v1954_v56 = vsel %vm788_vm1, %v5415_v23, -inf }
 0x3dc   : > { %2479 = vmax.xlane.f32.xlu2 %v2478_v40  ;;  %2473 = vmax.xlane.f32.xlu1 %v2472_v53 }
 0x3de   : > { %v3812_v0 = vpop.eup %3811 }
 0x3df   : > { %v5404_v31 = vpop.eup %3813  ;;  %v1523_v34 = vmul.f32 %v3812_v0, %v5215_v42  ;;  %v2462_v60 = vpop.xlane.xlu1 %2461 }
 0x3e0   : > { %v5407_v4 = vpop.eup %3815  ;;  %v2023_v35 = vsel %vm788_vm1, %v5404_v31, 0.0  ;;  %v2506_v13 = vsub.f32 %v5224_v9, %v2462_v60 }
 0x3e1   : > { %v1539_v37 = vpack.c.bf16 %v1523_v34, %v1523_v34  ;;  %v2553_v46 = vsel %vm788_vm1, %v5407_v4, 0.0  ;;  %v3818_v3 = vpop.eup %3817 }
 0x3e2   : > { %v1525_v22 = vmul.f32 %v3818_v3, %v5116_v12  ;;  %v2523_v53 = vmul.f32 1.442695, %v2506_v13 }
 0x3e3   : > { %v1563_v18 = vunpack.c.l.b16 %v1539_v37 }
 0x3e4   : > { %2024 = vadd.xlane.f32.xlu1 %v2023_v35  ;;  %2554 = vadd.xlane.f32.xlu2 %v2553_v46  ;;  %v1541_v0 = vpack.c.bf16 %v1525_v22, %v1525_v22 }
 0x3e5   : > { %v1570_v42 = vpack.c.b16 %v1564_v19, %v1563_v18 }
 0x3e6   : > { %v1565_v12 = vunpack.c.l.b16 %v1541_v0 }
 0x3e7   : > { %v1474_v17 = vpop.xlane.xlu1 %1473  ;;  %3398 = vmatmul.msk.bf16.gmra.mxu0 %vm788_vm1, %v1570_v42 }
 0x3e8   : > { %3819 = vrcp.f32 %v1474_v17 }
 0x3e9   : > { %2200 = vrot.lane.b32.xlu0 %v5994_v49, %s4050_s14  ;;  %3821 = vpow2.f32 %v1989_v27 }
 0x3ea   : > { %3823 = vrcp.f32 %v5358_v32 }
 0x3ec   : > { %1955 = vmax.xlane.f32.xlu1 %v1954_v56 }
 0x3ee   : > { %v3820_v40 = vpop.eup %3819 }
 0x3ef   : > { %v1526_v62 = vmul.f32 %v3820_v40, %v5234_v45  ;;  %v1477_v34 = vpop.xlane.xlu1 %1476  ;;  %v5426_v37 = vpop.eup %3821 }
 0x3f0   : > { %3825 = vrcp.f32 %v1477_v34  ;;  %v2029_v2 = vsel %vm788_vm1, %v5426_v37, 0.0  ;;  %v3824_v32 = vpop.eup %3823 }
 0x3f1   : > { %3827 = vrcp.f32 %v5377_v21  ;;  %v1542_v9 = vpack.c.bf16 %v1526_v62, %v1526_v62  ;;  %2673 = vrot.lane.b32.xlu0 %v4434_v10, %s4051_s10  ;;  %v1528_v10 = vmul.f32 %v3824_v32, %v5141_v51  ;;  %v5451_v62 = vpop.f32.mrf.mxu0 }
 0x3f2   : > { %3829 = vpow2.f32 %v2523_v53 }
 0x3f3   : > { %v1566_v60 = vunpack.c.l.b16 %v1542_v9  ;;  %v1544_v3 = vpack.c.bf16 %v1528_v10, %v1528_v10 }
 0x3f4   : > { %2030 = vadd.xlane.f32.xlu1 %v2029_v2 }
 0x3f5   : > { %v1571_v19 = vpack.c.b16 %v1566_v60, %v1565_v12  ;;  %v1568_v51 = vunpack.c.l.b16 %v1544_v3 }
 0x3f6   : > { %v3826_v45 = vpop.eup %3825 }
 0x3f7   : > { %v3828_v18 = vpop.eup %3827  ;;  %v1483_v35 = vpop.xlane.xlu1 %1482  ;;  %3399 = vmatmul.msk.bf16.gmra.mxu0 %vm788_vm1, %v1571_v19  ;;  %v1527_v21 = vmul.f32 %v3826_v45, %v5240_v58 }
 0x3f8   : > { %v5434_v46 = vpop.eup %3829  ;;  %3831 = vrcp.f32 %v1483_v35  ;;  %v1530_v61 = vmul.f32 %v3828_v18, %v5198_v30  ;;  %v5461_v45 = vpop.f32.mrf.mxu3 }
 0x3f9   : > { %2671 = vrot.lane.b32.xlu0 %v5988_v39, %s4051_s10  ;;  %v2556_v42 = vsel %vm788_vm1, %v5434_v46, 0.0  ;;  %v1543_v27 = vpack.c.bf16 %v1527_v21, %v1527_v21  ;;  %v5459_v32 = vpop.f32.mrf.mxu0 }
 0x3fa   : > { %v1546_v13 = vpack.c.bf16 %v1530_v61, %v1530_v61 }
 0x3fb   : > { %v1567_v39 = vunpack.c.l.b16 %v1543_v27 }
 0x3fc   : > { %2557 = vadd.xlane.f32.xlu1 %v2556_v42  ;;  %2675 = vrot.lane.b32.xlu2 %v5986_v6, %s4051_s10  ;;  %v1635_v30 = vunpack.c.l.b16 %v1546_v13 }
 0x3fd   : > { %v1572_v53 = vpack.c.b16 %v1568_v51, %v1567_v39 }
 0x3fe   : > { %v3832_v17 = vpop.eup %3831 }
 0x3ff   : > { %v1529_v58 = vmul.f32 %v3832_v17, %v5246_v15  ;;  %v2010_v22 = vpop.xlane.xlu1 %2009 }
 0x400   : > { %3833 = vrcp.f32 %v2010_v22  ;;  %v2423_v42 = vpop.f32.mrf.mxu3 }
 0x401   : > { %v1545_v56 = vpack.c.bf16 %v1529_v58, %v1529_v58  ;;  %2194 = vrot.lane.b32.xlu0 %v5990_v47, %s4050_s14  ;;  %3835 = vrcp.f32 %v5351_v57  ;;  %v5466_v10 = vpop.f32.mrf.mxu0 }
 0x403   : > { %v1634_v40 = vunpack.c.l.b16 %v1545_v56 }
 0x404   : > { %2196 = vrot.lane.b32.xlu2 %v4450_v24, %s4050_s14 }
 0x405   : > { %v1642_v6 = vpack.c.b16 %v1635_v30, %v1634_v40  ;;  %v5995_v30 = vld [vmem:[#allocation12_spill] sm:$0xff] }
 0x406   : > { %v3834_v0 = vpop.eup %3833 }
 0x407   : > { %v1489_v15 = vpop.xlane.xlu1 %1488  ;;  %3400 = vmatmul.msk.bf16.gmra.mxu0 %vm788_vm1, %v1572_v53  ;;  %3401 = vmatmul.msk.bf16.vlgmr.msra.gmra.mxu1 %vm788_vm1, %v1642_v6  ;;  %v3836_v34 = vpop.eup %3835  ;;  %v2070_v9 = vmul.f32 %v3834_v0, %v5251_v50  ;;  %v5996_v6 = vld [vmem:[#allocation10_spill] sm:$0xff] }
 0x408   : > { %v2069_v57 = vmul.f32 %v3836_v34, %v5196_v20  ;;  %v1941_v3 = vpop.xlane.xlu2 %1940 }
 0x409   : > { %2669 = vrot.lane.b32.xlu0 %v5991_v16, %s4051_s10  ;;  %v2086_v12 = vpack.c.bf16 %v2070_v9, %v2070_v9  ;;  %v1967_v53 = vsub.f32 %v5996_v6, %v1941_v3  ;;  %v5473_v9 = vpop.f32.mrf.mxu0 }
 0x40a   : > { %v2085_v60 = vpack.c.bf16 %v2069_v57, %v2069_v57 }
 0x40b   : > { %v2110_v19 = vunpack.c.l.b16 %v2086_v12  ;;  %v1993_v12 = vmul.f32 1.442695, %v1967_v53 }
 0x40c   : > { %v2109_v18 = vunpack.c.l.b16 %v2085_v60 }
 0x40e   : > { %v2117_v35 = vpack.c.b16 %v2110_v19, %v2109_v18 }
 0x40f   : > { %v2013_v2 = vpop.xlane.xlu1 %2012 }
 0x410   : > { %3837 = vrcp.f32 %v2013_v2  ;;  %v2426_v2 = vpop.f32.mrf.mxu3 }
 0x411   : > { %3839 = vrcp.f32 %v1489_v15 }
 0x415   : > { %2198 = vrot.lane.b32.xlu1 %v5987_v25, %s4050_s14 }
 0x416   : > { %v3838_v20 = vpop.eup %3837 }
 0x417   : > { %v2016_v50 = vpop.xlane.xlu0 %2015  ;;  %v1492_v21 = vpop.xlane.xlu1 %1491  ;;  %3413 = vmatmul.msk.bf16.vlgmr.msrb.gmra.mxu0 %vm788_vm1, %v2117_v35  ;;  %v2071_v61 = vmul.f32 %v3838_v20, %v5270_v5  ;;  %v5476_v35 = vmul.f32 0.17677669, %v2423_v42 }
 0x418   : > { %3841 = vrcp.f32 %v2016_v50  ;;  %v3840_v16 = vpop.eup %3839 }
 0x419   : > { %3843 = vrcp.f32 %v1492_v21  ;;  %v1531_v27 = vmul.f32 %v3840_v16, %v5261_v48  ;;  %v2087_v58 = vpack.c.bf16 %v2071_v61, %v2071_v61  ;;  %v2484_v16 = vsel %vm788_vm1, %v5476_v35, -inf }
 0x41a   : > { %3845 = vpow2.f32 %v1993_v12  ;;  %v5505_v12 = vmul.f32 0.17677669, %v5461_v45 }
 0x41b   : > { %v1547_v51 = vpack.c.bf16 %v1531_v27, %v1531_v27  ;;  %v2111_v34 = vunpack.c.l.b16 %v2087_v58  ;;  %v5483_v27 = vpop.f32.mrf.mxu0 }
 0x41d   : > { %v1636_v48 = vunpack.c.l.b16 %v1547_v51 }
 0x41e   : > { %v3842_v17 = vpop.eup %3841 }
 0x41f   : > { %v3844_v13 = vpop.eup %3843  ;;  %v2072_v22 = vmul.f32 %v3842_v17, %v5280_v43  ;;  %v2019_v39 = vpop.xlane.xlu0 %2018 }
 0x420   : > { %v1944_v56 = vpop.xlane.xlu1 %1943  ;;  %v1532_v40 = vmul.f32 %v3844_v13, %v5995_v30  ;;  %3847 = vrcp.f32 %v2019_v39  ;;  %v5485_v17 = vpop.eup %3845 }
 0x421   : > { %v2088_v0 = vpack.c.bf16 %v2072_v22, %v2072_v22  ;;  %v5487_v13 = vpop.f32.mrf.mxu3  ;;  %v1968_v30 = vsub.f32 %v5289_v26, %v1944_v56 }
 0x422   : > { %v1548_v15 = vpack.c.bf16 %v1532_v40, %v1532_v40 }
 0x423   : > { %v2112_v5 = vunpack.c.l.b16 %v2088_v0 }
 0x424   : > { %v1637_v57 = vunpack.c.l.b16 %v1548_v15 }
 0x425   : > { %v2118_v60 = vpack.c.b16 %v2112_v5, %v2111_v34  ;;  %v5500_v5 = vmul.f32 0.17677669, %v2426_v2 }
 0x426   : > { %v1643_v19 = vpack.c.b16 %v1637_v57, %v1636_v48  ;;  %v5502_v48 = vpop.f32.mrf.mxu0 }
 0x427   : > { %v1950_v43 = vpop.xlane.xlu0 %1949  ;;  %3414 = vmatmul.msk.bf16.gmra.mxu0 %vm788_vm1, %v2118_v60 }
 0x428   : > { %v2465_v18 = vpop.xlane.xlu1 %2464  ;;  %3402 = vmatmul.msk.bf16.gmra.mxu1 %vm788_vm1, %v1643_v19  ;;  %v1970_v21 = vsub.f32 %v5303_v36, %v1950_v43  ;;  %v2035_v36 = vsel %vm788_vm1, %v5485_v17, 0.0 }
 0x429   : > { %v2507_v50 = vsub.f32 %v5301_v52, %v2465_v18  ;;  %v3848_v52 = vpop.eup %3847  ;;  %v2431_v56 = vpop.f32.mrf.mxu3 }
 0x42a   : > { %v1999_v61 = vmul.f32 1.442695, %v1970_v21  ;;  %v2073_v22 = vmul.f32 %v3848_v52, %v5292_v8  ;;  %v1995_v8 = vmul.f32 1.442695, %v1968_v30  ;;  %v5512_v18 = vmul.f32 0.17677669, %v2431_v56 }
 0x42b   : > { %v2525_v20 = vmul.f32 1.442695, %v2507_v50  ;;  %v2481_v50 = vsel %vm788_vm1, %v5505_v12, -inf }
 0x42c   : > { %v2089_v53 = vpack.c.bf16 %v2073_v22, %v2073_v22 }
 0x42d   : > { %3849 = vpow2.f32 %v2525_v20  ;;  %2485 = vmax.xlane.f32.xlu2 %v2484_v16 }
 0x42e   : > { %v2113_v60 = vunpack.c.l.b16 %v2089_v53 }
 0x42f   : > { %v2022_v3 = vpop.xlane.xlu2 %2021 }
 0x430   : > { %v2468_v42 = vpop.xlane.xlu1 %2467  ;;  %3851 = vrcp.f32 %v2022_v3  ;;  %v1501_v39 = vpop.xlane.xlu0 %1500 }
 0x431   : > { %3853 = vpow2.f32 %v1999_v61  ;;  %v2508_v2 = vsub.f32 %v5317_v44, %v2468_v42  ;;  %v5517_v3 = vpop.f32.mrf.mxu0  ;;  %v2493_v44 = vsel %vm788_vm1, %v5512_v18, -inf }
 0x433   : > { %v5491_v58 = vpop.eup %3849  ;;  %2036 = vadd.xlane.f32.xlu0 %v2035_v36  ;;  %v2527_v61 = vmul.f32 1.442695, %v2508_v2 }
 0x434   : > { %v2559_v51 = vsel %vm788_vm1, %v5491_v58, 0.0 }
 0x435   : > { %2560 = vadd.xlane.f32.xlu2 %v2559_v51 }
 0x436   : > { %v3852_v40 = vpop.eup %3851 }
 0x437   : > { %v5497_v6 = vpop.eup %3853  ;;  %v2074_v0 = vmul.f32 %v3852_v40, %v5322_v59  ;;  %v2471_v34 = vpop.xlane.xlu2 %2470  ;;  %v2487_v59 = vsel %vm788_vm1, %v5500_v5, -inf }
 0x438   : > { %v1495_v15 = vpop.xlane.xlu1 %1494  ;;  %v2044_v26 = vsel %vm788_vm1, %v5497_v6, 0.0  ;;  %v2028_v45 = vpop.xlane.xlu0 %2027 }
 0x439   : > { %v2090_v57 = vpack.c.bf16 %v2074_v0, %v2074_v0  ;;  %3855 = vrcp.f32 %v1495_v15 }
 0x43a   : > { %3857 = vpow2.f32 %v1995_v8 }
 0x43b   : > { %v2114_v19 = vunpack.c.l.b16 %v2090_v57  ;;  %2045 = vadd.xlane.f32.xlu0 %v2044_v26 }
 0x43d   : > { %2488 = vmax.xlane.f32.xlu2 %v2487_v59  ;;  %v2119_v43 = vpack.c.b16 %v2114_v19, %v2113_v60  ;;  %v5532_v60 = vpop.f32.mrf.mxu0 }
 0x43f   : > { %2482 = vmax.xlane.f32.xlu1 %v2481_v50  ;;  %3415 = vmatmul.msk.bf16.gmra.mxu0 %vm788_vm1, %v2119_v43  ;;  %v1504_v20 = vpop.xlane.xlu2 %1503  ;;  %v3856_v16 = vpop.eup %3855 }
 0x440   : > { %v1498_v21 = vpop.xlane.xlu1 %1497  ;;  %v5521_v42 = vpop.eup %3857  ;;  %v1533_v52 = vmul.f32 %v3856_v16, %v5339_v14 }
 0x441   : > { %3859 = vrcp.f32 %v1498_v21  ;;  %v2038_v22 = vsel %vm788_vm1, %v5521_v42, 0.0  ;;  %v5528_v8 = vpop.xlane.xlu0 %2476 }
 0x442   : > { %3861 = vpow2.f32 %v2527_v61  ;;  %v1549_v51 = vpack.c.bf16 %v1533_v52, %v1533_v52 }
 0x443   : > { %2494 = vmax.xlane.f32.xlu0 %v2493_v44  ;;  %3863 = vrcp.f32 %v1504_v20 }
 0x444   : > { %3865 = vrcp.f32 %v1501_v39  ;;  %v1638_v26 = vunpack.c.l.b16 %v1549_v51 }
 0x447   : > { %v3860_v36 = vpop.eup %3859  ;;  %2039 = vadd.xlane.f32.xlu1 %v2038_v22  ;;  %v1953_v53 = vpop.xlane.xlu2 %1952 }
 0x448   : > { %v1534_v30 = vmul.f32 %v3860_v36, %v5353_v54  ;;  %v1947_v40 = vpop.xlane.xlu1 %1946  ;;  %v5530_v57 = vpop.eup %3861  ;;  %v2509_v54 = vsub.f32 %v5333_v41, %v2471_v34  ;;  %v5543_v41 = vmul.f32 0.17677669, %v5487_v13  ;;  %v1971_v34 = vsub.f32 %v5374_v1, %v1953_v53 }
 0x449   : > { %v1969_v0 = vsub.f32 %v5372_v28, %v1947_v40  ;;  %v3864_v59 = vpop.eup %3863  ;;  %v2562_v2 = vsel %vm788_vm1, %v5530_v57, 0.0  ;;  %v5547_v52 = vpop.xlane.xlu0 %2033 }
 0x44a   : > { %v1550_v15 = vpack.c.bf16 %v1534_v30, %v1534_v30  ;;  %v3866_v43 = vpop.eup %3865  ;;  %v2529_v21 = vmul.f32 1.442695, %v2509_v54  ;;  %v1536_v20 = vmul.f32 %v3864_v59, %v5361_v7  ;;  %v2001_v22 = vmul.f32 1.442695, %v1971_v34 }
 0x44b   : > { %v1997_v14 = vmul.f32 1.442695, %v1969_v0  ;;  %v1535_v44 = vmul.f32 %v3866_v43, %v5319_v55  ;;  %v2490_v13 = vsel %vm788_vm1, %v5543_v41, -inf  ;;  %v2433_v0 = vpop.f32.mrf.mxu3  ;;  %v2511_v59 = vsub.f32 %v5356_v29, %v5528_v8 }
 0x44c   : > { %v1639_v56 = vunpack.c.l.b16 %v1550_v15  ;;  %v1552_v7 = vpack.c.bf16 %v1536_v20, %v1536_v20 }
 0x44d   : > { %3867 = vpow2.f32 %v1997_v14  ;;  %v2533_v8 = vmul.f32 1.442695, %v2511_v59 }
 0x44e   : > { %v1644_v19 = vpack.c.b16 %v1639_v56, %v1638_v26  ;;  %3869 = vrcp.f32 %v2028_v45  ;;  %v1551_v45 = vpack.c.bf16 %v1535_v44, %v1535_v44  ;;  %v1641_v30 = vunpack.c.l.b16 %v1552_v7 }
 0x44f   : > { %2563 = vadd.xlane.f32.xlu1 %v2562_v2  ;;  %v2480_v39 = vpop.xlane.xlu2 %2479  ;;  %v5576_v44 = vmul.f32 0.17677669, %v2433_v0 }
 0x450   : > { %v2474_v28 = vpop.xlane.xlu1 %2473  ;;  %3403 = vmatmul.msk.bf16.gmra.mxu1 %vm788_vm1, %v1644_v19  ;;  %v1640_v15 = vunpack.c.l.b16 %v1551_v45  ;;  %v2512_v26 = vsub.f32 %v5395_v33, %v2480_v39 }
 0x451   : > { %v2510_v50 = vsub.f32 %v5393_v38, %v2474_v28 }
 0x452   : > { %v1645_v28 = vpack.c.b16 %v1641_v30, %v1640_v15  ;;  %v2535_v39 = vmul.f32 1.442695, %v2512_v26 }
 0x453   : > { %v5540_v16 = vpop.eup %3867  ;;  %v2531_v61 = vmul.f32 1.442695, %v2510_v50 }
 0x454   : > { %v2041_v36 = vsel %vm788_vm1, %v5540_v16, 0.0  ;;  %v5551_v38 = vpop.f32.mrf.mxu0  ;;  %v3870_v55 = vpop.eup %3869 }
 0x455   : > { %3871 = vpow2.f32 %v2531_v61  ;;  %2042 = vadd.xlane.f32.xlu2 %v2041_v36  ;;  %v2076_v14 = vmul.f32 %v3870_v55, %v5342_v11  ;;  %v2496_v55 = vsel %vm788_vm1, %v5576_v44, -inf }
 0x456   : > { %3873 = vpow2.f32 %v2529_v21 }
 0x457   : > { %2491 = vmax.xlane.f32.xlu1 %v2490_v13  ;;  %v2555_v51 = vpop.xlane.xlu2 %2554  ;;  %v2092_v33 = vpack.c.bf16 %v2076_v14, %v2076_v14 }
 0x458   : > { %v2025_v1 = vpop.xlane.xlu1 %2024 }
 0x459   : > { %3875 = vrcp.f32 %v2025_v1  ;;  %v2116_v7 = vunpack.c.l.b16 %v2092_v33  ;;  %v2436_v1 = vpop.f32.mrf.mxu3 }
 0x45a   : > { %3877 = vpow2.f32 %v2001_v22 }
 0x45b   : > { %v5555_v40 = vpop.eup %3871  ;;  %v2201_v56 = vpop.permute.xlu0 %2200  ;;  %3879 = vpow2.f32 %v2535_v39 }
 0x45c   : > { %v5557_v53 = vpop.eup %3873  ;;  %v2568_v54 = vsel %vm788_vm1, %v5555_v40, 0.0  ;;  %2222 = vmatpush.bf16.msrb.mxu1 %v2201_v56  ;;  %v5563_v19 = vpop.f32.mrf.mxu0 }
 0x45d   : > { %2569 = vadd.xlane.f32.xlu2 %v2568_v54  ;;  %v2565_v11 = vsel %vm788_vm1, %v5557_v53, 0.0 }
 0x45f   : > { %v3876_v43 = vpop.eup %3875  ;;  %2566 = vadd.xlane.f32.xlu1 %v2565_v11  ;;  %v2676_v20 = vpop.permute.xlu2 %2675 }
 0x460   : > { %v2075_v50 = vmul.f32 %v3876_v43, %v5404_v31  ;;  %v1956_v21 = vpop.xlane.xlu1 %1955  ;;  %3404 = vmatmul.msk.bf16.gmra.mxu1 %vm788_vm1, %v1645_v28  ;;  %v5573_v34 = vpop.eup %3877  ;;  %2697 = vmatpush.bf16.msra.mxu0 %v2676_v20  ;;  %v5601_v43 = vmul.f32 0.17677669, %v2436_v1 }
 0x461   : > { %v1972_v29 = vsub.f32 %v5415_v23, %v1956_v21  ;;  %v2047_v31 = vsel %vm788_vm1, %v5573_v34, 0.0  ;;  %v5585_v0 = vpop.eup %3879  ;;  %v2438_v11 = vpop.f32.mrf.mxu3 }
 0x462   : > { %v2091_v61 = vpack.c.bf16 %v2075_v50, %v2075_v50  ;;  %v2574_v59 = vsel %vm788_vm1, %v5585_v0, 0.0  ;;  %v5603_v50 = vmul.f32 0.17677669, %v2438_v11 }
 0x463   : > { %v2003_v36 = vmul.f32 1.442695, %v1972_v29  ;;  %v2674_v13 = vpop.permute.xlu0 %2673  ;;  %v2499_v29 = vsel %vm788_vm1, %v5601_v43, -inf }
 0x464   : > { %v2115_v22 = vunpack.c.l.b16 %v2091_v61  ;;  %v5580_v45 = vpop.f32.mrf.mxu0  ;;  %2698 = vmatpush.bf16.msra.mxu0 %v2674_v13 }
 0x465   : > { %3881 = vpow2.f32 %v2003_v36  ;;  %2048 = vadd.xlane.f32.xlu2 %v2047_v31  ;;  %v2502_v36 = vsel %vm788_vm1, %v5603_v50, -inf }
 0x466   : > { %3883 = vpow2.f32 %v2533_v8  ;;  %v2120_v23 = vpack.c.b16 %v2116_v7, %v2115_v22 }
 0x467   : > { %2497 = vmax.xlane.f32.xlu1 %v2496_v55  ;;  %3885 = vrcp.f32 %v2555_v51 }
 0x468   : > { %v2031_v30 = vpop.xlane.xlu1 %2030  ;;  %3416 = vmatmul.msk.bf16.gmra.mxu0 %vm788_vm1, %v2120_v23 }
 0x46b   : > { %v5587_v15 = vpop.eup %3881  ;;  %v2672_v26 = vpop.permute.xlu0 %2671 }
 0x46c   : > { %v5589_v14 = vpop.eup %3883  ;;  %v2050_v56 = vsel %vm788_vm1, %v5587_v15, 0.0  ;;  %2699 = vmatpush.bf16.msra.mxu0 %v2672_v26  ;;  %v5593_v54 = vpop.f32.mrf.mxu0 }
 0x46d   : > { %2051 = vadd.xlane.f32.xlu0 %v2050_v56  ;;  %2575 = vadd.xlane.f32.xlu2 %v2574_v59  ;;  %v2571_v51 = vsel %vm788_vm1, %v5589_v14, 0.0  ;;  %v3886_v39 = vpop.eup %3885 }
 0x46e   : > { %v2617_v21 = vmul.f32 %v3886_v39, %v5407_v4 }
 0x46f   : > { %2572 = vadd.xlane.f32.xlu1 %v2571_v51 }
 0x470   : > { %v2558_v33 = vpop.xlane.xlu1 %2557  ;;  %v2633_v7 = vpack.c.bf16 %v2617_v21, %v2617_v21  ;;  %v2197_v21 = vpop.permute.xlu2 %2196 }
 0x471   : > { %3887 = vrcp.f32 %v2558_v33 }
 0x472   : > { %v2657_v31 = vunpack.c.l.b16 %v2633_v7  ;;  %3889 = vrcp.f32 %v2031_v30 }
 0x473   : > { %v2195_v20 = vpop.permute.xlu0 %2194  ;;  %3891 = vrcp.f32 %v5547_v52 }
 0x474   : > { %v5608_v8 = vpop.f32.mrf.mxu0 }
 0x475   : > { %2500 = vmax.xlane.f32.xlu0 %v2499_v29 }
 0x477   : > { %v3888_v61 = vpop.eup %3887  ;;  %2503 = vmax.xlane.f32.xlu1 %v2502_v36 }
 0x478   : > { %v2618_v22 = vmul.f32 %v3888_v61, %v5434_v46  ;;  %v3890_v56 = vpop.eup %3889 }
 0x479   : > { %v3892_v59 = vpop.eup %3891  ;;  %v2077_v51 = vmul.f32 %v3890_v56, %v5426_v37 }
 0x47a   : > { %v2634_v13 = vpack.c.bf16 %v2618_v22, %v2618_v22  ;;  %v2078_v11 = vmul.f32 %v3892_v59, %v5379_v63  ;;  %v5636_v22 = vpop.f32.mrf.mxu1 }
 0x47b   : > { %v2670_v23 = vpop.permute.xlu0 %2669  ;;  %v2093_v33 = vpack.c.bf16 %v2077_v51, %v2077_v51 }
 0x47c   : > { %v2658_v1 = vunpack.c.l.b16 %v2634_v13  ;;  %2700 = vmatpush.bf16.msra.mxu0 %v2670_v23  ;;  %v5613_v4 = vpop.f32.mrf.mxu0  ;;  %v2094_v39 = vpack.c.bf16 %v2078_v11, %v2078_v11 }
 0x47d   : > { %v2182_v61 = vunpack.c.l.b16 %v2093_v33 }
 0x47e   : > { %v2665_v55 = vpack.c.b16 %v2658_v1, %v2657_v31  ;;  %v2183_v36 = vunpack.c.l.b16 %v2094_v39 }
 0x480   : > { %3429 = vmatmul.msk.bf16.vlgmr.msra.gmra.mxu0 %vm788_vm1, %v2665_v55  ;;  %v2190_v37 = vpack.c.b16 %v2183_v36, %v2182_v61 }
 0x482   : > { %v5643_v55 = vpop.f32.mrf.mxu1 }
 0x484   : > { %v5619_v46 = vpop.f32.mrf.mxu0 }
 0x487   : > { %v2199_v30 = vpop.permute.xlu1 %2198 }
 0x488   : > { %2223 = vmatpush.bf16.msrb.mxu1 %v2199_v30 }
 0x48c   : > { %v5623_v29 = vpop.f32.mrf.mxu0  ;;  %2224 = vmatpush.bf16.msrb.mxu1 %v2197_v21 }
 0x490   : > { %2748 = vrot.lane.b32.xlu1 %v5994_v49, %s4051_s10  ;;  %2225 = vmatpush.bf16.msrb.mxu1 %v2195_v20 }
 0x493   : > { %3417 = vmatmul.msk.bf16.vlgmr.msrb.gmra.mxu1 %vm788_vm1, %v2190_v37 }
 0x494   : > { %v5630_v63 = vpop.f32.mrf.mxu0 }
 0x498   : > { %2742 = vrot.lane.b32.xlu1 %v5990_v47, %s4051_s10 }
 0x49c   : > { %v5634_v7 = vpop.f32.mrf.mxu0 }
 0x4a0   : > { %v2486_v31 = vpop.xlane.xlu2 %2485 }
 0x4a1   : > { %v2514_v1 = vsub.f32 %v5476_v35, %v2486_v31  ;;  %v5653_v35 = vpop.f32.mrf.mxu1 }
 0x4a3   : > { %v2539_v49 = vmul.f32 1.442695, %v2514_v1 }
 0x4a4   : > { %v5641_v20 = vpop.f32.mrf.mxu0 }
 0x4a5   : > { %3893 = vpow2.f32 %v2539_v49 }
 0x4a6   : > { %v2037_v23 = vpop.xlane.xlu0 %2036 }
 0x4a7   : > { %3895 = vrcp.f32 %v2037_v23 }
 0x4a8   : > { %v2561_v39 = vpop.xlane.xlu2 %2560 }
 0x4a9   : > { %v5657_v37 = vpop.f32.mrf.mxu1 }
 0x4ab   : > { %v5645_v56 = vpop.eup %3893 }
 0x4ac   : > { %v5647_v47 = vpop.f32.mrf.mxu0  ;;  %v2580_v59 = vsel %vm788_vm1, %v5645_v56, 0.0 }
 0x4ad   : > { %2581 = vadd.xlane.f32.xlu0 %v2580_v59  ;;  %v3896_v49 = vpop.eup %3895 }
 0x4ae   : > { %v2046_v11 = vpop.xlane.xlu0 %2045  ;;  %v2079_v23 = vmul.f32 %v3896_v49, %v5485_v17 }
 0x4b2   : > { %v2483_v30 = vpop.xlane.xlu1 %2482 }
 0x4b3   : > { %v2513_v33 = vsub.f32 %v5505_v12, %v2483_v30  ;;  %v2489_v30 = vpop.xlane.xlu2 %2488 }
 0x4b5   : > { %v2537_v21 = vmul.f32 1.442695, %v2513_v33  ;;  %v5668_v33 = vpop.f32.mrf.mxu1 }
 0x4b6   : > { %v2495_v61 = vpop.xlane.xlu0 %2494 }
 0x4b7   : > { %3897 = vpow2.f32 %v2537_v21  ;;  %v2517_v36 = vsub.f32 %v5512_v18, %v2495_v61 }
 0x4b9   : > { %v2545_v31 = vmul.f32 1.442695, %v2517_v36 }
 0x4ba   : > { %v2040_v1 = vpop.xlane.xlu1 %2039 }
 0x4bb   : > { %3899 = vpow2.f32 %v2545_v31  ;;  %v2095_v31 = vpack.c.bf16 %v2079_v23, %v2079_v23 }
 0x4bc   : > { %3901 = vrcp.f32 %v2040_v1  ;;  %v5659_v59 = vpop.f32.mrf.mxu0 }
 0x4bd   : > { %v5661_v51 = vpop.eup %3897  ;;  %3903 = vrcp.f32 %v2561_v39 }
 0x4be   : > { %v2577_v12 = vsel %vm788_vm1, %v5661_v51, 0.0 }
 0x4bf   : > { %2578 = vadd.xlane.f32.xlu2 %v2577_v12 }
 0x4c1   : > { %v5666_v18 = vpop.eup %3899  ;;  %2744 = vrot.lane.b32.xlu0 %v4450_v24, %s4051_s10  ;;  %v2184_v24 = vunpack.c.l.b16 %v2095_v31 }
 0x4c2   : > { %v3902_v21 = vpop.eup %3901  ;;  %v2564_v61 = vpop.xlane.xlu1 %2563  ;;  %v2589_v36 = vsel %vm788_vm1, %v5666_v18, 0.0 }
 0x4c3   : > { %v3904_v39 = vpop.eup %3903  ;;  %v2080_v1 = vmul.f32 %v3902_v21, %v5521_v42  ;;  %3905 = vrcp.f32 %v2564_v61  ;;  %2590 = vadd.xlane.f32.xlu1 %v2589_v36  ;;  %v5683_v61 = vpop.f32.mrf.mxu1 }
 0x4c4   : > { %v5675_v17 = vpop.f32.mrf.mxu0  ;;  %v2619_v52 = vmul.f32 %v3904_v39, %v5491_v58  ;;  %3907 = vrcp.f32 %v2046_v11 }
 0x4c5   : > { %v2096_v49 = vpack.c.bf16 %v2080_v1, %v2080_v1 }
 0x4c6   : > { %v2635_v23 = vpack.c.bf16 %v2619_v52, %v2619_v52 }
 0x4c7   : > { %v2185_v13 = vunpack.c.l.b16 %v2096_v49 }
 0x4c8   : > { %v2043_v26 = vpop.xlane.xlu2 %2042  ;;  %v2659_v58 = vunpack.c.l.b16 %v2635_v23  ;;  %v2515_v23 = vsub.f32 %v5500_v5, %v2489_v30 }
 0x4c9   : > { %3909 = vrcp.f32 %v2043_v26  ;;  %v3906_v28 = vpop.eup %3905  ;;  %v2191_v2 = vpack.c.b16 %v2185_v13, %v2184_v24 }
 0x4ca   : > { %v2620_v42 = vmul.f32 %v3906_v28, %v5530_v57  ;;  %v5681_v21 = vpop.xlane.xlu1 %2491  ;;  %v3908_v36 = vpop.eup %3907 }
 0x4cb   : > { %3418 = vmatmul.msk.bf16.gmra.mxu1 %vm788_vm1, %v2191_v2  ;;  %v2082_v39 = vmul.f32 %v3908_v36, %v5497_v6  ;;  %v5689_v49 = vpop.f32.mrf.mxu1 }
 0x4cc   : > { %v2636_v1 = vpack.c.bf16 %v2620_v42, %v2620_v42 }
 0x4cd   : > { %v2098_v28 = vpack.c.bf16 %v2082_v39, %v2082_v39  ;;  %v2541_v39 = vmul.f32 1.442695, %v2515_v23 }
 0x4ce   : > { %v2660_v11 = vunpack.c.l.b16 %v2636_v1 }
 0x4cf   : > { %v3910_v12 = vpop.eup %3909  ;;  %v2187_v42 = vunpack.c.l.b16 %v2098_v28 }
 0x4d0   : > { %v2081_v26 = vmul.f32 %v3910_v12, %v5540_v16  ;;  %v2570_v31 = vpop.xlane.xlu2 %2569  ;;  %v2666_v52 = vpack.c.b16 %v2660_v11, %v2659_v58 }
 0x4d1   : > { %3911 = vrcp.f32 %v2570_v31 }
 0x4d2   : > { %v2097_v13 = vpack.c.bf16 %v2081_v26, %v2081_v26  ;;  %v2567_v57 = vpop.xlane.xlu1 %2566  ;;  %3430 = vmatmul.msk.bf16.gmra.mxu0 %vm788_vm1, %v2666_v52 }
 0x4d3   : > { %3913 = vrcp.f32 %v2567_v57  ;;  %v5697_v5 = vpop.f32.mrf.mxu1 }
 0x4d4   : > { %v2186_v2 = vunpack.c.l.b16 %v2097_v13 }
 0x4d6   : > { %v2192_v36 = vpack.c.b16 %v2187_v42, %v2186_v2 }
 0x4d7   : > { %v3912_v24 = vpop.eup %3911  ;;  %2746 = vrot.lane.b32.xlu2 %v5987_v25, %s4051_s10 }
 0x4d8   : > { %v2622_v6 = vmul.f32 %v3912_v24, %v5555_v40  ;;  %v2049_v16 = vpop.xlane.xlu2 %2048 }
 0x4d9   : > { %v3914_v12 = vpop.eup %3913  ;;  %3915 = vrcp.f32 %v2049_v16 }
 0x4da   : > { %v2638_v1 = vpack.c.bf16 %v2622_v6, %v2622_v6  ;;  %v2621_v58 = vmul.f32 %v3914_v12, %v5557_v53  ;;  %v2498_v11 = vpop.xlane.xlu1 %2497  ;;  %3917 = vpow2.f32 %v2541_v39 }
 0x4db   : > { %3419 = vmatmul.msk.bf16.gmra.mxu1 %vm788_vm1, %v2192_v36  ;;  %v2518_v57 = vsub.f32 %v5576_v44, %v2498_v11  ;;  %v5704_v6 = vpop.f32.mrf.mxu1 }
 0x4dc   : > { %v2637_v26 = vpack.c.bf16 %v2621_v58, %v2621_v58  ;;  %v2662_v31 = vunpack.c.l.b16 %v2638_v1 }
 0x4dd   : > { %v2547_v24 = vmul.f32 1.442695, %v2518_v57 }
 0x4de   : > { %v2661_v52 = vunpack.c.l.b16 %v2637_v26 }
 0x4df   : > { %v3916_v30 = vpop.eup %3915 }
 0x4e0   : > { %v2052_v40 = vpop.xlane.xlu0 %2051  ;;  %v2576_v25 = vpop.xlane.xlu2 %2575  ;;  %v2667_v13 = vpack.c.b16 %v2662_v31, %v2661_v52  ;;  %v2083_v28 = vmul.f32 %v3916_v30, %v5573_v34 }
 0x4e1   : > { %3919 = vrcp.f32 %v2052_v40  ;;  %v5702_v2 = vpop.eup %3917 }
 0x4e2   : > { %3921 = vrcp.f32 %v2576_v25  ;;  %v2573_v53 = vpop.xlane.xlu1 %2572  ;;  %3431 = vmatmul.msk.bf16.gmra.mxu0 %vm788_vm1, %v2667_v13  ;;  %v2099_v16 = vpack.c.bf16 %v2083_v28, %v2083_v28  ;;  %v2583_v39 = vsel %vm788_vm1, %v5702_v2, 0.0 }
 0x4e3   : > { %3923 = vrcp.f32 %v2573_v53  ;;  %v1681_v28 = vpop.f32.mrf.mxu1 }
 0x4e4   : > { %3925 = vpow2.f32 %v2547_v24  ;;  %v2188_v26 = vunpack.c.l.b16 %v2099_v16 }
 0x4e7   : > { %v3920_v42 = vpop.eup %3919 }
 0x4e8   : > { %v3922_v23 = vpop.eup %3921  ;;  %v2084_v12 = vmul.f32 %v3920_v42, %v5587_v15  ;;  %v2501_v42 = vpop.xlane.xlu0 %2500 }
 0x4e9   : > { %v2624_v36 = vmul.f32 %v3922_v23, %v5585_v0  ;;  %v3924_v44 = vpop.eup %3923  ;;  %v2516_v0 = vsub.f32 %v5543_v41, %v5681_v21  ;;  %v2519_v41 = vsub.f32 %v5601_v43, %v2501_v42  ;;  %v5997_v43 = vpack.i.bf16 %v5563_v19, %v5551_v38 }
 0x4ea   : > { %v2100_v1 = vpack.c.bf16 %v2084_v12, %v2084_v12  ;;  %v2623_v11 = vmul.f32 %v3924_v44, %v5589_v14  ;;  %v2504_v34 = vpop.xlane.xlu1 %2503  ;;  %v5714_v57 = vpop.eup %3925  ;;  %v5999_v38 = vpack.i.bf16 %v5613_v4, %v5608_v8 }
 0x4eb   : > { %v2640_v58 = vpack.c.bf16 %v2624_v36, %v2624_v36  ;;  %v2520_v52 = vsub.f32 %v5603_v50, %v2504_v34  ;;  %2584 = vadd.xlane.f32.xlu0 %v2583_v39  ;;  %v2169_v14 = vpop.f32.mrf.mxu0  ;;  %v2543_v24 = vmul.f32 1.442695, %v2516_v0  ;;  %v2592_v50 = vsel %vm788_vm1, %v5714_v57, 0.0  ;;  %v1684_v16 = vpop.f32.mrf.mxu1 }
 0x4ec   : > { %v2189_v31 = vunpack.c.l.b16 %v2100_v1  ;;  %v2639_v40 = vpack.c.bf16 %v2623_v11, %v2623_v11  ;;  %v2549_v36 = vmul.f32 1.442695, %v2519_v41  ;;  %v6000_v0 = vpack.i.bf16 %v5634_v7, %v5630_v63 }
 0x4ed   : > { %v2551_v30 = vmul.f32 1.442695, %v2520_v52  ;;  %v2664_v25 = vunpack.c.l.b16 %v2640_v58  ;;  %v6003_v63 = vpack.i.bf16 %v5675_v17, %v5659_v59 }
 0x4ee   : > { %v2193_v15 = vpack.c.b16 %v2189_v31, %v2188_v26  ;;  %v2663_v13 = vunpack.c.l.b16 %v2639_v40 }
 0x4ef   : > { %3927 = vpow2.f32 %v2551_v30  ;;  %v5998_v30 = vpack.i.bf16 %v5593_v54, %v5580_v45  ;;  %v3632_v45 = vpack.i.bf16 %v1681_v28, %v5704_v6  ;;  %v6002_v54 = vpack.i.bf16 %v5647_v47, %v5641_v20 }
 0x4f0   : > { %3420 = vmatmul.msk.bf16.gmra.mxu1 %vm788_vm1, %v2193_v15  ;;  %v2668_v53 = vpack.c.b16 %v2664_v25, %v2663_v13  ;;  %3929 = vpow2.f32 %v2543_v24  ;;  %v6001_v25 = vpack.i.bf16 %v5623_v29, %v5619_v46 }
 0x4f1   : > { %3931 = vpow2.f32 %v2549_v36  ;;  %v3508_v36 = vld [vmem:[%s5956_s2 + $0x38] sm:$0xff] }
 0x4f2   : > { %3432 = vmatmul.msk.bf16.gmra.mxu0 %vm788_vm1, %v2668_v53  ;;  %3112 = vmatpush.bf16.msra.mxu2 %v3508_v36 }
 0x4f3   : > { %2593 = vadd.xlane.f32.xlu0 %v2592_v50  ;;  %v2171_v12 = vpop.f32.mrf.mxu0  ;;  %v1686_v34 = vpop.f32.mrf.mxu1 }
 0x4f4   : > { %v3647_v4 = vpack.i.bf16 %v1686_v34, %v1684_v16  ;;  %v3622_v6 = vpack.i.bf16 %v2171_v12, %v2169_v14 }
 0x4f5   : > { %v5720_v23 = vpop.eup %3927 }
 0x4f6   : > { %v2598_v21 = vsel %vm788_vm1, %v5720_v23, 0.0  ;;  %v5725_v44 = vpop.eup %3929 }
 0x4f7   : > { %2599 = vadd.xlane.f32.xlu1 %v2598_v21  ;;  %v2586_v1 = vsel %vm788_vm1, %v5725_v44, 0.0  ;;  %v5729_v39 = vpop.eup %3931 }
 0x4f8   : > { %v2595_v26 = vsel %vm788_vm1, %v5729_v39, 0.0 }
 0x4fb   : > { %v1689_v31 = vpop.f32.mrf.mxu1 }
 0x4fd   : > { %v2702_v58 = vpop.f32.mrf.mxu0 }
 0x500   : > { %2587 = vadd.xlane.f32.xlu2 %v2586_v1  ;;  %v3507_v1 = vld [vmem:[%s5956_s2 + $0x30] sm:$0xff] }
 0x501   : > { %3113 = vmatpush.bf16.msra.mxu2 %v3507_v1 }
 0x502   : > { %v2749_v11 = vpop.permute.xlu1 %2748 }
 0x503   : > { %2770 = vmatpush.bf16.msra.mxu1 %v2749_v11  ;;  %v1691_v15 = vpop.f32.mrf.mxu1 }
 0x504   : > { %v3662_v7 = vpack.i.bf16 %v1691_v15, %v1689_v31  ;;  %v3503_v15 = vld [vmem:[%s5956_s2 + $0x10] sm:$0xff] }
 0x505   : > { %v2704_v52 = vpop.f32.mrf.mxu0 }
 0x506   : > { %v3582_v40 = vpack.i.bf16 %v2704_v52, %v2702_v58 }
 0x507   : > { %3573 = vrot.lane.b32.xlu0 %v5997_v43, %s4051_s10  ;;  %v3506_v43 = vld [vmem:[%s5956_s2 + $0x28] sm:$0xff] }
 0x508   : > { %2596 = vadd.xlane.f32.xlu2 %v2595_v26  ;;  %3114 = vmatpush.bf16.msra.mxu2 %v3506_v43  ;;  %v3505_v26 = vld [vmem:[%s5956_s2 + $0x20] sm:$0xff] }
 0x50a   : > { %v2743_v16 = vpop.permute.xlu1 %2742 }
 0x50b   : > { %v1694_v19 = vpop.f32.mrf.mxu1 }
 0x50c   : > { %3115 = vmatpush.bf16.msra.mxu2 %v3505_v26 }
 0x50f   : > { %3588 = vrot.lane.b32.xlu0 %v5998_v30, %s4051_s10  ;;  %v3504_v30 = vld [vmem:[%s5956_s2 + $0x18] sm:$0xff] }
 0x510   : > { %3583 = vrot.lane.b32.xlu1 %v3582_v40, %s4049_s6  ;;  %3116 = vmatpush.bf16.msra.mxu2 %v3504_v30 }
 0x513   : > { %v1696_v8 = vpop.f32.mrf.mxu1 }
 0x514   : > { %v3677_v50 = vpack.i.bf16 %v1696_v8, %v1694_v19  ;;  %3117 = vmatpush.bf16.msra.mxu2 %v3503_v15 }
 0x518   : > { %3603 = vrot.lane.b32.xlu1 %v5999_v38, %s4051_s10 }
 0x51b   : > { %v2227_v46 = vpop.f32.mrf.mxu1 }
 0x520   : > { %3578 = vrot.lane.b32.xlu2 %v6000_v0, %s4050_s14  ;;  %3618 = vrot.lane.b32.xlu1 %v6001_v25, %s4051_s10  ;;  %v2582_v13 = vpop.xlane.xlu0 %2581  ;;  %v3502_v25 = vld [vmem:[%s5956_s2 + $0x8] sm:$0xff] }
 0x521   : > { %3933 = vrcp.f32 %v2582_v13  ;;  %3118 = vmatpush.bf16.msra.mxu2 %v3502_v25 }
 0x523   : > { %v2229_v17 = vpop.f32.mrf.mxu1 }
 0x524   : > { %v3637_v42 = vpack.i.bf16 %v2229_v17, %v2227_v46 }
 0x527   : > { %v3934_v20 = vpop.eup %3933 }
 0x528   : > { %3593 = vrot.lane.b32.xlu2 %v6002_v54, %s4050_s14  ;;  %3633 = vrot.lane.b32.xlu1 %v3632_v45, %s4051_s10  ;;  %v2626_v53 = vmul.f32 %v3934_v20, %v5645_v56  ;;  %v3501_v45 = vld [vmem:[%s5956_s2] sm:$0xff] }
 0x529   : > { %3119 = vmatpush.bf16.msra.mxu2 %v3501_v45 }
 0x52a   : > { %v2642_v41 = vpack.c.bf16 %v2626_v53, %v2626_v53 }
 0x52c   : > { %v2731_v12 = vunpack.c.l.b16 %v2642_v41 }
 0x530   : > { %3608 = vrot.lane.b32.xlu2 %v6003_v63, %s4050_s14  ;;  %3648 = vrot.lane.b32.xlu1 %v3647_v4, %s4051_s10 }
 0x532   : > { %v2579_v29 = vpop.xlane.xlu2 %2578 }
 0x533   : > { %3935 = vrcp.f32 %v2579_v29  ;;  %v2745_v21 = vpop.permute.xlu0 %2744 }
 0x536   : > { %v2591_v46 = vpop.xlane.xlu1 %2590 }
 0x538   : > { %3623 = vrot.lane.b32.xlu2 %v3622_v6, %s4050_s14  ;;  %3663 = vrot.lane.b32.xlu1 %v3662_v7, %s4051_s10 }
 0x539   : > { %v3936_v47 = vpop.eup %3935 }
 0x53a   : > { %v2625_v28 = vmul.f32 %v3936_v47, %v5661_v51  ;;  %v2747_v59 = vpop.permute.xlu2 %2746 }
 0x53b   : > { %2771 = vmatpush.bf16.msra.mxu1 %v2747_v59 }
 0x53c   : > { %v2641_v24 = vpack.c.bf16 %v2625_v28, %v2625_v28 }
 0x53e   : > { %v2730_v14 = vunpack.c.l.b16 %v2641_v24 }
 0x53f   : > { %2772 = vmatpush.bf16.msra.mxu1 %v2745_v21 }
 0x540   : > { %3678 = vrot.lane.b32.xlu1 %v3677_v50, %s4051_s10  ;;  %3638 = vrot.lane.b32.xlu2 %v3637_v42, %s4050_s14  ;;  %v2738_v56 = vpack.c.b16 %v2731_v12, %v2730_v14 }
 0x543   : > { %2773 = vmatpush.bf16.msra.mxu1 %v2743_v16 }
 0x546   : > { %3433 = vmatmul.msk.bf16.vlgmr.msra.gmra.mxu1 %vm788_vm1, %v2738_v56 }
 0x548   : > { %v2232_v51 = vpop.f32.mrf.mxu1 }
 0x54f   : > { %v2707_v58 = vpop.f32.mrf.mxu0 }
 0x550   : > { %v2234_v11 = vpop.f32.mrf.mxu1 }
 0x551   : > { %v3652_v34 = vpack.i.bf16 %v2234_v11, %v2232_v51 }
 0x553   : > { %3653 = vrot.lane.b32.xlu2 %v3652_v34, %s4050_s14 }
 0x557   : > { %v2709_v31 = vpop.f32.mrf.mxu0 }
 0x558   : > { %v2237_v52 = vpop.f32.mrf.mxu1  ;;  %v3597_v40 = vpack.i.bf16 %v2709_v31, %v2707_v58 }
 0x55a   : > { %3598 = vrot.lane.b32.xlu0 %v3597_v40, %s4049_s6 }
 0x55e   : > { %v2585_v4 = vpop.xlane.xlu0 %2584 }
 0x55f   : > { %v2712_v38 = vpop.f32.mrf.mxu0  ;;  %3937 = vrcp.f32 %v2585_v4 }
 0x560   : > { %v2239_v19 = vpop.f32.mrf.mxu1 }
 0x561   : > { %v3667_v0 = vpack.i.bf16 %v2239_v19, %v2237_v52 }
 0x563   : > { %3668 = vrot.lane.b32.xlu2 %v3667_v0, %s4050_s14 }
 0x565   : > { %v3938_v7 = vpop.eup %3937 }
 0x566   : > { %v2594_v47 = vpop.xlane.xlu0 %2593  ;;  %v2627_v53 = vmul.f32 %v3938_v7, %v5702_v2 }
 0x567   : > { %v2714_v54 = vpop.f32.mrf.mxu0 }
 0x568   : > { %v3612_v8 = vpack.i.bf16 %v2714_v54, %v2712_v38  ;;  %v2643_v50 = vpack.c.bf16 %v2627_v53, %v2627_v53 }
 0x56a   : > { %3613 = vrot.lane.b32.xlu0 %v3612_v8, %s4049_s6  ;;  %v2600_v24 = vpop.xlane.xlu1 %2599  ;;  %v2732_v16 = vunpack.c.l.b16 %v2643_v50 }
 0x56d   : > { %v2242_v13 = vpop.f32.mrf.mxu1 }
 0x56f   : > { %v2717_v63 = vpop.f32.mrf.mxu0 }
 0x573   : > { %v2588_v29 = vpop.xlane.xlu2 %2587 }
 0x574   : > { %3939 = vrcp.f32 %v2588_v29 }
 0x575   : > { %v2244_v6 = vpop.f32.mrf.mxu1  ;;  %3941 = vrcp.f32 %v2594_v47 }
 0x576   : > { %v3682_v20 = vpack.i.bf16 %v2244_v6, %v2242_v13  ;;  %3943 = vrcp.f32 %v2591_v46 }
 0x577   : > { %v2719_v28 = vpop.f32.mrf.mxu0 }
 0x578   : > { %3683 = vrot.lane.b32.xlu2 %v3682_v20, %s4050_s14  ;;  %v3627_v59 = vpack.i.bf16 %v2719_v28, %v2717_v63 }
 0x579   : > { %v3574_v14 = vpop.permute.xlu0 %3573 }
 0x57a   : > { %v3940_v17 = vpop.eup %3939  ;;  %3628 = vrot.lane.b32.xlu0 %v3627_v59, %s4049_s6  ;;  %v3576_v2 = vunpack.i.h.bf16 %v3574_v14  ;;  %v3575_v51 = vunpack.i.l.bf16 %v3574_v14 }
 0x57b   : > { %v2628_v42 = vmul.f32 %v3940_v17, %v5725_v44  ;;  %v2597_v41 = vpop.xlane.xlu2 %2596  ;;  %v3942_v56 = vpop.eup %3941 }
 0x57c   : > { %v3944_v11 = vpop.eup %3943  ;;  %v2630_v34 = vmul.f32 %v3942_v56, %v5714_v57  ;;  %v2988_v26 = vsel %vm625_vm0, %v5459_v32, %v3576_v2  ;;  %v2987_v31 = vsel %vm625_vm0, %v5451_v62, %v3575_v51  ;;  %3945 = vrcp.f32 %v2597_v41 }
 0x57d   : > { %v2644_v21 = vpack.c.bf16 %v2628_v42, %v2628_v42  ;;  %v2629_v38 = vmul.f32 %v3944_v11, %v5666_v18  ;;  %3947 = vrcp.f32 %v2600_v24 }
 0x57e   : > { %v2646_v25 = vpack.c.bf16 %v2630_v34, %v2630_v34 }
 0x57f   : > { %v2733_v12 = vunpack.c.l.b16 %v2644_v21  ;;  %v2645_v45 = vpack.c.bf16 %v2629_v38, %v2629_v38 }
 0x580   : > { %v2735_v32 = vunpack.c.l.b16 %v2646_v25 }
 0x581   : > { %v2739_v36 = vpack.c.b16 %v2733_v12, %v2732_v16  ;;  %v2734_v62 = vunpack.c.l.b16 %v2645_v45  ;;  %v3589_v47 = vpop.permute.xlu0 %3588 }
 0x582   : > { %v3584_v1 = vpop.permute.xlu1 %3583  ;;  %v3946_v8 = vpop.eup %3945  ;;  %v3591_v28 = vunpack.i.h.bf16 %v3589_v47  ;;  %v3590_v59 = vunpack.i.l.bf16 %v3589_v47 }
 0x583   : > { %3434 = vmatmul.msk.bf16.gmra.mxu1 %vm788_vm1, %v2739_v36  ;;  %v3579_v58 = vpop.permute.xlu2 %3578  ;;  %v3586_v52 = vunpack.i.h.bf16 %v3584_v1  ;;  %v3585_v40 = vunpack.i.l.bf16 %v3584_v1  ;;  %v2740_v54 = vpack.c.b16 %v2735_v32, %v2734_v62  ;;  %v3948_v4 = vpop.eup %3947  ;;  %v2631_v13 = vmul.f32 %v3946_v8, %v5729_v39 }
 0x584   : > { %v3581_v43 = vunpack.i.h.bf16 %v3579_v58  ;;  %v3580_v44 = vunpack.i.l.bf16 %v3579_v58  ;;  %v2632_v18 = vmul.f32 %v3948_v4, %v5720_v23  ;;  %v2990_v23 = vsel %vm625_vm0, %v5473_v9, %v3591_v28 }
 0x585   : > { %v2647_v63 = vpack.c.bf16 %v2631_v13, %v2631_v13  ;;  %v2989_v39 = vsel %vm625_vm0, %v5466_v10, %v3590_v59 }
 0x586   : > { %v3004_v30 = vsel %vm788_vm1, %v2988_v26, %v3581_v43  ;;  %v3003_v15 = vsel %vm788_vm1, %v2987_v31, %v3580_v44  ;;  %v2648_v46 = vpack.c.bf16 %v2632_v18, %v2632_v18 }
 0x587   : > { %v3021_v19 = vsel %vm3019_vm2, %v3004_v30, %v3586_v52  ;;  %v3020_v57 = vsel %vm3019_vm2, %v3003_v15, %v3585_v40  ;;  %v2736_v29 = vunpack.c.l.b16 %v2647_v63 }
 0x588   : > { %v3036_v0 = vpack.c.bf16 %v3021_v19, %v3020_v57  ;;  %v2737_v7 = vunpack.c.l.b16 %v2648_v46 }
 0x58a   : > { %3120 = vmatmul.bf16.vlgmr.msra.gmra.mxu2 %v3036_v0  ;;  %v2741_v6 = vpack.c.b16 %v2737_v7, %v2736_v29  ;;  %v3604_v36 = vpop.permute.xlu1 %3603 }
 0x58b   : > { %v3594_v53 = vpop.permute.xlu2 %3593  ;;  %v3606_v9 = vunpack.i.h.bf16 %v3604_v36  ;;  %v3605_v58 = vunpack.i.l.bf16 %v3604_v36 }
 0x58c   : > { %v3596_v17 = vunpack.i.h.bf16 %v3594_v53  ;;  %v3595_v24 = vunpack.i.l.bf16 %v3594_v53 }
 0x58d   : > { %v2992_v43 = vsel %vm625_vm0, %v5502_v48, %v3606_v9  ;;  %v2991_v44 = vsel %vm625_vm0, %v5483_v27, %v3605_v58 }
 0x58e   : > { %v3006_v16 = vsel %vm788_vm1, %v2990_v23, %v3596_v17  ;;  %v3005_v12 = vsel %vm788_vm1, %v2989_v39, %v3595_v24 }
 0x592   : > { %v3619_v19 = vpop.permute.xlu1 %3618 }
 0x593   : > { %3435 = vmatmul.msk.bf16.gmra.mxu1 %vm788_vm1, %v2740_v54  ;;  %v3609_v1 = vpop.permute.xlu2 %3608  ;;  %v3621_v0 = vunpack.i.h.bf16 %v3619_v19  ;;  %v3620_v25 = vunpack.i.l.bf16 %v3619_v19 }
 0x594   : > { %v3611_v11 = vunpack.i.h.bf16 %v3609_v1  ;;  %v3610_v10 = vunpack.i.l.bf16 %v3609_v1 }
 0x595   : > { %v2994_v27 = vsel %vm625_vm0, %v5532_v60, %v3621_v0  ;;  %v2993_v62 = vsel %vm625_vm0, %v5517_v3, %v3620_v25  ;;  %v5847_v3 = vld [vmem:[%s5957_s3] ss:$0 sm:$0xff] }
 0x596   : > { %v3008_v52 = vsel %vm788_vm1, %v2992_v43, %v3611_v11  ;;  %v3007_v40 = vsel %vm788_vm1, %v2991_v44, %v3610_v10 }
 0x59b   : > { %v3624_v57 = vpop.permute.xlu2 %3623 }
 0x59c   : > { %v3626_v48 = vunpack.i.h.bf16 %v3624_v57  ;;  %v3625_v45 = vunpack.i.l.bf16 %v3624_v57 }
 0x59e   : > { %v3010_v4 = vsel %vm788_vm1, %v2994_v27, %v3626_v48  ;;  %v3009_v13 = vsel %vm788_vm1, %v2993_v62, %v3625_v45 }
 0x5a3   : > { %3436 = vmatmul.msk.bf16.gmra.mxu1 %vm788_vm1, %v2741_v6  ;;  %v3639_v23 = vpop.permute.xlu2 %3638 }
 0x5c3   : > { %v2775_v20 = vpop.f32.mrf.mxu1 }
 0x5cb   : > { %v2777_v50 = vpop.f32.mrf.mxu1 }
 0x5cc   : > { %v3642_v42 = vpack.i.bf16 %v2777_v50, %v2775_v20  ;;  %v3599_v41 = vpop.permute.xlu0 %3598 }
 0x5cd   : > { %v3601_v21 = vunpack.i.h.bf16 %v3599_v41  ;;  %v3600_v14 = vunpack.i.l.bf16 %v3599_v41  ;;  %v3634_v41 = vpop.permute.xlu1 %3633 }
 0x5ce   : > { %3643 = vrot.lane.b32.xlu0 %v3642_v42, %s4049_s6  ;;  %v3636_v39 = vunpack.i.h.bf16 %v3634_v41 }
 0x5cf   : > { %v3022_v56 = vsel %vm3019_vm2, %v3005_v12, %v3600_v14  ;;  %v3023_v2 = vsel %vm3019_vm2, %v3006_v16, %v3601_v21  ;;  %v3635_v21 = vunpack.i.l.bf16 %v3634_v41  ;;  %v3641_v14 = vunpack.i.h.bf16 %v3639_v23 }
 0x5d0   : > { %v3037_v51 = vpack.c.bf16 %v3023_v2, %v3022_v56  ;;  %v3640_v16 = vunpack.i.l.bf16 %v3639_v23  ;;  %v2996_v56 = vsel %vm625_vm0, %v5643_v55, %v3636_v39 }
 0x5d1   : > { %v2995_v2 = vsel %vm625_vm0, %v5636_v22, %v3635_v21  ;;  %v3012_v1 = vsel %vm788_vm1, %v2996_v56, %v3641_v14 }
 0x5d2   : > { %3125 = vmatmul.bf16.gmra.mxu2 %v3037_v51  ;;  %v3011_v9 = vsel %vm788_vm1, %v2995_v2, %v3640_v16 }
 0x5dc   : > { %v3614_v34 = vpop.permute.xlu0 %3613 }
 0x5dd   : > { %v3616_v26 = vunpack.i.h.bf16 %v3614_v34  ;;  %v3615_v31 = vunpack.i.l.bf16 %v3614_v34 }
 0x5df   : > { %v3024_v30 = vsel %vm3019_vm2, %v3007_v40, %v3615_v31  ;;  %v3025_v15 = vsel %vm3019_vm2, %v3008_v52, %v3616_v26 }
 0x5e0   : > { %v3038_v38 = vpack.c.bf16 %v3025_v15, %v3024_v30  ;;  %v3649_v30 = vpop.permute.xlu1 %3648 }
 0x5e1   : > { %v3651_v19 = vunpack.i.h.bf16 %v3649_v30  ;;  %v3650_v57 = vunpack.i.l.bf16 %v3649_v30 }
 0x5e2   : > { %3130 = vmatmul.bf16.gmra.mxu2 %v3038_v38  ;;  %v3654_v38 = vpop.permute.xlu2 %3653 }
 0x5e3   : > { %v3656_v0 = vunpack.i.h.bf16 %v3654_v38  ;;  %v3655_v25 = vunpack.i.l.bf16 %v3654_v38  ;;  %v2998_v48 = vsel %vm625_vm0, %v5657_v37, %v3651_v19  ;;  %v2997_v27 = vsel %vm625_vm0, %v5653_v35, %v3650_v57 }
 0x5e8   : > { %v3664_v37 = vpop.permute.xlu1 %3663 }
 0x5ec   : > { %v3629_v32 = vpop.permute.xlu0 %3628 }
 0x5ed   : > { %v3631_v54 = vunpack.i.h.bf16 %v3629_v32  ;;  %v3630_v8 = vunpack.i.l.bf16 %v3629_v32 }
 0x5ef   : > { %v3026_v18 = vsel %vm3019_vm2, %v3009_v13, %v3630_v8  ;;  %v3027_v63 = vsel %vm3019_vm2, %v3010_v4, %v3631_v54  ;;  %v3014_v4 = vsel %vm788_vm1, %v2998_v48, %v3656_v0  ;;  %v3013_v13 = vsel %vm788_vm1, %v2997_v27, %v3655_v25 }
 0x5f0   : > { %v3039_v46 = vpack.c.bf16 %v3027_v63, %v3026_v18  ;;  %v3679_v23 = vpop.permute.xlu1 %3678 }
 0x5f1   : > { %v3681_v21 = vunpack.i.h.bf16 %v3679_v23  ;;  %v3680_v14 = vunpack.i.l.bf16 %v3679_v23 }
 0x5f2   : > { %3135 = vmatmul.bf16.gmra.mxu2 %v3039_v46 }
 0x5f3   : > { %v3001_v56 = vsel %vm625_vm0, %v5689_v49, %v3680_v14 }
 0x600   : > { %v2780_v29 = vpop.f32.mrf.mxu1 }
 0x608   : > { %v2782_v7 = vpop.f32.mrf.mxu1 }
 0x609   : > { %v3657_v6 = vpack.i.bf16 %v2782_v7, %v2780_v29  ;;  %v3669_v29 = vpop.permute.xlu2 %3668  ;;  %v3666_v7 = vunpack.i.h.bf16 %v3664_v37 }
 0x60a   : > { %v3671_v35 = vunpack.i.h.bf16 %v3669_v29 }
 0x60b   : > { %3658 = vrot.lane.b32.xlu0 %v3657_v6, %s4049_s6  ;;  %v3665_v6 = vunpack.i.l.bf16 %v3664_v37 }
 0x60d   : > { %v3121_v60 = vpop.f32.mrf.mxu2 }
 0x60e   : > { %v3122_v20 = vadd.f32 %v5847_v3, %v3121_v60  ;;  %v3670_v60 = vunpack.i.l.bf16 %v3669_v29 }
 0x610   : > { %3161 = vst [vmem:[%s5853_s20] sm:$0xff] %v3122_v20  ;;  %v2785_v47 = vpop.f32.mrf.mxu1 }
 0x611   : > { %v3684_v39 = vpop.permute.xlu2 %3683 }
 0x612   : > { %v3685_v16 = vunpack.i.l.bf16 %v3684_v39 }
 0x615   : > { %v3123_v53 = vpop.f32.mrf.mxu2 }
 0x616   : > { %v3124_v28 = vadd.f32 %v5847_v3, %v3123_v53  ;;  %v2999_v53 = vsel %vm625_vm0, %v5668_v33, %v3665_v6 }
 0x618   : > { %3162 = vst [vmem:[%s5853_s20 + $0x8] sm:$0xff] %v3124_v28  ;;  %v2787_v59 = vpop.f32.mrf.mxu1 }
 0x619   : > { %v3672_v17 = vpack.i.bf16 %v2787_v59, %v2785_v47  ;;  %v3000_v47 = vsel %vm625_vm0, %v5683_v61, %v3666_v7  ;;  %v3686_v61 = vunpack.i.h.bf16 %v3684_v39 }
 0x61b   : > { %3673 = vrot.lane.b32.xlu0 %v3672_v17, %s4049_s6  ;;  %v3016_v17 = vsel %vm788_vm1, %v3000_v47, %v3671_v35 }
 0x620   : > { %v2790_v24 = vpop.f32.mrf.mxu1 }
 0x628   : > { %v2792_v50 = vpop.f32.mrf.mxu1 }
 0x629   : > { %v3687_v42 = vpack.i.bf16 %v2792_v50, %v2790_v24  ;;  %v3015_v24 = vsel %vm788_vm1, %v2999_v53, %v3670_v60 }
 0x62b   : > { %3688 = vrot.lane.b32.xlu0 %v3687_v42, %s4049_s6 }
 0x640   : > { %v3644_v12 = vpop.permute.xlu0 %3643 }
 0x641   : > { %v3646_v51 = vunpack.i.h.bf16 %v3644_v12  ;;  %v3645_v36 = vunpack.i.l.bf16 %v3644_v12  ;;  %v3002_v12 = vsel %vm625_vm0, %v5697_v5, %v3681_v21 }
 0x643   : > { %v3028_v58 = vsel %vm3019_vm2, %v3011_v9, %v3645_v36  ;;  %v3029_v11 = vsel %vm3019_vm2, %v3012_v1, %v3646_v51  ;;  %v3018_v36 = vsel %vm788_vm1, %v3002_v12, %v3686_v61  ;;  %v3017_v1 = vsel %vm788_vm1, %v3001_v56, %v3685_v16 }
 0x644   : > { %v3040_v10 = vpack.c.bf16 %v3029_v11, %v3028_v58 }
 0x646   : > { %3140 = vmatmul.bf16.gmra.mxu2 %v3040_v10 }
 0x655   : > { %v3126_v34 = vpop.f32.mrf.mxu2 }
 0x656   : > { %v3127_v55 = vadd.f32 %v5847_v3, %v3126_v34 }
 0x658   : > { %3163 = vst [vmem:[%s5853_s20 + $0x10] sm:$0xff] %v3127_v55 }
 0x65d   : > { %v3128_v22 = vpop.f32.mrf.mxu2 }
 0x65e   : > { %v3129_v43 = vadd.f32 %v5847_v3, %v3128_v22 }
 0x660   : > { %3164 = vst [vmem:[%s5853_s20 + $0x18] sm:$0xff] %v3129_v43 }
 0x665   : > { %v3131_v44 = vpop.f32.mrf.mxu2 }
 0x666   : > { %v3132_v26 = vadd.f32 %v5847_v3, %v3131_v44 }
 0x668   : > { %3165 = vst [vmem:[%s5853_s20 + $0x20] sm:$0xff] %v3132_v26 }
 0x66d   : > { %v3133_v31 = vpop.f32.mrf.mxu2 }
 0x66e   : > { %v3134_v52 = vadd.f32 %v5847_v3, %v3133_v31 }
 0x670   : > { %3166 = vst [vmem:[%s5853_s20 + $0x28] sm:$0xff] %v3134_v52 }
 0x675   : > { %v3136_v40 = vpop.f32.mrf.mxu2 }
 0x676   : > { %v3137_v15 = vadd.f32 %v5847_v3, %v3136_v40 }
 0x678   : > { %3167 = vst [vmem:[%s5853_s20 + $0x30] sm:$0xff] %v3137_v15 }
 0x67d   : > { %v3659_v45 = vpop.permute.xlu0 %3658  ;;  %v3138_v32 = vpop.f32.mrf.mxu2 }
 0x67e   : > { %v3661_v62 = vunpack.i.h.bf16 %v3659_v45  ;;  %v3660_v54 = vunpack.i.l.bf16 %v3659_v45  ;;  %v3139_v8 = vadd.f32 %v5847_v3, %v3138_v32 }
 0x680   : > { %3168 = vst [vmem:[%s5853_s20 + $0x38] sm:$0xff] %v3139_v8  ;;  %v3030_v18 = vsel %vm3019_vm2, %v3013_v13, %v3660_v54  ;;  %v3031_v63 = vsel %vm3019_vm2, %v3014_v4, %v3661_v62 }
 0x681   : > { %v3041_v46 = vpack.c.bf16 %v3031_v63, %v3030_v18 }
 0x683   : > { %3145 = vmatmul.bf16.gmra.mxu2 %v3041_v46 }
 0x68d   : > { %v3674_v20 = vpop.permute.xlu0 %3673 }
 0x68e   : > { %v3676_v28 = vunpack.i.h.bf16 %v3674_v20  ;;  %v3675_v59 = vunpack.i.l.bf16 %v3674_v20 }
 0x690   : > { %v3032_v50 = vsel %vm3019_vm2, %v3015_v24, %v3675_v59  ;;  %v3033_v42 = vsel %vm3019_vm2, %v3016_v17, %v3676_v28 }
 0x691   : > { %v3042_v41 = vpack.c.bf16 %v3033_v42, %v3032_v50 }
 0x693   : > { %3150 = vmatmul.bf16.gmra.mxu2 %v3042_v41 }
 0x69d   : > { %v3689_v33 = vpop.permute.xlu0 %3688 }
 0x69e   : > { %v3691_v2 = vunpack.i.h.bf16 %v3689_v33  ;;  %v3690_v51 = vunpack.i.l.bf16 %v3689_v33 }
 0x6a0   : > { %v3034_v9 = vsel %vm3019_vm2, %v3017_v1, %v3690_v51  ;;  %v3035_v58 = vsel %vm3019_vm2, %v3018_v36, %v3691_v2 }
 0x6a1   : > { %v3043_v11 = vpack.c.bf16 %v3035_v58, %v3034_v9 }
 0x6a3   : > { %3155 = vmatmul.bf16.gmra.mxu2 %v3043_v11 }
 0x6c9   : > { %v3141_v10 = vpop.f32.mrf.mxu2 }
 0x6ca   : > { %v3142_v5 = vadd.f32 %v5847_v3, %v3141_v10 }
 0x6cc   : > { %3169 = vst [vmem:[%s5853_s20 + $0x40] sm:$0xff] %v3142_v5 }
 0x6d1   : > { %v3143_v49 = vpop.f32.mrf.mxu2 }
 0x6d2   : > { %v3144_v34 = vadd.f32 %v5847_v3, %v3143_v49 }
 0x6d4   : > { %3170 = vst [vmem:[%s5853_s20 + $0x48] sm:$0xff] %v3144_v34 }
 0x706   : > { %v3146_v55 = vpop.f32.mrf.mxu2 }
 0x707   : > { %v3147_v22 = vadd.f32 %v5847_v3, %v3146_v55 }
 0x709   : > { %3171 = vst [vmem:[%s5853_s20 + $0x50] sm:$0xff] %v3147_v22 }
 0x70e   : > { %v3148_v43 = vpop.f32.mrf.mxu2 }
 0x70f   : > { %v3149_v44 = vadd.f32 %v5847_v3, %v3148_v43 }
 0x711   : > { %3172 = vst [vmem:[%s5853_s20 + $0x58] sm:$0xff] %v3149_v44 }
 0x716   : > { %v3151_v26 = vpop.f32.mrf.mxu2 }
 0x717   : > { %v3152_v31 = vadd.f32 %v5847_v3, %v3151_v26 }
 0x719   : > { %3173 = vst [vmem:[%s5853_s20 + $0x60] sm:$0xff] %v3152_v31 }
 0x71e   : > { %v3153_v52 = vpop.f32.mrf.mxu2 }
 0x71f   : > { %v3154_v40 = vadd.f32 %v5847_v3, %v3153_v52 }
 0x721   : > { %3174 = vst [vmem:[%s5853_s20 + $0x68] sm:$0xff] %v3154_v40 }
 0x726   : > { %v3156_v30 = vpop.f32.mrf.mxu2 }
 0x727   : > { %v3157_v15 = vadd.f32 %v5847_v3, %v3156_v30 }
 0x729   : > { %3175 = vst [vmem:[%s5853_s20 + $0x70] sm:$0xff] %v3157_v15 }
 0x72e   : > { %v3158_v38 = vpop.f32.mrf.mxu2 }
 0x72f   : > { %v3159_v19 = vadd.f32 %v5847_v3, %v3158_v38 }
 0x731   : > { %3176 = vst [vmem:[%s5853_s20 + $0x78] sm:$0xff] %v3159_v19 }
 0x732   : > { %4006 = shalt.err (!%p4003_p4)
}
 0x733   : > { %s4052_s7 = smov 128   ;;  %s4053_s14 = smov 8  }
 0x734   : > { %3521 = dma.vmem_to_hbm [thread:$0]  (%p4129_p11), %s3192_s25, 2048, %s3194_s30, %s3178_s26, %s4052_s7, %s4052_s7, %s4053_s14  }
 0x735 PF: > { %s3208_s13 = sand.u32 1, %s4033_s15   ;;  %p6004_p7 = scmp.ge.s32.totalorder %s4045_s18, 2 }
 0x736   : > { %s3209_s20 = scalar_lea.sflag [#allocation4], %s3208_s13 }
 0x737   : > { %p3528_p5 = pnand %p6004_p7, %p4133_p12 }
 0x739   : > { %p3529_p8 = pneg %p3528_p5 }
 0x73b   : > { %4028 = dma.done.wait (%p3529_p8), %s3209_s20, 2048  }
 0x73c   : > { %4030 = vsyncadd (%p3529_p8), %s3209_s20, 4294965248  ;;  %p17_p10 = scmp.ge.s32.totalorder %s4104_s21, 4   ;;  %s6005_s15 = smov %s4037_s16 }
 0x73d   : > { %s6006_s16 = smov %s4041_s17  ;;  %s6007_s17 = smov %s4116_s24 }
 0x73e   : > { %s6008_s18 = smov %s4104_s21  ;;  %19 = sbr.rel (!%p17_p10) target bundleno = 5 (0x5), region = 81 }
 0x743   :  { %3215 = vsyncpa [#allocation3], 1 }
 0x744   :  { %3217 = vsyncpa [#allocation3 + $0x1], 1 }
 0x745   :  { %3218 = vsyncpa [#allocation4], 1 }
 0x746   :  { %3220 = vsyncpa [#allocation4 + $0x1], 1 }

</bundles_post_ra>
